<compile_context>
chip_gen: v6e
topology: v6e:2x2x1
jax: 0.10.0
libtpu: 0.0.40
codegen_flags: <defaults>
</compile_context>

<pallas_src>
import functools
import math

import jax
import jax.numpy as jnp
from jax.experimental import pallas as pl
from jax.experimental.pallas import tpu as pltpu


# ----------------------------------------------------------------------------
# helpers
# ----------------------------------------------------------------------------
def _softplus(v):
    # numerically safe softplus (matches torch.nn.functional.softplus threshold)
    return jnp.where(v > 20.0, v, jnp.log(1.0 + jnp.exp(jnp.minimum(v, 20.0))))


def _sigmoid_ref(v):
    return 1.0 / (1.0 + jnp.exp(-v))


def _silu_ref(v):
    return v * _sigmoid_ref(v)


def _silu_k(v):
    # in-kernel SiLU: exp + approx reciprocal both on the EUP (error ~2^-12)
    return v * pl.reciprocal(1.0 + jnp.exp(-v), approx=True)


# ----------------------------------------------------------------------------
# fused Pallas kernel: embedding + n_layers Mamba blocks + head, whole batch
# ----------------------------------------------------------------------------
def _fused_forward_kernel(feat_ref, emb_w_ref, emb_b_ref,
                          w_in_ref, conv_w_ref, conv_b_ref,
                          w_proj_ref, b_dt_ref, a_ref, d_ref,
                          w_out_ref, w_outhd_ref, head_b_ref,
                          tile_ref, red_ref,
                          o_ref,
                          dA_ref, dBu_ref, hs_ref, cexp_ref,
                          *, n_layers, bsz, seq, d_inner, d_state, d_conv):
    f32 = jnp.float32
    M = bsz * seq
    dsdi = d_state * d_inner
    cpad = (d_conv - 1) * bsz

    # scan chunking: aligned (8, dsdi) tiles whenever B divides 8
    if 8 % bsz == 0 and seq % (8 // bsz) == 0:
        spc = 8 // bsz
    else:
        spc = 1          # correct (but slower, masked-store) fallback
    rows = spc * bsz
    n_chunks = seq // spc

    # ---- embedding ----------------------------------------------------------
    x = jnp.dot(feat_ref[...], emb_w_ref[...], preferred_element_type=f32)
    x = x + emb_b_ref[...]                                        # (M, d_model)

    T = tile_ref[...]     # (d_inner, dsdi): replicates a (M, d_inner) vector ds times
    R = red_ref[...]      # (dsdi, d_inner): sums over the d_state lane groups

    for l in range(n_layers):                       # static unroll over layers
        # ---- single fused input projection; slice conv / gate branches -------
        xz = jnp.dot(x, w_in_ref[l], preferred_element_type=f32)    # (M, 2*di)
        xc = xz[:, :d_inner]                                         # conv branch
        res = xz[:, d_inner:]                                        # gate branch

        # ---- causal depthwise conv: value-level whole-B row shifts -----------
        cw = conv_w_ref[l]                                           # (d_conv, di)
        xp = jnp.concatenate([jnp.zeros((cpad, d_inner), f32), xc], axis=0)
        conv = xc * cw[d_conv - 1:d_conv, :]          # shift-0 tap is xc itself
        for k in range(d_conv - 1):                                  # static
            conv = conv + xp[k * bsz:k * bsz + M, :] * cw[k:k + 1, :]
        conv = conv + conv_b_ref[l]                   # (1, di) implicit broadcast
        xs = _silu_k(conv)                                           # (M, di)

        # ---- fused SSM projections: [B*expand | C*expand | dt] in one matmul -
        proj = jnp.dot(xs, w_proj_ref[l], preferred_element_type=f32)  # (M, 2*dsdi+di)
        b_exp = proj[:, :dsdi]                                          # (M, dsdi)
        cexp_ref[...] = proj[:, dsdi:2 * dsdi]        # stage C; reload post-scan
        dt = _softplus(proj[:, 2 * dsdi:] + b_dt_ref[l])                # (M, di)

        # ---- lane-replicate dt and dt*xs with ONE one-hot matmul --------------
        both = jnp.dot(jnp.concatenate([dt, dt * xs], axis=0), T,
                       preferred_element_type=f32)                      # (2M, dsdi)
        dA_ref[...] = jnp.exp(both[:M, :] * a_ref[l])                   # exp(dt*A)
        dBu_ref[...] = both[M:, :] * b_exp                              # dt*B*u

        # ---- sequential selective scan: fori_loop over aligned chunks --------
        def scan_chunk(c, h):
            base = pl.multiple_of(c * rows, rows)
            da = dA_ref[pl.ds(base, rows), :]          # one aligned tile load
            db = dBu_ref[pl.ds(base, rows), :]
            outs = []
            for t in range(spc):                       # static inner unroll
                lo, hi = t * bsz, (t + 1) * bsz
                h = da[lo:hi, :] * h + db[lo:hi, :]
                outs.append(h)
            blk = outs[0] if spc == 1 else jnp.concatenate(outs, axis=0)
            hs_ref[pl.ds(base, rows), :] = blk         # one aligned tile store
            return h

        jax.lax.fori_loop(0, n_chunks, scan_chunk, jnp.zeros((bsz, dsdi), f32))

        # ---- contract state with C (MXU group-sum), skip, gate, out proj -----
        ys = jnp.dot(hs_ref[...] * cexp_ref[...], R, preferred_element_type=f32)
        y = (ys + xs * d_ref[l]) * _silu_k(res)

        if l < n_layers - 1:
            x = jnp.dot(y, w_out_ref[l], preferred_element_type=f32)   # (M, dm)
        else:
            # classification head folded into the last output projection
            logits = jnp.dot(y, w_outhd_ref[...], preferred_element_type=f32)
            logits = logits + head_b_ref[...]
            o_ref[...] = 1.0 / (1.0 + jnp.exp(-logits))     # exact sigmoid


# ----------------------------------------------------------------------------
# host-side parameter preparation: fold / fuse / stack for the kernel
# ----------------------------------------------------------------------------
def prepare_params(params, cfg):
    f32 = jnp.float32
    di, ds, dtr = cfg["d_inner"], cfg["d_state"], cfg["dt_rank"]
    nl = cfg["n_layers"]
    dsdi = ds * di
    lanes = jnp.arange(dsdi)
    # expand: (M, ds)    -> (M, ds*di)  (repeat each state over d_inner lanes)
    # tile:   (M, di)    -> (M, ds*di)  (tile the d_inner vector ds times)
    # red:    (M, ds*di) -> (M, di)     (sum over the ds lane groups)
    expand = (lanes[None, :] // di == jnp.arange(ds)[:, None]).astype(f32)
    tile = (lanes[None, :] % di == jnp.arange(di)[:, None]).astype(f32)
    red = tile.T

    w_in, conv_w, conv_b, w_proj, b_dt, a_flat, d_vec, w_out = ([] for _ in range(8))
    for li, lp in enumerate(params["layers"]):
        w_xp = lp["w_xproj"]
        w_in.append(lp["w_in"])                                   # fused (dm, 2*di)
        conv_w.append(lp["conv_w"])
        conv_b.append(lp["conv_b"])
        w_be = w_xp[:, dtr:dtr + ds] @ expand                     # (di, dsdi)
        w_ce = w_xp[:, dtr + ds:] @ expand                        # (di, dsdi)
        w_dt = w_xp[:, :dtr] @ lp["w_dt"]                         # (di, di)
        w_proj.append(jnp.concatenate([w_be, w_ce, w_dt], axis=1))  # (di, 2*dsdi+di)
        b_dt.append(lp["b_dt"])
        a_flat.append((-jnp.exp(lp["A_log_t"])).reshape(1, dsdi))
        d_vec.append(lp["D"])
        if li < nl - 1:
            w_out.append(lp["w_out"])
    if not w_out:                                                 # nl == 1 guard
        w_out.append(jnp.zeros_like(params["layers"][0]["w_out"]))
    w_outhd = params["layers"][-1]["w_out"] @ params["head_w"]    # (di, 1) fold

    return dict(
        emb_w=params["emb_w"].astype(f32), emb_b=params["emb_b"].astype(f32),
        w_in=jnp.stack(w_in).astype(f32),
        conv_w=jnp.stack(conv_w).astype(f32), conv_b=jnp.stack(conv_b).astype(f32),
        w_proj=jnp.stack(w_proj).astype(f32), b_dt=jnp.stack(b_dt).astype(f32),
        a_flat=jnp.stack(a_flat).astype(f32), d=jnp.stack(d_vec).astype(f32),
        w_out=jnp.stack(w_out).astype(f32),
        w_outhd=w_outhd.astype(f32), head_b=params["head_b"].astype(f32),
        tile=tile, red=red)


def forward_pallas(features, kparams, cfg):
    B, L, nin = features.shape
    assert nin == cfg["input_feature_dim"], "Expected 11D features"
    di, ds, dconv, nl = cfg["d_inner"], cfg["d_state"], cfg["d_conv"], cfg["n_layers"]
    dsdi = ds * di
    M = B * L

    # time-major flat layout: row index = t*B + b
    feat_tm = jnp.transpose(features, (1, 0, 2)).reshape(M, nin)

    kernel = functools.partial(
        _fused_forward_kernel, n_layers=nl, bsz=B, seq=L,
        d_inner=di, d_state=ds, d_conv=dconv)

    out_flat = pl.pallas_call(
        kernel,
        out_shape=jax.ShapeDtypeStruct((M, 1), jnp.float32),
        scratch_shapes=[
            pltpu.VMEM((M, dsdi), jnp.float32),   # deltaA   (lane-dense)
            pltpu.VMEM((M, dsdi), jnp.float32),   # deltaB*u (lane-dense)
            pltpu.VMEM((M, dsdi), jnp.float32),   # scan states
            pltpu.VMEM((M, dsdi), jnp.float32),   # staged C (short live range)
        ],
        compiler_params=pltpu.CompilerParams(vmem_limit_bytes=32 * 1024 * 1024),
    )(feat_tm, kparams["emb_w"], kparams["emb_b"],
      kparams["w_in"], kparams["conv_w"], kparams["conv_b"],
      kparams["w_proj"], kparams["b_dt"], kparams["a_flat"], kparams["d"],
      kparams["w_out"], kparams["w_outhd"], kparams["head_b"],
      kparams["tile"], kparams["red"])

    return jnp.transpose(out_flat.reshape(L, B, 1), (1, 0, 2))


# ----------------------------------------------------------------------------
# pure-JAX reference (natural parameter layout, PyTorch semantics)
# ----------------------------------------------------------------------------
def _ref_mamba(x, p, cfg):
    B, L, dm = x.shape
    di, ds, dconv, dtr = cfg["d_inner"], cfg["d_state"], cfg["d_conv"], cfg["dt_rank"]
    xz = x @ p["w_in"]
    xc, res = xz[..., :di], xz[..., di:]
    xpad = jnp.pad(xc, ((0, 0), (dconv - 1, 0), (0, 0)))
    conv = sum(xpad[:, k:k + L, :] * p["conv_w"][k][None, None, :] for k in range(dconv))
    conv = conv + p["conv_b"]
    xs = _silu_ref(conv)
    x_dbl = xs @ p["w_xproj"]
    dt_in, Bm, Cm = x_dbl[..., :dtr], x_dbl[..., dtr:dtr + ds], x_dbl[..., dtr + ds:]
    dt = _softplus(dt_in @ p["w_dt"] + p["b_dt"])
    A = -jnp.exp(p["A_log_t"])                                     # (ds, di)
    dA = jnp.exp(dt[:, :, None, :] * A[None, None])                # (B, L, ds, di)
    dBu = dt[:, :, None, :] * Bm[:, :, :, None] * xs[:, :, None, :]

    def step(h, inp):
        dA_t, dBu_t, C_t = inp
        h = dA_t * h + dBu_t
        return h, jnp.sum(h * C_t[:, :, None], axis=1)

    h0 = jnp.zeros((B, ds, di), jnp.float32)
    _, ys = jax.lax.scan(step, h0, (dA.transpose(1, 0, 2, 3),
                                    dBu.transpose(1, 0, 2, 3),
                                    Cm.transpose(1, 0, 2)))
    y = ys.transpose(1, 0, 2) + xs * p["D"]
    y = y * _silu_ref(res)
    return y @ p["w_out"]


def forward_ref(features, params, cfg):
    h = features @ params["emb_w"] + params["emb_b"]
    for lp in params["layers"]:
        h = _ref_mamba(h, lp, cfg)
    return _sigmoid_ref(h @ params["head_w"] + params["head_b"])


# ----------------------------------------------------------------------------
# deterministic synthetic parameter initialization (natural layout)
# ----------------------------------------------------------------------------
def init_params(key, cfg):
    f32 = jnp.float32
    dm, di, ds = cfg["d_model"], cfg["d_inner"], cfg["d_state"]
    dconv, dtr, nin = cfg["d_conv"], cfg["dt_rank"], cfg["input_feature_dim"]

    def nrm(k, shape, scale=0.05):
        return scale * jax.random.normal(k, shape, f32)

    keys = jax.random.split(key, 2 + 8 * cfg["n_layers"] + 2)
    ki = iter(range(len(keys)))
    params = {
        "emb_w": nrm(keys[next(ki)], (nin, dm)),
        "emb_b": nrm(keys[next(ki)], (1, dm)),
        "layers": [],
        "head_w": nrm(keys[-2], (dm, 1), 0.1),
        "head_b": nrm(keys[-1], (1, 1), 0.1),
    }
    for _ in range(cfg["n_layers"]):
        a_log_t = jnp.log(jnp.broadcast_to(
            jnp.arange(1, ds + 1, dtype=f32)[:, None], (ds, di)))  # (ds, di)
        params["layers"].append({
            "w_in":    nrm(keys[next(ki)], (dm, 2 * di)),
            "conv_w":  nrm(keys[next(ki)], (dconv, di), 0.2),
            "conv_b":  nrm(keys[next(ki)], (1, di), 0.1),
            "w_xproj": nrm(keys[next(ki)], (di, dtr + 2 * ds)),
            "w_dt":    nrm(keys[next(ki)], (dtr, di), 0.2),
            "b_dt":    nrm(keys[next(ki)], (1, di), 0.1),
            "A_log_t": a_log_t,
            "D":       jnp.ones((1, di), f32),
            "w_out":   nrm(keys[next(ki)], (di, dm)),
        })
        next(ki); next(ki)  # burn remaining per-layer keys for determinism
    return params


# ----------------------------------------------------------------------------
if __name__ == "__main__":
    d_model, expand = 32, 2
    cfg = {
        "input_feature_dim": 11,
        "d_model": d_model,
        "d_state": 8,
        "d_conv": 4,
        "expand": expand,
        "n_layers": 2,
        "d_inner": expand * d_model,
        "dt_rank": math.ceil(d_model / 16),
    }

    root = jax.random.PRNGKey(0)
    k_param, k_data = jax.random.split(root)
    params = init_params(k_param, cfg)
    kparams = prepare_params(params, cfg)

    B, L = 2, 16
    features = jax.random.normal(k_data, (B, L, cfg["input_feature_dim"]), jnp.float32)

    probs = jax.block_until_ready(forward_pallas(features, kparams, cfg))
    assert probs.shape == (B, L, 1)
    assert bool(jnp.all((probs >= 0.0) & (probs <= 1.0)))

    ref = forward_ref(features, params, cfg)
    max_err = float(jnp.max(jnp.abs(probs - ref)))
    assert max_err < 2e-2, f"mismatch vs reference: {max_err}"

    print("KERNEL_OK")
</pallas_src>

<mosaic_0001>
module attributes {stable_mosaic.version = 11 : i64} {
  func.func @_fused_forward_kernel(%arg0: memref<32x11xf32, #tpu.memory_space<vmem>>, %arg1: memref<11x32xf32, #tpu.memory_space<vmem>>, %arg2: memref<1x32xf32, #tpu.memory_space<vmem>>, %arg3: memref<2x32x128xf32, #tpu.memory_space<vmem>>, %arg4: memref<2x4x64xf32, #tpu.memory_space<vmem>>, %arg5: memref<2x1x64xf32, #tpu.memory_space<vmem>>, %arg6: memref<2x64x1088xf32, #tpu.memory_space<vmem>>, %arg7: memref<2x1x64xf32, #tpu.memory_space<vmem>>, %arg8: memref<2x1x512xf32, #tpu.memory_space<vmem>>, %arg9: memref<2x1x64xf32, #tpu.memory_space<vmem>>, %arg10: memref<1x64x32xf32, #tpu.memory_space<vmem>>, %arg11: memref<64x1xf32, #tpu.memory_space<vmem>>, %arg12: memref<1x1xf32, #tpu.memory_space<vmem>>, %arg13: memref<64x512xf32, #tpu.memory_space<vmem>>, %arg14: memref<512x64xf32, #tpu.memory_space<vmem>>, %arg15: memref<32x1xf32, #tpu.memory_space<vmem>>, %arg16: memref<32x512xf32, #tpu.memory_space<vmem>>, %arg17: memref<32x512xf32, #tpu.memory_space<vmem>>, %arg18: memref<32x512xf32, #tpu.memory_space<vmem>>, %arg19: memref<32x512xf32, #tpu.memory_space<vmem>>) attributes {dimension_semantics = [], scalar_prefetch = 0 : i64, scratch_operands = 4 : i64, tpu.core_type = #tpu.core_type<tc>} {
    %c0 = arith.constant 0 : index
    %c0_0 = arith.constant 0 : index
    %0 = vector.load %arg0[%c0, %c0_0] : memref<32x11xf32, #tpu.memory_space<vmem>>, vector<32x11xf32>
    %c0_1 = arith.constant 0 : index
    %c0_2 = arith.constant 0 : index
    %1 = vector.load %arg1[%c0_1, %c0_2] : memref<11x32xf32, #tpu.memory_space<vmem>>, vector<11x32xf32>
    %cst = arith.constant dense<0.000000e+00> : vector<32x32xf32>
    %2 = tpu.matmul %0, %1, %cst {dimension_numbers = #tpu.dot_dimension_numbers<[1], [0], [0], [1], [0, 0, 1, 1], [], []>} : vector<32x11xf32>, vector<11x32xf32>, vector<32x32xf32> -> vector<32x32xf32>
    %c0_3 = arith.constant 0 : index
    %c0_4 = arith.constant 0 : index
    %3 = vector.load %arg2[%c0_3, %c0_4] : memref<1x32xf32, #tpu.memory_space<vmem>>, vector<1x32xf32>
    %4 = vector.broadcast %3 : vector<1x32xf32> to vector<32x32xf32>
    %5 = arith.addf %2, %4 : vector<32x32xf32>
    %c0_5 = arith.constant 0 : index
    %c0_6 = arith.constant 0 : index
    %6 = vector.load %arg13[%c0_5, %c0_6] : memref<64x512xf32, #tpu.memory_space<vmem>>, vector<64x512xf32>
    %c0_7 = arith.constant 0 : index
    %c0_8 = arith.constant 0 : index
    %7 = vector.load %arg14[%c0_7, %c0_8] : memref<512x64xf32, #tpu.memory_space<vmem>>, vector<512x64xf32>
    %c0_9 = arith.constant 0 : index
    %c0_10 = arith.constant 0 : index
    %c0_11 = arith.constant 0 : index
    %8 = vector.load %arg3[%c0_9, %c0_10, %c0_11] : memref<2x32x128xf32, #tpu.memory_space<vmem>>, vector<1x32x128xf32>
    %9 = vector.shape_cast %8 : vector<1x32x128xf32> to vector<32x128xf32>
    %cst_12 = arith.constant dense<0.000000e+00> : vector<32x128xf32>
    %10 = tpu.matmul %5, %9, %cst_12 {dimension_numbers = #tpu.dot_dimension_numbers<[1], [0], [0], [1], [0, 0, 1, 1], [], []>} : vector<32x32xf32>, vector<32x128xf32>, vector<32x128xf32> -> vector<32x128xf32>
    %11 = vector.extract_strided_slice %10 {offsets = [0, 0], sizes = [32, 64], strides = [1, 1]} : vector<32x128xf32> to vector<32x64xf32>
    %12 = vector.extract_strided_slice %10 {offsets = [0, 64], sizes = [32, 64], strides = [1, 1]} : vector<32x128xf32> to vector<32x64xf32>
    %c0_13 = arith.constant 0 : index
    %c0_14 = arith.constant 0 : index
    %c0_15 = arith.constant 0 : index
    %13 = vector.load %arg4[%c0_13, %c0_14, %c0_15] : memref<2x4x64xf32, #tpu.memory_space<vmem>>, vector<1x4x64xf32>
    %14 = vector.shape_cast %13 : vector<1x4x64xf32> to vector<4x64xf32>
    %cst_16 = arith.constant 0.000000e+00 : f32
    %15 = vector.broadcast %cst_16 : f32 to vector<6x64xf32>
    %16 = tpu.concatenate %15, %11 in 0 : vector<6x64xf32>, vector<32x64xf32> -> vector<38x64xf32>
    %17 = vector.extract_strided_slice %14 {offsets = [3, 0], sizes = [1, 64], strides = [1, 1]} : vector<4x64xf32> to vector<1x64xf32>
    %18 = vector.broadcast %17 : vector<1x64xf32> to vector<32x64xf32>
    %19 = arith.mulf %11, %18 : vector<32x64xf32>
    %20 = vector.extract_strided_slice %16 {offsets = [0, 0], sizes = [32, 64], strides = [1, 1]} : vector<38x64xf32> to vector<32x64xf32>
    %21 = vector.extract_strided_slice %14 {offsets = [0, 0], sizes = [1, 64], strides = [1, 1]} : vector<4x64xf32> to vector<1x64xf32>
    %22 = vector.broadcast %21 : vector<1x64xf32> to vector<32x64xf32>
    %23 = arith.mulf %20, %22 : vector<32x64xf32>
    %24 = arith.addf %19, %23 : vector<32x64xf32>
    %25 = vector.extract_strided_slice %16 {offsets = [2, 0], sizes = [32, 64], strides = [1, 1]} : vector<38x64xf32> to vector<32x64xf32>
    %26 = vector.extract_strided_slice %14 {offsets = [1, 0], sizes = [1, 64], strides = [1, 1]} : vector<4x64xf32> to vector<1x64xf32>
    %27 = vector.broadcast %26 : vector<1x64xf32> to vector<32x64xf32>
    %28 = arith.mulf %25, %27 : vector<32x64xf32>
    %29 = arith.addf %24, %28 : vector<32x64xf32>
    %30 = vector.extract_strided_slice %16 {offsets = [4, 0], sizes = [32, 64], strides = [1, 1]} : vector<38x64xf32> to vector<32x64xf32>
    %31 = vector.extract_strided_slice %14 {offsets = [2, 0], sizes = [1, 64], strides = [1, 1]} : vector<4x64xf32> to vector<1x64xf32>
    %32 = vector.broadcast %31 : vector<1x64xf32> to vector<32x64xf32>
    %33 = arith.mulf %30, %32 : vector<32x64xf32>
    %34 = arith.addf %29, %33 : vector<32x64xf32>
    %c0_17 = arith.constant 0 : index
    %c0_18 = arith.constant 0 : index
    %c0_19 = arith.constant 0 : index
    %35 = vector.load %arg5[%c0_17, %c0_18, %c0_19] : memref<2x1x64xf32, #tpu.memory_space<vmem>>, vector<1x1x64xf32>
    %36 = vector.shape_cast %35 : vector<1x1x64xf32> to vector<1x64xf32>
    %37 = vector.broadcast %36 : vector<1x64xf32> to vector<32x64xf32>
    %38 = arith.addf %34, %37 : vector<32x64xf32>
    %cst_20 = arith.constant 0.000000e+00 : f32
    %39 = vector.broadcast %cst_20 : f32 to vector<32x64xf32>
    %40 = arith.subf %39, %38 : vector<32x64xf32>
    %41 = math.exp %40 : vector<32x64xf32>
    %cst_21 = arith.constant 1.000000e+00 : f32
    %42 = vector.broadcast %cst_21 : f32 to vector<32x64xf32>
    %43 = arith.addf %42, %41 : vector<32x64xf32>
    %44 = tpu.reciprocal %43 {approx = true} : vector<32x64xf32> -> vector<32x64xf32>
    %45 = arith.mulf %38, %44 : vector<32x64xf32>
    %c0_22 = arith.constant 0 : index
    %c0_23 = arith.constant 0 : index
    %c0_24 = arith.constant 0 : index
    %46 = vector.load %arg6[%c0_22, %c0_23, %c0_24] : memref<2x64x1088xf32, #tpu.memory_space<vmem>>, vector<1x64x1088xf32>
    %47 = vector.shape_cast %46 : vector<1x64x1088xf32> to vector<64x1088xf32>
    %cst_25 = arith.constant dense<0.000000e+00> : vector<32x1088xf32>
    %48 = tpu.matmul %45, %47, %cst_25 {dimension_numbers = #tpu.dot_dimension_numbers<[1], [0], [0], [1], [0, 0, 1, 1], [], []>} : vector<32x64xf32>, vector<64x1088xf32>, vector<32x1088xf32> -> vector<32x1088xf32>
    %49 = vector.extract_strided_slice %48 {offsets = [0, 0], sizes = [32, 512], strides = [1, 1]} : vector<32x1088xf32> to vector<32x512xf32>
    %50 = vector.extract_strided_slice %48 {offsets = [0, 512], sizes = [32, 512], strides = [1, 1]} : vector<32x1088xf32> to vector<32x512xf32>
    %c0_26 = arith.constant 0 : index
    %c0_27 = arith.constant 0 : index
    %51 = vector.load %arg19[%c0_26, %c0_27] : memref<32x512xf32, #tpu.memory_space<vmem>>, vector<32x512xf32>
    tpu.vector_store %arg19[%c0_26, %c0_27], %50 {strides = array<i32>} : memref<32x512xf32, #tpu.memory_space<vmem>>, vector<32x512xf32>,
    %52 = vector.extract_strided_slice %48 {offsets = [0, 1024], sizes = [32, 64], strides = [1, 1]} : vector<32x1088xf32> to vector<32x64xf32>
    %c0_28 = arith.constant 0 : index
    %c0_29 = arith.constant 0 : index
    %c0_30 = arith.constant 0 : index
    %53 = vector.load %arg7[%c0_28, %c0_29, %c0_30] : memref<2x1x64xf32, #tpu.memory_space<vmem>>, vector<1x1x64xf32>
    %54 = vector.shape_cast %53 : vector<1x1x64xf32> to vector<1x64xf32>
    %55 = vector.broadcast %54 : vector<1x64xf32> to vector<32x64xf32>
    %56 = arith.addf %52, %55 : vector<32x64xf32>
    %cst_31 = arith.constant 2.000000e+01 : f32
    %57 = vector.broadcast %cst_31 : f32 to vector<32x64xf32>
    %58 = arith.cmpf ogt, %56, %57 : vector<32x64xf32>
    %cst_32 = arith.constant 2.000000e+01 : f32
    %59 = vector.broadcast %cst_32 : f32 to vector<32x64xf32>
    %60 = arith.minimumf %56, %59 : vector<32x64xf32>
    %61 = math.exp %60 : vector<32x64xf32>
    %cst_33 = arith.constant 1.000000e+00 : f32
    %62 = vector.broadcast %cst_33 : f32 to vector<32x64xf32>
    %63 = arith.addf %62, %61 : vector<32x64xf32>
    %64 = math.log %63 : vector<32x64xf32>
    %65 = arith.select %58, %56, %64 : vector<32x64xi1>, vector<32x64xf32>
    %66 = arith.mulf %65, %45 : vector<32x64xf32>
    %67 = tpu.concatenate %65, %66 in 0 : vector<32x64xf32>, vector<32x64xf32> -> vector<64x64xf32>
    %cst_34 = arith.constant dense<0.000000e+00> : vector<64x512xf32>
    %68 = tpu.matmul %67, %6, %cst_34 {dimension_numbers = #tpu.dot_dimension_numbers<[1], [0], [0], [1], [0, 0, 1, 1], [], []>} : vector<64x64xf32>, vector<64x512xf32>, vector<64x512xf32> -> vector<64x512xf32>
    %69 = vector.extract_strided_slice %68 {offsets = [0, 0], sizes = [32, 512], strides = [1, 1]} : vector<64x512xf32> to vector<32x512xf32>
    %c0_35 = arith.constant 0 : index
    %c0_36 = arith.constant 0 : index
    %c0_37 = arith.constant 0 : index
    %70 = vector.load %arg8[%c0_35, %c0_36, %c0_37] : memref<2x1x512xf32, #tpu.memory_space<vmem>>, vector<1x1x512xf32>
    %71 = vector.shape_cast %70 : vector<1x1x512xf32> to vector<1x512xf32>
    %72 = vector.broadcast %71 : vector<1x512xf32> to vector<32x512xf32>
    %73 = arith.mulf %69, %72 : vector<32x512xf32>
    %74 = math.exp %73 : vector<32x512xf32>
    %c0_38 = arith.constant 0 : index
    %c0_39 = arith.constant 0 : index
    %75 = vector.load %arg16[%c0_38, %c0_39] : memref<32x512xf32, #tpu.memory_space<vmem>>, vector<32x512xf32>
    tpu.vector_store %arg16[%c0_38, %c0_39], %74 {strides = array<i32>} : memref<32x512xf32, #tpu.memory_space<vmem>>, vector<32x512xf32>,
    %76 = vector.extract_strided_slice %68 {offsets = [32, 0], sizes = [32, 512], strides = [1, 1]} : vector<64x512xf32> to vector<32x512xf32>
    %77 = arith.mulf %76, %49 : vector<32x512xf32>
    %c0_40 = arith.constant 0 : index
    %c0_41 = arith.constant 0 : index
    %78 = vector.load %arg17[%c0_40, %c0_41] : memref<32x512xf32, #tpu.memory_space<vmem>>, vector<32x512xf32>
    tpu.vector_store %arg17[%c0_40, %c0_41], %77 {strides = array<i32>} : memref<32x512xf32, #tpu.memory_space<vmem>>, vector<32x512xf32>,
    %cst_42 = arith.constant 0.000000e+00 : f32
    %79 = vector.broadcast %cst_42 : f32 to vector<2x512xf32>
    %c0_i32 = arith.constant 0 : i32
    %c4_i32 = arith.constant 4 : i32
    %80 = arith.addi %c0_i32, %c4_i32 : i32
    %c1_i32 = arith.constant 1 : i32
    %81 = scf.for %arg20 = %c0_i32 to %80 step %c1_i32 iter_args(%arg21 = %79) -> (vector<2x512xf32>)  : i32 {
      %c8_i32 = arith.constant 8 : i32
      %206 = arith.muli %arg20, %c8_i32 : i32
      %207 = tpu.assume_multiple %206, 8 : i32
      %208 = arith.index_cast %207 : i32 to index
      %c0_115 = arith.constant 0 : index
      %209 = vector.load %arg16[%208, %c0_115] : memref<32x512xf32, #tpu.memory_space<vmem>>, vector<8x512xf32>
      %210 = arith.index_cast %207 : i32 to index
      %c0_116 = arith.constant 0 : index
      %211 = vector.load %arg17[%210, %c0_116] : memref<32x512xf32, #tpu.memory_space<vmem>>, vector<8x512xf32>
      %212 = vector.extract_strided_slice %209 {offsets = [0, 0], sizes = [2, 512], strides = [1, 1]} : vector<8x512xf32> to vector<2x512xf32>
      %213 = arith.mulf %212, %arg21 : vector<2x512xf32>
      %214 = vector.extract_strided_slice %211 {offsets = [0, 0], sizes = [2, 512], strides = [1, 1]} : vector<8x512xf32> to vector<2x512xf32>
      %215 = arith.addf %213, %214 : vector<2x512xf32>
      %216 = vector.extract_strided_slice %209 {offsets = [2, 0], sizes = [2, 512], strides = [1, 1]} : vector<8x512xf32> to vector<2x512xf32>
      %217 = arith.mulf %216, %215 : vector<2x512xf32>
      %218 = vector.extract_strided_slice %211 {offsets = [2, 0], sizes = [2, 512], strides = [1, 1]} : vector<8x512xf32> to vector<2x512xf32>
      %219 = arith.addf %217, %218 : vector<2x512xf32>
      %220 = vector.extract_strided_slice %209 {offsets = [4, 0], sizes = [2, 512], strides = [1, 1]} : vector<8x512xf32> to vector<2x512xf32>
      %221 = arith.mulf %220, %219 : vector<2x512xf32>
      %222 = vector.extract_strided_slice %211 {offsets = [4, 0], sizes = [2, 512], strides = [1, 1]} : vector<8x512xf32> to vector<2x512xf32>
      %223 = arith.addf %221, %222 : vector<2x512xf32>
      %224 = vector.extract_strided_slice %209 {offsets = [6, 0], sizes = [2, 512], strides = [1, 1]} : vector<8x512xf32> to vector<2x512xf32>
      %225 = arith.mulf %224, %223 : vector<2x512xf32>
      %226 = vector.extract_strided_slice %211 {offsets = [6, 0], sizes = [2, 512], strides = [1, 1]} : vector<8x512xf32> to vector<2x512xf32>
      %227 = arith.addf %225, %226 : vector<2x512xf32>
      %228 = tpu.concatenate %215, %219, %223, %227 in 0 : vector<2x512xf32>, vector<2x512xf32>, vector<2x512xf32>, vector<2x512xf32> -> vector<8x512xf32>
      %229 = arith.index_cast %207 : i32 to index
      %c0_117 = arith.constant 0 : index
      %230 = vector.load %arg18[%229, %c0_117] : memref<32x512xf32, #tpu.memory_space<vmem>>, vector<8x512xf32>
      tpu.vector_store %arg18[%229, %c0_117], %228 {strides = array<i32>} : memref<32x512xf32, #tpu.memory_space<vmem>>, vector<8x512xf32>,
      scf.yield %227 : vector<2x512xf32>
    }
    %c4_i32_43 = arith.constant 4 : i32
    %c0_44 = arith.constant 0 : index
    %c0_45 = arith.constant 0 : index
    %82 = vector.load %arg18[%c0_44, %c0_45] : memref<32x512xf32, #tpu.memory_space<vmem>>, vector<32x512xf32>
    %c0_46 = arith.constant 0 : index
    %c0_47 = arith.constant 0 : index
    %83 = vector.load %arg19[%c0_46, %c0_47] : memref<32x512xf32, #tpu.memory_space<vmem>>, vector<32x512xf32>
    %84 = arith.mulf %82, %83 : vector<32x512xf32>
    %cst_48 = arith.constant dense<0.000000e+00> : vector<32x64xf32>
    %85 = tpu.matmul %84, %7, %cst_48 {dimension_numbers = #tpu.dot_dimension_numbers<[1], [0], [0], [1], [0, 0, 1, 1], [], []>} : vector<32x512xf32>, vector<512x64xf32>, vector<32x64xf32> -> vector<32x64xf32>
    %c0_49 = arith.constant 0 : index
    %c0_50 = arith.constant 0 : index
    %c0_51 = arith.constant 0 : index
    %86 = vector.load %arg9[%c0_49, %c0_50, %c0_51] : memref<2x1x64xf32, #tpu.memory_space<vmem>>, vector<1x1x64xf32>
    %87 = vector.shape_cast %86 : vector<1x1x64xf32> to vector<1x64xf32>
    %88 = vector.broadcast %87 : vector<1x64xf32> to vector<32x64xf32>
    %89 = arith.mulf %45, %88 : vector<32x64xf32>
    %90 = arith.addf %85, %89 : vector<32x64xf32>
    %cst_52 = arith.constant 0.000000e+00 : f32
    %91 = vector.broadcast %cst_52 : f32 to vector<32x64xf32>
    %92 = arith.subf %91, %12 : vector<32x64xf32>
    %93 = math.exp %92 : vector<32x64xf32>
    %cst_53 = arith.constant 1.000000e+00 : f32
    %94 = vector.broadcast %cst_53 : f32 to vector<32x64xf32>
    %95 = arith.addf %94, %93 : vector<32x64xf32>
    %96 = tpu.reciprocal %95 {approx = true} : vector<32x64xf32> -> vector<32x64xf32>
    %97 = arith.mulf %12, %96 : vector<32x64xf32>
    %98 = arith.mulf %90, %97 : vector<32x64xf32>
    %c0_54 = arith.constant 0 : index
    %c0_55 = arith.constant 0 : index
    %c0_56 = arith.constant 0 : index
    %99 = vector.load %arg10[%c0_54, %c0_55, %c0_56] : memref<1x64x32xf32, #tpu.memory_space<vmem>>, vector<1x64x32xf32>
    %100 = vector.shape_cast %99 : vector<1x64x32xf32> to vector<64x32xf32>
    %cst_57 = arith.constant dense<0.000000e+00> : vector<32x32xf32>
    %101 = tpu.matmul %98, %100, %cst_57 {dimension_numbers = #tpu.dot_dimension_numbers<[1], [0], [0], [1], [0, 0, 1, 1], [], []>} : vector<32x64xf32>, vector<64x32xf32>, vector<32x32xf32> -> vector<32x32xf32>
    %c1 = arith.constant 1 : index
    %c0_58 = arith.constant 0 : index
    %c0_59 = arith.constant 0 : index
    %102 = vector.load %arg3[%c1, %c0_58, %c0_59] : memref<2x32x128xf32, #tpu.memory_space<vmem>>, vector<1x32x128xf32>
    %103 = vector.shape_cast %102 : vector<1x32x128xf32> to vector<32x128xf32>
    %cst_60 = arith.constant dense<0.000000e+00> : vector<32x128xf32>
    %104 = tpu.matmul %101, %103, %cst_60 {dimension_numbers = #tpu.dot_dimension_numbers<[1], [0], [0], [1], [0, 0, 1, 1], [], []>} : vector<32x32xf32>, vector<32x128xf32>, vector<32x128xf32> -> vector<32x128xf32>
    %105 = vector.extract_strided_slice %104 {offsets = [0, 0], sizes = [32, 64], strides = [1, 1]} : vector<32x128xf32> to vector<32x64xf32>
    %106 = vector.extract_strided_slice %104 {offsets = [0, 64], sizes = [32, 64], strides = [1, 1]} : vector<32x128xf32> to vector<32x64xf32>
    %c1_61 = arith.constant 1 : index
    %c0_62 = arith.constant 0 : index
    %c0_63 = arith.constant 0 : index
    %107 = vector.load %arg4[%c1_61, %c0_62, %c0_63] : memref<2x4x64xf32, #tpu.memory_space<vmem>>, vector<1x4x64xf32>
    %108 = vector.shape_cast %107 : vector<1x4x64xf32> to vector<4x64xf32>
    %cst_64 = arith.constant 0.000000e+00 : f32
    %109 = vector.broadcast %cst_64 : f32 to vector<6x64xf32>
    %110 = tpu.concatenate %109, %105 in 0 : vector<6x64xf32>, vector<32x64xf32> -> vector<38x64xf32>
    %111 = vector.extract_strided_slice %108 {offsets = [3, 0], sizes = [1, 64], strides = [1, 1]} : vector<4x64xf32> to vector<1x64xf32>
    %112 = vector.broadcast %111 : vector<1x64xf32> to vector<32x64xf32>
    %113 = arith.mulf %105, %112 : vector<32x64xf32>
    %114 = vector.extract_strided_slice %110 {offsets = [0, 0], sizes = [32, 64], strides = [1, 1]} : vector<38x64xf32> to vector<32x64xf32>
    %115 = vector.extract_strided_slice %108 {offsets = [0, 0], sizes = [1, 64], strides = [1, 1]} : vector<4x64xf32> to vector<1x64xf32>
    %116 = vector.broadcast %115 : vector<1x64xf32> to vector<32x64xf32>
    %117 = arith.mulf %114, %116 : vector<32x64xf32>
    %118 = arith.addf %113, %117 : vector<32x64xf32>
    %119 = vector.extract_strided_slice %110 {offsets = [2, 0], sizes = [32, 64], strides = [1, 1]} : vector<38x64xf32> to vector<32x64xf32>
    %120 = vector.extract_strided_slice %108 {offsets = [1, 0], sizes = [1, 64], strides = [1, 1]} : vector<4x64xf32> to vector<1x64xf32>
    %121 = vector.broadcast %120 : vector<1x64xf32> to vector<32x64xf32>
    %122 = arith.mulf %119, %121 : vector<32x64xf32>
    %123 = arith.addf %118, %122 : vector<32x64xf32>
    %124 = vector.extract_strided_slice %110 {offsets = [4, 0], sizes = [32, 64], strides = [1, 1]} : vector<38x64xf32> to vector<32x64xf32>
    %125 = vector.extract_strided_slice %108 {offsets = [2, 0], sizes = [1, 64], strides = [1, 1]} : vector<4x64xf32> to vector<1x64xf32>
    %126 = vector.broadcast %125 : vector<1x64xf32> to vector<32x64xf32>
    %127 = arith.mulf %124, %126 : vector<32x64xf32>
    %128 = arith.addf %123, %127 : vector<32x64xf32>
    %c1_65 = arith.constant 1 : index
    %c0_66 = arith.constant 0 : index
    %c0_67 = arith.constant 0 : index
    %129 = vector.load %arg5[%c1_65, %c0_66, %c0_67] : memref<2x1x64xf32, #tpu.memory_space<vmem>>, vector<1x1x64xf32>
    %130 = vector.shape_cast %129 : vector<1x1x64xf32> to vector<1x64xf32>
    %131 = vector.broadcast %130 : vector<1x64xf32> to vector<32x64xf32>
    %132 = arith.addf %128, %131 : vector<32x64xf32>
    %cst_68 = arith.constant 0.000000e+00 : f32
    %133 = vector.broadcast %cst_68 : f32 to vector<32x64xf32>
    %134 = arith.subf %133, %132 : vector<32x64xf32>
    %135 = math.exp %134 : vector<32x64xf32>
    %cst_69 = arith.constant 1.000000e+00 : f32
    %136 = vector.broadcast %cst_69 : f32 to vector<32x64xf32>
    %137 = arith.addf %136, %135 : vector<32x64xf32>
    %138 = tpu.reciprocal %137 {approx = true} : vector<32x64xf32> -> vector<32x64xf32>
    %139 = arith.mulf %132, %138 : vector<32x64xf32>
    %c1_70 = arith.constant 1 : index
    %c0_71 = arith.constant 0 : index
    %c0_72 = arith.constant 0 : index
    %140 = vector.load %arg6[%c1_70, %c0_71, %c0_72] : memref<2x64x1088xf32, #tpu.memory_space<vmem>>, vector<1x64x1088xf32>
    %141 = vector.shape_cast %140 : vector<1x64x1088xf32> to vector<64x1088xf32>
    %cst_73 = arith.constant dense<0.000000e+00> : vector<32x1088xf32>
    %142 = tpu.matmul %139, %141, %cst_73 {dimension_numbers = #tpu.dot_dimension_numbers<[1], [0], [0], [1], [0, 0, 1, 1], [], []>} : vector<32x64xf32>, vector<64x1088xf32>, vector<32x1088xf32> -> vector<32x1088xf32>
    %143 = vector.extract_strided_slice %142 {offsets = [0, 0], sizes = [32, 512], strides = [1, 1]} : vector<32x1088xf32> to vector<32x512xf32>
    %144 = vector.extract_strided_slice %142 {offsets = [0, 512], sizes = [32, 512], strides = [1, 1]} : vector<32x1088xf32> to vector<32x512xf32>
    %c0_74 = arith.constant 0 : index
    %c0_75 = arith.constant 0 : index
    %145 = vector.load %arg19[%c0_74, %c0_75] : memref<32x512xf32, #tpu.memory_space<vmem>>, vector<32x512xf32>
    tpu.vector_store %arg19[%c0_74, %c0_75], %144 {strides = array<i32>} : memref<32x512xf32, #tpu.memory_space<vmem>>, vector<32x512xf32>,
    %146 = vector.extract_strided_slice %142 {offsets = [0, 1024], sizes = [32, 64], strides = [1, 1]} : vector<32x1088xf32> to vector<32x64xf32>
    %c1_76 = arith.constant 1 : index
    %c0_77 = arith.constant 0 : index
    %c0_78 = arith.constant 0 : index
    %147 = vector.load %arg7[%c1_76, %c0_77, %c0_78] : memref<2x1x64xf32, #tpu.memory_space<vmem>>, vector<1x1x64xf32>
    %148 = vector.shape_cast %147 : vector<1x1x64xf32> to vector<1x64xf32>
    %149 = vector.broadcast %148 : vector<1x64xf32> to vector<32x64xf32>
    %150 = arith.addf %146, %149 : vector<32x64xf32>
    %cst_79 = arith.constant 2.000000e+01 : f32
    %151 = vector.broadcast %cst_79 : f32 to vector<32x64xf32>
    %152 = arith.cmpf ogt, %150, %151 : vector<32x64xf32>
    %cst_80 = arith.constant 2.000000e+01 : f32
    %153 = vector.broadcast %cst_80 : f32 to vector<32x64xf32>
    %154 = arith.minimumf %150, %153 : vector<32x64xf32>
    %155 = math.exp %154 : vector<32x64xf32>
    %cst_81 = arith.constant 1.000000e+00 : f32
    %156 = vector.broadcast %cst_81 : f32 to vector<32x64xf32>
    %157 = arith.addf %156, %155 : vector<32x64xf32>
    %158 = math.log %157 : vector<32x64xf32>
    %159 = arith.select %152, %150, %158 : vector<32x64xi1>, vector<32x64xf32>
    %160 = arith.mulf %159, %139 : vector<32x64xf32>
    %161 = tpu.concatenate %159, %160 in 0 : vector<32x64xf32>, vector<32x64xf32> -> vector<64x64xf32>
    %cst_82 = arith.constant dense<0.000000e+00> : vector<64x512xf32>
    %162 = tpu.matmul %161, %6, %cst_82 {dimension_numbers = #tpu.dot_dimension_numbers<[1], [0], [0], [1], [0, 0, 1, 1], [], []>} : vector<64x64xf32>, vector<64x512xf32>, vector<64x512xf32> -> vector<64x512xf32>
    %163 = vector.extract_strided_slice %162 {offsets = [0, 0], sizes = [32, 512], strides = [1, 1]} : vector<64x512xf32> to vector<32x512xf32>
    %c1_83 = arith.constant 1 : index
    %c0_84 = arith.constant 0 : index
    %c0_85 = arith.constant 0 : index
    %164 = vector.load %arg8[%c1_83, %c0_84, %c0_85] : memref<2x1x512xf32, #tpu.memory_space<vmem>>, vector<1x1x512xf32>
    %165 = vector.shape_cast %164 : vector<1x1x512xf32> to vector<1x512xf32>
    %166 = vector.broadcast %165 : vector<1x512xf32> to vector<32x512xf32>
    %167 = arith.mulf %163, %166 : vector<32x512xf32>
    %168 = math.exp %167 : vector<32x512xf32>
    %c0_86 = arith.constant 0 : index
    %c0_87 = arith.constant 0 : index
    %169 = vector.load %arg16[%c0_86, %c0_87] : memref<32x512xf32, #tpu.memory_space<vmem>>, vector<32x512xf32>
    tpu.vector_store %arg16[%c0_86, %c0_87], %168 {strides = array<i32>} : memref<32x512xf32, #tpu.memory_space<vmem>>, vector<32x512xf32>,
    %170 = vector.extract_strided_slice %162 {offsets = [32, 0], sizes = [32, 512], strides = [1, 1]} : vector<64x512xf32> to vector<32x512xf32>
    %171 = arith.mulf %170, %143 : vector<32x512xf32>
    %c0_88 = arith.constant 0 : index
    %c0_89 = arith.constant 0 : index
    %172 = vector.load %arg17[%c0_88, %c0_89] : memref<32x512xf32, #tpu.memory_space<vmem>>, vector<32x512xf32>
    tpu.vector_store %arg17[%c0_88, %c0_89], %171 {strides = array<i32>} : memref<32x512xf32, #tpu.memory_space<vmem>>, vector<32x512xf32>,
    %cst_90 = arith.constant 0.000000e+00 : f32
    %173 = vector.broadcast %cst_90 : f32 to vector<2x512xf32>
    %c0_i32_91 = arith.constant 0 : i32
    %c4_i32_92 = arith.constant 4 : i32
    %174 = arith.addi %c0_i32_91, %c4_i32_92 : i32
    %c1_i32_93 = arith.constant 1 : i32
    %175 = scf.for %arg20 = %c0_i32_91 to %174 step %c1_i32_93 iter_args(%arg21 = %173) -> (vector<2x512xf32>)  : i32 {
      %c8_i32 = arith.constant 8 : i32
      %206 = arith.muli %arg20, %c8_i32 : i32
      %207 = tpu.assume_multiple %206, 8 : i32
      %208 = arith.index_cast %207 : i32 to index
      %c0_115 = arith.constant 0 : index
      %209 = vector.load %arg16[%208, %c0_115] : memref<32x512xf32, #tpu.memory_space<vmem>>, vector<8x512xf32>
      %210 = arith.index_cast %207 : i32 to index
      %c0_116 = arith.constant 0 : index
      %211 = vector.load %arg17[%210, %c0_116] : memref<32x512xf32, #tpu.memory_space<vmem>>, vector<8x512xf32>
      %212 = vector.extract_strided_slice %209 {offsets = [0, 0], sizes = [2, 512], strides = [1, 1]} : vector<8x512xf32> to vector<2x512xf32>
      %213 = arith.mulf %212, %arg21 : vector<2x512xf32>
      %214 = vector.extract_strided_slice %211 {offsets = [0, 0], sizes = [2, 512], strides = [1, 1]} : vector<8x512xf32> to vector<2x512xf32>
      %215 = arith.addf %213, %214 : vector<2x512xf32>
      %216 = vector.extract_strided_slice %209 {offsets = [2, 0], sizes = [2, 512], strides = [1, 1]} : vector<8x512xf32> to vector<2x512xf32>
      %217 = arith.mulf %216, %215 : vector<2x512xf32>
      %218 = vector.extract_strided_slice %211 {offsets = [2, 0], sizes = [2, 512], strides = [1, 1]} : vector<8x512xf32> to vector<2x512xf32>
      %219 = arith.addf %217, %218 : vector<2x512xf32>
      %220 = vector.extract_strided_slice %209 {offsets = [4, 0], sizes = [2, 512], strides = [1, 1]} : vector<8x512xf32> to vector<2x512xf32>
      %221 = arith.mulf %220, %219 : vector<2x512xf32>
      %222 = vector.extract_strided_slice %211 {offsets = [4, 0], sizes = [2, 512], strides = [1, 1]} : vector<8x512xf32> to vector<2x512xf32>
      %223 = arith.addf %221, %222 : vector<2x512xf32>
      %224 = vector.extract_strided_slice %209 {offsets = [6, 0], sizes = [2, 512], strides = [1, 1]} : vector<8x512xf32> to vector<2x512xf32>
      %225 = arith.mulf %224, %223 : vector<2x512xf32>
      %226 = vector.extract_strided_slice %211 {offsets = [6, 0], sizes = [2, 512], strides = [1, 1]} : vector<8x512xf32> to vector<2x512xf32>
      %227 = arith.addf %225, %226 : vector<2x512xf32>
      %228 = tpu.concatenate %215, %219, %223, %227 in 0 : vector<2x512xf32>, vector<2x512xf32>, vector<2x512xf32>, vector<2x512xf32> -> vector<8x512xf32>
      %229 = arith.index_cast %207 : i32 to index
      %c0_117 = arith.constant 0 : index
      %230 = vector.load %arg18[%229, %c0_117] : memref<32x512xf32, #tpu.memory_space<vmem>>, vector<8x512xf32>
      tpu.vector_store %arg18[%229, %c0_117], %228 {strides = array<i32>} : memref<32x512xf32, #tpu.memory_space<vmem>>, vector<8x512xf32>,
      scf.yield %227 : vector<2x512xf32>
    }
    %c4_i32_94 = arith.constant 4 : i32
    %c0_95 = arith.constant 0 : index
    %c0_96 = arith.constant 0 : index
    %176 = vector.load %arg18[%c0_95, %c0_96] : memref<32x512xf32, #tpu.memory_space<vmem>>, vector<32x512xf32>
    %c0_97 = arith.constant 0 : index
    %c0_98 = arith.constant 0 : index
    %177 = vector.load %arg19[%c0_97, %c0_98] : memref<32x512xf32, #tpu.memory_space<vmem>>, vector<32x512xf32>
    %178 = arith.mulf %176, %177 : vector<32x512xf32>
    %cst_99 = arith.constant dense<0.000000e+00> : vector<32x64xf32>
    %179 = tpu.matmul %178, %7, %cst_99 {dimension_numbers = #tpu.dot_dimension_numbers<[1], [0], [0], [1], [0, 0, 1, 1], [], []>} : vector<32x512xf32>, vector<512x64xf32>, vector<32x64xf32> -> vector<32x64xf32>
    %c1_100 = arith.constant 1 : index
    %c0_101 = arith.constant 0 : index
    %c0_102 = arith.constant 0 : index
    %180 = vector.load %arg9[%c1_100, %c0_101, %c0_102] : memref<2x1x64xf32, #tpu.memory_space<vmem>>, vector<1x1x64xf32>
    %181 = vector.shape_cast %180 : vector<1x1x64xf32> to vector<1x64xf32>
    %182 = vector.broadcast %181 : vector<1x64xf32> to vector<32x64xf32>
    %183 = arith.mulf %139, %182 : vector<32x64xf32>
    %184 = arith.addf %179, %183 : vector<32x64xf32>
    %cst_103 = arith.constant 0.000000e+00 : f32
    %185 = vector.broadcast %cst_103 : f32 to vector<32x64xf32>
    %186 = arith.subf %185, %106 : vector<32x64xf32>
    %187 = math.exp %186 : vector<32x64xf32>
    %cst_104 = arith.constant 1.000000e+00 : f32
    %188 = vector.broadcast %cst_104 : f32 to vector<32x64xf32>
    %189 = arith.addf %188, %187 : vector<32x64xf32>
    %190 = tpu.reciprocal %189 {approx = true} : vector<32x64xf32> -> vector<32x64xf32>
    %191 = arith.mulf %106, %190 : vector<32x64xf32>
    %192 = arith.mulf %184, %191 : vector<32x64xf32>
    %c0_105 = arith.constant 0 : index
    %c0_106 = arith.constant 0 : index
    %193 = vector.load %arg11[%c0_105, %c0_106] : memref<64x1xf32, #tpu.memory_space<vmem>>, vector<64x1xf32>
    %cst_107 = arith.constant dense<0.000000e+00> : vector<32x1xf32>
    %194 = tpu.matmul %192, %193, %cst_107 {dimension_numbers = #tpu.dot_dimension_numbers<[1], [0], [0], [1], [0, 0, 1, 1], [], []>} : vector<32x64xf32>, vector<64x1xf32>, vector<32x1xf32> -> vector<32x1xf32>
    %c0_108 = arith.constant 0 : index
    %c0_109 = arith.constant 0 : index
    %195 = vector.load %arg12[%c0_108, %c0_109] : memref<1x1xf32, #tpu.memory_space<vmem>>, vector<1x1xf32>
    %196 = vector.broadcast %195 : vector<1x1xf32> to vector<32x1xf32>
    %197 = arith.addf %194, %196 : vector<32x1xf32>
    %cst_110 = arith.constant 0.000000e+00 : f32
    %198 = vector.broadcast %cst_110 : f32 to vector<32x1xf32>
    %199 = arith.subf %198, %197 : vector<32x1xf32>
    %200 = math.exp %199 : vector<32x1xf32>
    %cst_111 = arith.constant 1.000000e+00 : f32
    %201 = vector.broadcast %cst_111 : f32 to vector<32x1xf32>
    %202 = arith.addf %201, %200 : vector<32x1xf32>
    %cst_112 = arith.constant 1.000000e+00 : f32
    %203 = vector.broadcast %cst_112 : f32 to vector<32x1xf32>
    %204 = arith.divf %203, %202 : vector<32x1xf32>
    %c0_113 = arith.constant 0 : index
    %c0_114 = arith.constant 0 : index
    %205 = vector.load %arg15[%c0_113, %c0_114] : memref<32x1xf32, #tpu.memory_space<vmem>>, vector<32x1xf32>
    tpu.vector_store %arg15[%c0_113, %c0_114], %204 {strides = array<i32>} : memref<32x1xf32, #tpu.memory_space<vmem>>, vector<32x1xf32>,
    return
  }
}

</mosaic_0001>

<bundles_post_ra>
// kernel: tpu_custom_call.1
= control target key start
LH: loop header
LB: loop body
LE: loop exit
PB: predicated region body
PF: predicated region fallthrough
CT: control target
= control target key end

     0   :  { %s6056_s0 = inlined_call_operand.vmem [shape: f32[32,11], index: 0, kind: input, shape index: {}]   ;;  %s6057_s1 = inlined_call_operand.vmem [shape: f32[11,32], index: 1, kind: input, shape index: {}]   ;;  %s6058_s2 = inlined_call_operand.vmem [shape: f32[1,32], index: 2, kind: input, shape index: {}]   ;;  %s6059_s3 = inlined_call_operand.vmem [shape: f32[2,32,128], index: 3, kind: input, shape index: {}]   ;;  %s6060_s4 = inlined_call_operand.vmem [shape: f32[2,4,64], index: 4, kind: input, shape index: {}]   ;;  %s6061_s5 = inlined_call_operand.vmem [shape: f32[2,1,64], index: 5, kind: input, shape index: {}]   ;;  %s6062_s6 = inlined_call_operand.hbm [shape: f32[2,64,1088], index: 6, kind: input, shape index: {}]   ;;  %s6063_s7 = inlined_call_operand.vmem [shape: f32[2,1,64], index: 7, kind: input, shape index: {}]   ;;  %s6064_s8 = inlined_call_operand.vmem [shape: f32[2,1,512], index: 8, kind: input, shape index: {}]   ;;  %s6065_s9 = inlined_call_operand.vmem [shape: f32[2,1,64], index: 9, kind: input, shape index: {}]   ;;  %s6066_s10 = inlined_call_operand.vmem [shape: f32[1,64,32], index: 10, kind: input, shape index: {}]   ;;  %s6067_s11 = inlined_call_operand.vmem [shape: f32[64,1], index: 11, kind: input, shape index: {}]   ;;  %s6068_s12 = inlined_call_operand.<no memory space> [shape: f32[1,1], index: 12, kind: input, shape index: {}]   ;;  %s6069_s13 = inlined_call_operand.vmem [shape: f32[64,512], index: 13, kind: input, shape index: {}]   ;;  %s6070_s14 = inlined_call_operand.vmem [shape: f32[512,64], index: 14, kind: input, shape index: {}]   ;;  %s6071_s15 = inlined_call_operand.vmem [shape: f32[32,1], index: 15, kind: output, shape index: {}]  }
   0x1   :  { %v20_v0 = vstv %s6068_s12 }
   0x2   :  { %21 = vst [vmem:[#allocation6] sm:$0x1] %v20_v0 }
   0x3   :  { %22 = vsyncpa [#allocation8], 0  ;;  %s4626_s20 = smov [#allocation7]  }
   0x4   :  { %s40_s21 = sshll.u32 %s4626_s20, 4  ;;  %s41_s21 = int_to_ptr.vmem [resolvable:$true] %s40_s21 }
   0x5   :  { %s4532_s22 = scalar_lea.vmem %s41_s21, 18432  ;;  %p4537_p1 = scmp.lt.s32.totalorder %s41_s21, %s41_s21 }
   0x6   :  { %p4533_p0 = scmp.ne.s32.totalorder %s41_s21, %s4532_s22  ;;  %p4538_p2 = scmp.lt.s32.totalorder %s4532_s22, %s4532_s22 }
   0x8   :  { %p4539_p3 = por %p4538_p2, %p4537_p1 }
   0xa   :  { %p4540_p4 = pnand %p4539_p3, %p4533_p0 }
   0xc   :  { %4543 = shalt.err (!%p4540_p4)
}
   0xd   :  { %s4627_s23 = smov 1152   ;;  %s4628_s24 = smov 72  }
   0xe   :  { %46 = dma.hbm_to_vmem [thread:$0]  %s6062_s6, 18432, %s41_s21, [#allocation8], %s4627_s23, %s4627_s23, %s4628_s24  }
   0xf   :  { %4584 = dma.done.wait [#allocation8], 18432  }
  0x10   :  { %4585 = vsyncadd [#allocation8], 4294948864  ;;  %v4720_v1 = vld [vmem:[%s6070_s14] sm:$0xff]  ;;  %v4725_v2 = vld [vmem:[%s6070_s14 + $0x8] sm:$0xff]  ;;  %vm92_vm0 = vcmask 1042432   ;;  %vm79_vm1 = vcmask 89088  }
  0x11   :  { %6113 = vst [vmem:[#allocation10_spill] sm:$0xff] %v4720_v1  ;;  %6114 = vst [vmem:[#allocation11_spill] sm:$0xff] %v4725_v2  ;;  %v4730_v3 = vld [vmem:[%s6070_s14 + $0x10] sm:$0xff]  ;;  %v4735_v4 = vld [vmem:[%s6070_s14 + $0x18] sm:$0xff]  ;;  %vm281_vm2 = vcmask 261120   ;;  %vm384_vm3 = vcmask 1045504  }
  0x12   :  { %6115 = vst [vmem:[#allocation12_spill] sm:$0xff] %v4730_v3  ;;  %6116 = vst [vmem:[#allocation13_spill] sm:$0xff] %v4735_v4  ;;  %v4740_v5 = vld [vmem:[%s6070_s14 + $0x20] sm:$0xff]  ;;  %v4745_v6 = vld [vmem:[%s6070_s14 + $0x28] sm:$0xff]  ;;  %vm463_vm4 = vcmask 1043456   ;;  %vm588_vm5 = vcmask 523264  }
  0x13   :  { %6117 = vst [vmem:[#allocation14_spill] sm:$0xff] %v4740_v5  ;;  %6118 = vst [vmem:[#allocation15_spill] sm:$0xff] %v4745_v6  ;;  %v4750_v7 = vld [vmem:[%s6070_s14 + $0x30] sm:$0xff]  ;;  %v4755_v8 = vld [vmem:[%s6070_s14 + $0x38] sm:$0xff]  ;;  %s5486_s12 = smov 0  }
  0x14   :  { %6119 = vst [vmem:[#allocation16_spill] sm:$0xff] %v4750_v7  ;;  %6120 = vst [vmem:[#allocation17_spill] sm:$0xff] %v4755_v8  ;;  %v4760_v9 = vld [vmem:[%s6070_s14 + $0x40] sm:$0xff]  ;;  %v4765_v10 = vld [vmem:[%s6070_s14 + $0x48] sm:$0xff] }
  0x15   :  { %6121 = vst [vmem:[#allocation18_spill] sm:$0xff] %v4760_v9  ;;  %6122 = vst [vmem:[#allocation19_spill] sm:$0xff] %v4765_v10  ;;  %v4770_v11 = vld [vmem:[%s6070_s14 + $0x50] sm:$0xff]  ;;  %v4775_v12 = vld [vmem:[%s6070_s14 + $0x58] sm:$0xff] }
  0x16   :  { %6123 = vst [vmem:[#allocation20_spill] sm:$0xff] %v4770_v11  ;;  %6124 = vst [vmem:[#allocation21_spill] sm:$0xff] %v4775_v12  ;;  %v4780_v13 = vld [vmem:[%s6070_s14 + $0x60] sm:$0xff]  ;;  %v4785_v14 = vld [vmem:[%s6070_s14 + $0x68] sm:$0xff] }
  0x17   :  { %6125 = vst [vmem:[#allocation22_spill] sm:$0xff] %v4780_v13  ;;  %v4790_v15 = vld [vmem:[%s6070_s14 + $0x70] sm:$0xff]  ;;  %v4795_v16 = vld [vmem:[%s6070_s14 + $0x78] sm:$0xff]  ;;  %v4800_v17 = vld [vmem:[%s6070_s14 + $0x80] sm:$0xff] }
  0x18   :  { %6126 = vst [vmem:[#allocation23_spill] sm:$0xff] %v4800_v17  ;;  %v4805_v18 = vld [vmem:[%s6070_s14 + $0x88] sm:$0xff]  ;;  %v4810_v19 = vld [vmem:[%s6070_s14 + $0x90] sm:$0xff]  ;;  %v4815_v20 = vld [vmem:[%s6070_s14 + $0x98] sm:$0xff] }
  0x19   :  { %6127 = vst [vmem:[#allocation24_spill] sm:$0xff] %v4805_v18  ;;  %6128 = vst [vmem:[#allocation25_spill] sm:$0xff] %v4810_v19  ;;  %v4820_v21 = vld [vmem:[%s6070_s14 + $0xa0] sm:$0xff]  ;;  %v4825_v22 = vld [vmem:[%s6070_s14 + $0xa8] sm:$0xff] }
  0x1a   :  { %6129 = vst [vmem:[#allocation26_spill] sm:$0xff] %v4815_v20  ;;  %6130 = vst [vmem:[#allocation27_spill] sm:$0xff] %v4820_v21  ;;  %v4830_v23 = vld [vmem:[%s6070_s14 + $0xb0] sm:$0xff]  ;;  %v4835_v24 = vld [vmem:[%s6070_s14 + $0xb8] sm:$0xff] }
  0x1b   :  { %6131 = vst [vmem:[#allocation28_spill] sm:$0xff] %v4825_v22  ;;  %6132 = vst [vmem:[#allocation29_spill] sm:$0xff] %v4830_v23  ;;  %v4840_v25 = vld [vmem:[%s6070_s14 + $0xc0] sm:$0xff]  ;;  %v4845_v26 = vld [vmem:[%s6070_s14 + $0xc8] sm:$0xff] }
  0x1c   :  { %6133 = vst [vmem:[#allocation30_spill] sm:$0xff] %v4835_v24  ;;  %6134 = vst [vmem:[#allocation31_spill] sm:$0xff] %v4840_v25  ;;  %v4850_v27 = vld [vmem:[%s6070_s14 + $0xd0] sm:$0xff]  ;;  %v4855_v28 = vld [vmem:[%s6070_s14 + $0xd8] sm:$0xff] }
  0x1d   :  { %6135 = vst [vmem:[#allocation32_spill] sm:$0xff] %v4845_v26  ;;  %6136 = vst [vmem:[#allocation33_spill] sm:$0xff] %v4850_v27  ;;  %v4860_v29 = vld [vmem:[%s6070_s14 + $0xe0] sm:$0xff]  ;;  %v4865_v30 = vld [vmem:[%s6070_s14 + $0xe8] sm:$0xff] }
  0x1e   :  { %6137 = vst [vmem:[#allocation34_spill] sm:$0xff] %v4855_v28  ;;  %v4870_v31 = vld [vmem:[%s6070_s14 + $0xf0] sm:$0xff]  ;;  %v4875_v32 = vld [vmem:[%s6070_s14 + $0xf8] sm:$0xff]  ;;  %v4880_v33 = vld [vmem:[%s6070_s14 + $0x100] sm:$0xff] }
  0x1f   :  { %6138 = vst [vmem:[#allocation35_spill] sm:$0xff] %v4880_v33  ;;  %v4885_v34 = vld [vmem:[%s6070_s14 + $0x108] sm:$0xff]  ;;  %v4890_v35 = vld [vmem:[%s6070_s14 + $0x110] sm:$0xff]  ;;  %v4895_v36 = vld [vmem:[%s6070_s14 + $0x118] sm:$0xff] }
  0x20   :  { %6139 = vst [vmem:[#allocation36_spill] sm:$0xff] %v4885_v34  ;;  %6140 = vst [vmem:[#allocation37_spill] sm:$0xff] %v4890_v35  ;;  %v4900_v37 = vld [vmem:[%s6070_s14 + $0x120] sm:$0xff]  ;;  %v4905_v38 = vld [vmem:[%s6070_s14 + $0x128] sm:$0xff] }
  0x21   :  { %6141 = vst [vmem:[#allocation38_spill] sm:$0xff] %v4895_v36  ;;  %6142 = vst [vmem:[#allocation39_spill] sm:$0xff] %v4900_v37  ;;  %v4910_v39 = vld [vmem:[%s6070_s14 + $0x130] sm:$0xff]  ;;  %v4915_v40 = vld [vmem:[%s6070_s14 + $0x138] sm:$0xff] }
  0x22   :  { %6143 = vst [vmem:[#allocation40_spill] sm:$0xff] %v4905_v38  ;;  %6144 = vst [vmem:[#allocation41_spill] sm:$0xff] %v4910_v39  ;;  %v4920_v41 = vld [vmem:[%s6070_s14 + $0x140] sm:$0xff]  ;;  %v4925_v42 = vld [vmem:[%s6070_s14 + $0x148] sm:$0xff] }
  0x23   :  { %6145 = vst [vmem:[#allocation42_spill] sm:$0xff] %v4915_v40  ;;  %6146 = vst [vmem:[#allocation43_spill] sm:$0xff] %v4920_v41  ;;  %v4930_v43 = vld [vmem:[%s6070_s14 + $0x150] sm:$0xff]  ;;  %v4935_v44 = vld [vmem:[%s6070_s14 + $0x158] sm:$0xff] }
  0x24   :  { %6147 = vst [vmem:[#allocation44_spill] sm:$0xff] %v4925_v42  ;;  %6148 = vst [vmem:[#allocation45_spill] sm:$0xff] %v4930_v43  ;;  %v4940_v45 = vld [vmem:[%s6070_s14 + $0x160] sm:$0xff]  ;;  %v4945_v46 = vld [vmem:[%s6070_s14 + $0x168] sm:$0xff] }
  0x25   :  { %6149 = vst [vmem:[#allocation46_spill] sm:$0xff] %v4935_v44  ;;  %6150 = vst [vmem:[#allocation47_spill] sm:$0xff] %v4940_v45  ;;  %v4950_v47 = vld [vmem:[%s6070_s14 + $0x170] sm:$0xff]  ;;  %v4955_v48 = vld [vmem:[%s6070_s14 + $0x178] sm:$0xff] }
  0x26   :  { %v4960_v49 = vld [vmem:[%s6070_s14 + $0x180] sm:$0xff]  ;;  %v4965_v50 = vld [vmem:[%s6070_s14 + $0x188] sm:$0xff]  ;;  %v4970_v51 = vld [vmem:[%s6070_s14 + $0x190] sm:$0xff] }
  0x27   :  { %6151 = vst [vmem:[#allocation48_spill] sm:$0xff] %v4960_v49  ;;  %6152 = vst [vmem:[#allocation49_spill] sm:$0xff] %v4965_v50  ;;  %v4975_v52 = vld [vmem:[%s6070_s14 + $0x198] sm:$0xff]  ;;  %v4980_v53 = vld [vmem:[%s6070_s14 + $0x1a0] sm:$0xff] }
  0x28   :  { %6153 = vst [vmem:[#allocation50_spill] sm:$0xff] %v4970_v51  ;;  %6154 = vst [vmem:[#allocation51_spill] sm:$0xff] %v4975_v52  ;;  %v4985_v54 = vld [vmem:[%s6070_s14 + $0x1a8] sm:$0xff]  ;;  %v4990_v55 = vld [vmem:[%s6070_s14 + $0x1b0] sm:$0xff] }
  0x29   :  { %6155 = vst [vmem:[#allocation52_spill] sm:$0xff] %v4980_v53  ;;  %6156 = vst [vmem:[#allocation53_spill] sm:$0xff] %v4985_v54  ;;  %v4995_v56 = vld [vmem:[%s6070_s14 + $0x1b8] sm:$0xff]  ;;  %v5000_v57 = vld [vmem:[%s6070_s14 + $0x1c0] sm:$0xff] }
  0x2a   :  { %6157 = vst [vmem:[#allocation54_spill] sm:$0xff] %v4990_v55  ;;  %6158 = vst [vmem:[#allocation55_spill] sm:$0xff] %v4995_v56  ;;  %v5005_v58 = vld [vmem:[%s6070_s14 + $0x1c8] sm:$0xff]  ;;  %v5010_v59 = vld [vmem:[%s6070_s14 + $0x1d0] sm:$0xff] }
  0x2b   :  { %6159 = vst [vmem:[#allocation56_spill] sm:$0xff] %v5000_v57  ;;  %6160 = vst [vmem:[#allocation57_spill] sm:$0xff] %v5005_v58  ;;  %v5015_v60 = vld [vmem:[%s6070_s14 + $0x1d8] sm:$0xff]  ;;  %v5020_v61 = vld [vmem:[%s6070_s14 + $0x1e0] sm:$0xff] }
  0x2c   :  { %6161 = vst [vmem:[#allocation58_spill] sm:$0xff] %v5010_v59  ;;  %6162 = vst [vmem:[#allocation59_spill] sm:$0xff] %v5015_v60  ;;  %v5025_v62 = vld [vmem:[%s6070_s14 + $0x1e8] sm:$0xff]  ;;  %v5030_v63 = vld [vmem:[%s6070_s14 + $0x1f0] sm:$0xff] }
  0x2d   :  { %v5035_v0 = vld [vmem:[%s6070_s14 + $0x1f8] sm:$0xff]  ;;  %v71_v33 = vld [vmem:[%s6057_s1 + $0x8] sm:$0x7]  ;;  %v70_v1 = vld [vmem:[%s6057_s1] sm:$0xff] }
  0x2e   :  { %4137 = vmatprep.subr.msk.mxu0 %vm92_vm0, %v71_v33  ;;  %v66_v49 = vld [vmem:[%s6056_s0] sm:$0xff]  ;;  %v67_v17 = vld [vmem:[%s6056_s0 + $0x8] sm:$0xff]  ;;  %v280_v34 = vld [vmem:[%s6059_s3 + $0x18] sm:$0xff] }
  0x2f   :  { %4138 = vmatpush3.msk.msra.mxu0 %vm92_vm0, %v71_v33  ;;  %4141 = vmatprep.mubr.msk.f32.mxu0 %vm79_vm1, %v66_v49  ;;  %v68_v2 = vld [vmem:[%s6056_s0 + $0x10] sm:$0xff]  ;;  %v69_v33 = vld [vmem:[%s6056_s0 + $0x18] sm:$0xff] }
  0x30   :  { %4139 = vmatprep.subr.mxu0 %v70_v1  ;;  %4147 = vmatprep.subr.mxu1 %v280_v34  ;;  %v279_v49 = vld [vmem:[%s6059_s3 + $0x10] sm:$0xff]  ;;  %v579_v19 = vld [vmem:[#allocation7 + $0x1f8] sm:$0xff] }
  0x31   :  { %4140 = vmatpush3.msra.mxu0 %v70_v1  ;;  %4148 = vmatpush3.msra.mxu1 %v280_v34  ;;  %v278_v1 = vld [vmem:[%s6059_s3 + $0x8] sm:$0xff]  ;;  %v3765_v34 = vld [vmem:[%s6058_s2] ss:$0 sm:$0xff]  ;;  %v582_v51 = vld [vmem:[#allocation7 + $0x210] sm:$0xff] }
  0x32   :  { %4142 = vmatmul.mubr.msk.f32.vlgmr.msra.gmra.mxu0 %vm79_vm1, %v67_v17  ;;  %4149 = vmatprep.subr.mxu1 %v279_v49  ;;  %v581_v36 = vld [vmem:[#allocation7 + $0x208] sm:$0xff] }
  0x33   :  { %4144 = vmatprep.mubr.msk.f32.mxu0 %vm79_vm1, %v68_v2  ;;  %4150 = vmatpush3.msra.mxu1 %v279_v49  ;;  %v277_v2 = vld [vmem:[%s6059_s3] sm:$0xff] }
  0x34   :  { %4151 = vmatprep.subr.mxu1 %v278_v1 }
  0x35   :  { %4152 = vmatpush3.msra.mxu1 %v278_v1 }
  0x36   :  { %4145 = vmatmul.mubr.msk.f32.gmra.mxu0 %vm79_vm1, %v69_v33  ;;  %4153 = vmatprep.subr.mxu1 %v277_v2 }
  0x37   :  { %4154 = vmatpush3.msra.mxu1 %v277_v2  ;;  %v580_v2 = vld [vmem:[#allocation7 + $0x200] sm:$0xff] }
  0x38   :  { %617 = vmatprep.subr.mxu0 %v580_v2  ;;  %706 = vmatprep.subr.mxu1 %v582_v51  ;;  %v555_v51 = vld [vmem:[#allocation7 + $0x138] sm:$0xff]  ;;  %v544_v2 = vld [vmem:[#allocation7 + $0xe0] sm:$0xff] }
  0x39   :  { %618 = vmatpush1.msra.mxu0 %v579_v19  ;;  %v552_v19 = vld [vmem:[#allocation7 + $0x120] sm:$0xff] }
  0xf2   :  { %v4143_v17 = vpop.f32.mrf.mxu0 }
  0xf3   :  { %v168_v50 = vadd.f32 %v4143_v17, %v3765_v34  ;;  %v571_v17 = vld [vmem:[#allocation7 + $0x1b8] sm:$0xff] }
  0xf4   :  { %v162_v33 = vpop.f32.mrf.mxu0  ;;  %619 = vmatprep.subr.mxu0 %v571_v17  ;;  %v546_v17 = vld [vmem:[#allocation7 + $0xf0] sm:$0xff] }
  0xf5   :  { %v163_v49 = vadd.f32 %v3765_v34, %v162_v33  ;;  %v573_v33 = vld [vmem:[#allocation7 + $0x1c8] sm:$0xff] }
  0xf6   :  { %v4146_v18 = vpop.f32.mrf.mxu0 }
  0xf7   :  { %4155 = vmatprep.mubr.msk.f32.mxu1 %vm281_vm2, %v163_v49  ;;  %v178_v3 = vadd.f32 %v4146_v18, %v3765_v34  ;;  %v570_v49 = vld [vmem:[#allocation7 + $0x1b0] sm:$0xff] }
  0xf8   :  { %v172_v35 = vpop.f32.mrf.mxu0  ;;  %4156 = vmatmul.mubr.msk.f32.vlgmr.msra.gmra.mxu1 %vm281_vm2, %v168_v50  ;;  %v572_v50 = vld [vmem:[#allocation7 + $0x1c0] sm:$0xff]  ;;  %620 = vmatpush1.msra.mxu0 %v570_v49  ;;  %v562_v18 = vld [vmem:[#allocation7 + $0x170] sm:$0xff]  ;;  %v545_v49 = vld [vmem:[#allocation7 + $0xe8] sm:$0xff] }
  0xf9   :  { %v173_v1 = vadd.f32 %v3765_v34, %v172_v35  ;;  %707 = vmatpush1.msra.mxu1 %v581_v36  ;;  %v564_v35 = vld [vmem:[#allocation7 + $0x180] sm:$0xff]  ;;  %621 = vmatprep.subr.mxu0 %v562_v18  ;;  %v563_v34 = vld [vmem:[#allocation7 + $0x178] sm:$0xff]  ;;  %v554_v36 = vld [vmem:[#allocation7 + $0x130] sm:$0xff] }
  0xfa   :  { %708 = vmatprep.subr.mxu1 %v573_v33  ;;  %v543_v33 = vld [vmem:[#allocation7 + $0xd8] sm:$0xff]  ;;  %v537_v18 = vld [vmem:[#allocation7 + $0xa8] sm:$0xff] }
  0xfb   :  { %4158 = vmatprep.mubr.msk.f32.mxu1 %vm281_vm2, %v173_v1  ;;  %709 = vmatpush1.msra.mxu1 %v572_v50  ;;  %v553_v1 = vld [vmem:[#allocation7 + $0x128] sm:$0xff]  ;;  %v535_v50 = vld [vmem:[#allocation7 + $0x98] sm:$0xff] }
  0xfc   :  { %4159 = vmatmul.mubr.msk.f32.gmra.mxu1 %vm281_vm2, %v178_v3  ;;  %v561_v3 = vld [vmem:[#allocation7 + $0x168] sm:$0xff]  ;;  %710 = vmatprep.subr.mxu1 %v564_v35  ;;  %v534_v35 = vld [vmem:[#allocation7 + $0x90] sm:$0xff] }
  0xfd   :  { %622 = vmatpush1.msra.mxu0 %v561_v3  ;;  %711 = vmatpush1.msra.mxu1 %v563_v34  ;;  %v536_v3 = vld [vmem:[#allocation7 + $0xa0] sm:$0xff]  ;;  %v526_v34 = vld [vmem:[#allocation7 + $0x50] sm:$0xff] }
  0xfe   :  { %623 = vmatprep.subr.mxu0 %v553_v1  ;;  %712 = vmatprep.subr.mxu1 %v555_v51  ;;  %v528_v1 = vld [vmem:[#allocation7 + $0x60] sm:$0xff]  ;;  %v525_v51 = vld [vmem:[#allocation7 + $0x48] sm:$0xff] }
  0xff   :  { %624 = vmatpush1.msra.mxu0 %v552_v19  ;;  %713 = vmatpush1.msra.mxu1 %v554_v36  ;;  %v527_v19 = vld [vmem:[#allocation7 + $0x58] sm:$0xff]  ;;  %v517_v36 = vld [vmem:[#allocation7 + $0x8] sm:$0xff] }
 0x100   :  { %625 = vmatprep.subr.mxu0 %v544_v2  ;;  %714 = vmatprep.subr.mxu1 %v546_v17  ;;  %v519_v2 = vld [vmem:[#allocation7 + $0x18] sm:$0xff]  ;;  %v516_v17 = vld [vmem:[#allocation7] sm:$0xff] }
 0x101   :  { %626 = vmatpush1.msra.mxu0 %v543_v33  ;;  %715 = vmatpush1.msra.mxu1 %v545_v49  ;;  %v518_v33 = vld [vmem:[#allocation7 + $0x10] sm:$0xff]  ;;  %v6072_v49 = vmov 0.0  }
 0x102   :  { %627 = vmatprep.subr.mxu0 %v535_v50  ;;  %716 = vmatprep.subr.mxu1 %v537_v18  ;;  %v584_v50 = vld [vmem:[#allocation7 + $0x220] sm:$0xff]  ;;  %v586_v18 = vld [vmem:[#allocation7 + $0x230] sm:$0xff] }
 0x103   :  { %628 = vmatpush1.msra.mxu0 %v534_v35  ;;  %717 = vmatpush1.msra.mxu1 %v536_v3  ;;  %v398_v35 = vlaneseq }
 0x104   :  { %629 = vmatprep.subr.mxu0 %v526_v34  ;;  %718 = vmatprep.subr.mxu1 %v528_v1 }
 0x105   :  { %630 = vmatpush1.msra.mxu0 %v525_v51  ;;  %719 = vmatpush1.msra.mxu1 %v527_v19  ;;  %v399_v3 = vshrl.u32 %v398_v35, 7 }
 0x106   :  { %631 = vmatprep.subr.mxu0 %v517_v36  ;;  %720 = vmatprep.subr.mxu1 %v519_v2  ;;  %v379_v2 = vld [vmem:[%s6060_s4] sm:$0xf] }
 0x107   :  { %632 = vmatpush1.msra.mxu0 %v516_v17  ;;  %665 = vmatprep.mubr.f32.mxu0 %v6072_v49  ;;  %v5080_v34 = vsub.s32 1, %v399_v3  ;;  %v5082_v1 = vsub.s32 0, %v399_v3  ;;  %v5084_v51 = vsub.s32 2, %v399_v3  ;;  %v5088_v36 = vsub.s32 3, %v399_v3 }
 0x108   :  { %721 = vmatpush1.msra.mxu1 %v518_v33  ;;  %754 = vmatprep.mubr.f32.mxu1 %v6072_v49 }
 0x109   :  { %795 = vmatprep.subr.mxu0 %v584_v50  ;;  %884 = vmatprep.subr.mxu1 %v586_v18  ;;  %6163 = vst [vmem:[#allocation60_spill] sm:$0xff] %v5082_v1  ;;  %6164 = vst [vmem:[#allocation61_spill] sm:$0xff] %v5084_v51  ;;  %v421_v17 = vrot.slane %v379_v2, %v5080_v34  ;;  %v409_v50 = vrot.slane %v379_v2, %v5082_v1 }
 0x10a   :  { %6165 = vst [vmem:[#allocation62_spill] sm:$0xff] %v5088_v36  ;;  %v452_v35 = vrot.slane %v379_v2, %v5084_v51  ;;  %v401_v3 = vrot.slane %v379_v2, %v5088_v36 }
 0x1b8   :  { %v5086_v19 = vpop.f32.mrf.mxu1 }
 0x1b9   :  { %v386_v18 = vrot.slane %v5086_v19, 2  ;;  %v403_v40 = vmul.f32 %v5086_v19, %v401_v3 }
 0x1ba   :  { %v5094_v33 = vpop.f32.mrf.mxu1 }
 0x1bb   :  { %v385_v49 = vrot.slane %v5094_v33, 2  ;;  %v402_v37 = vmul.f32 %v401_v3, %v5094_v33 }
 0x1bc   :  { %v5101_v4 = vpop.f32.mrf.mxu1 }
 0x1bd   :  { %v387_v52 = vsel %vm384_vm3, %v385_v49, %v386_v18  ;;  %v397_v20 = vsel %vm384_vm3, 0.0, %v385_v49  ;;  %v390_v54 = vrot.slane %v5101_v4, 2 }
 0x1be   :  { %v410_v5 = vmul.f32 %v409_v50, %v397_v20  ;;  %v422_v53 = vmul.f32 %v421_v17, %v397_v20  ;;  %v423_v21 = vmul.f32 %v421_v17, %v387_v52  ;;  %v453_v38 = vmul.f32 %v452_v35, %v397_v20  ;;  %v5107_v22 = vpop.f32.mrf.mxu1 }
 0x1bf   :  { %v454_v6 = vmul.f32 %v452_v35, %v387_v52  ;;  %v411_v49 = vmul.f32 %v409_v50, %v387_v52  ;;  %v388_v56 = vrot.slane %v5107_v22, 2  ;;  %v405_v20 = vmul.f32 %v5101_v4, %v401_v3 }
 0x1c0   :  { %v414_v39 = vadd.f32 %v410_v5, %v402_v37  ;;  %v432_v7 = vrot.slane %v422_v53, 2  ;;  %v433_v2 = vrot.slane %v423_v21, 2  ;;  %v464_v55 = vrot.slane %v453_v38, 4  ;;  %v3775_v5 = vld [vmem:[%s6061_s5] ss:$0 sm:$0xff] }
 0x1c1   :  { %v465_v23 = vrot.slane %v454_v6, 4  ;;  %v426_v41 = vmul.f32 %v421_v17, %v390_v54  ;;  %v457_v9 = vmul.f32 %v452_v35, %v390_v54  ;;  %v389_v6 = vsel %vm384_vm3, %v386_v18, %v388_v56 }
 0x1c2   :  { %v434_v8 = vsel %vm384_vm3, %v432_v7, %v433_v2  ;;  %v391_v21 = vsel %vm384_vm3, %v388_v56, %v390_v54  ;;  %v404_v37 = vmul.f32 %v401_v3, %v5107_v22  ;;  %v412_v38 = vmul.f32 %v409_v50, %v389_v6 }
 0x1c3   :  { %v445_v24 = vadd.f32 %v434_v8, %v414_v39  ;;  %v466_v57 = vsel %vm463_vm4, %v464_v55, %v465_v23  ;;  %v413_v52 = vmul.f32 %v409_v50, %v391_v21  ;;  %v424_v8 = vmul.f32 %v421_v17, %v389_v6 }
 0x1c4   :  { %v415_v39 = vadd.f32 %v411_v49, %v403_v40  ;;  %v425_v53 = vmul.f32 %v421_v17, %v391_v21  ;;  %v455_v25 = vmul.f32 %v452_v35, %v389_v6  ;;  %v456_v42 = vmul.f32 %v452_v35, %v391_v21 }
 0x1c5   :  { %v477_v7 = vadd.f32 %v466_v57, %v445_v24  ;;  %v416_v55 = vadd.f32 %v412_v38, %v404_v37  ;;  %v417_v58 = vadd.f32 %v413_v52, %v405_v20  ;;  %v435_v26 = vrot.slane %v424_v8, 2 }
 0x1c6   :  { %v439_v43 = vrot.slane %v426_v41, 2  ;;  %v437_v11 = vrot.slane %v425_v53, 2  ;;  %v467_v59 = vrot.slane %v455_v25, 4  ;;  %v469_v18 = vrot.slane %v456_v42, 4 }
 0x1c7   :  { %v488_v10 = vadd.f32 %v3775_v5, %v477_v7  ;;  %v436_v54 = vsel %vm384_vm3, %v433_v2, %v435_v26  ;;  %v471_v56 = vrot.slane %v457_v9, 4 }
 0x1c8   :  { %v438_v24 = vsel %vm384_vm3, %v435_v26, %v437_v11  ;;  %v440_v57 = vsel %vm384_vm3, %v437_v11, %v439_v43  ;;  %v446_v40 = vadd.f32 %v436_v54, %v415_v39  ;;  %v468_v3 = vsel %vm463_vm4, %v465_v23, %v467_v59  ;;  %v575_v54 = vld [vmem:[#allocation7 + $0x1d8] sm:$0xff] }
 0x1c9   :  { %v492_v27 = vsub.f32 0.0, %v488_v10  ;;  %v447_v50 = vadd.f32 %v438_v24, %v416_v55  ;;  %v448_v35 = vadd.f32 %v440_v57, %v417_v58  ;;  %v470_v49 = vsel %vm463_vm4, %v467_v59, %v469_v18  ;;  %v583_v55 = vld [vmem:[#allocation7 + $0x218] sm:$0xff]  ;;  %v574_v24 = vld [vmem:[#allocation7 + $0x1d0] sm:$0xff] }
 0x1ca   :  { %v472_v41 = vsel %vm463_vm4, %v469_v18, %v471_v56  ;;  %v478_v25 = vadd.f32 %v468_v3, %v446_v40  ;;  %v585_v18 = vld [vmem:[#allocation7 + $0x228] sm:$0xff]  ;;  %v566_v57 = vld [vmem:[#allocation7 + $0x190] sm:$0xff]  ;;  %v576_v40 = vld [vmem:[#allocation7 + $0x1e0] sm:$0xff] }
 0x1cb   :  { %v496_v17 = vmul.f32 1.442695, %v492_v27  ;;  %v479_v42 = vadd.f32 %v470_v49, %v447_v50  ;;  %v480_v20 = vadd.f32 %v472_v41, %v448_v35  ;;  %v577_v56 = vld [vmem:[#allocation7 + $0x1e8] sm:$0xff]  ;;  %v568_v50 = vld [vmem:[#allocation7 + $0x1a0] sm:$0xff]  ;;  %v567_v41 = vld [vmem:[#allocation7 + $0x198] sm:$0xff] }
 0x1cc   :  { %v489_v2 = vadd.f32 %v3775_v5, %v478_v25  ;;  %v557_v35 = vld [vmem:[#allocation7 + $0x148] sm:$0xff]  ;;  %v556_v25 = vld [vmem:[#allocation7 + $0x140] sm:$0xff] }
 0x1cd   :  { %4348 = vpow2.f32 %v496_v17  ;;  %v490_v9 = vadd.f32 %v3775_v5, %v479_v42  ;;  %v5126_v6 = vadd.f32 %v3775_v5, %v480_v20  ;;  %v6166_v17 = vmov 0.0   ;;  %v559_v20 = vld [vmem:[#allocation7 + $0x158] sm:$0xff] }
 0x1ce   :  { %v493_v26 = vsub.f32 0.0, %v489_v2 }
 0x1cf   :  { %v494_v11 = vsub.f32 0.0, %v490_v9  ;;  %v495_v27 = vsub.f32 0.0, %v5126_v6 }
 0x1d0   :  { %v498_v43 = vmul.f32 1.442695, %v493_v26  ;;  %v548_v26 = vld [vmem:[#allocation7 + $0x100] sm:$0xff] }
 0x1d1   :  { %v500_v58 = vmul.f32 1.442695, %v494_v11  ;;  %v502_v23 = vmul.f32 1.442695, %v495_v27  ;;  %v558_v11 = vld [vmem:[#allocation7 + $0x150] sm:$0xff] }
 0x1d2   :  { %4350 = vpow2.f32 %v498_v43  ;;  %v550_v43 = vld [vmem:[#allocation7 + $0x110] sm:$0xff] }
 0x1d3   :  { %4352 = vpow2.f32 %v500_v58  ;;  %v539_v58 = vld [vmem:[#allocation7 + $0xb8] sm:$0xff] }
 0x1d4   :  { %4354 = vpow2.f32 %v502_v23  ;;  %v549_v23 = vld [vmem:[#allocation7 + $0x108] sm:$0xff] }
 0x1da   :  { %v4349_v59 = vpop.eup %4348 }
 0x1db   :  { %v504_v21 = vadd.f32 1.0, %v4349_v59  ;;  %v538_v59 = vld [vmem:[#allocation7 + $0xb0] sm:$0xff] }
 0x1dd   :  { %4356 = vrcp.f32 %v504_v21 }
 0x1df   :  { %v4351_v37 = vpop.eup %4350 }
 0x1e0   :  { %v4353_v7 = vpop.eup %4352  ;;  %v505_v38 = vadd.f32 1.0, %v4351_v37  ;;  %v530_v37 = vld [vmem:[#allocation7 + $0x70] sm:$0xff] }
 0x1e1   :  { %v506_v52 = vadd.f32 1.0, %v4353_v7  ;;  %v4355_v5 = vpop.eup %4354  ;;  %v540_v7 = vld [vmem:[#allocation7 + $0xc0] sm:$0xff] }
 0x1e2   :  { %4358 = vrcp.f32 %v505_v38  ;;  %v507_v8 = vadd.f32 1.0, %v4355_v5  ;;  %v532_v5 = vld [vmem:[#allocation7 + $0x80] sm:$0xff] }
 0x1e3   :  { %4360 = vrcp.f32 %v506_v52  ;;  %v529_v52 = vld [vmem:[#allocation7 + $0x68] sm:$0xff] }
 0x1e4   :  { %4362 = vrcp.f32 %v507_v8  ;;  %v521_v8 = vld [vmem:[#allocation7 + $0x28] sm:$0xff] }
 0x1ea   :  { %v4357_v39 = vpop.eup %4356 }
 0x1eb   :  { %v5129_v53 = vmul.f32 %v4357_v39, %v488_v10  ;;  %v565_v10 = vld [vmem:[#allocation7 + $0x188] sm:$0xff]  ;;  %v531_v39 = vld [vmem:[#allocation7 + $0x78] sm:$0xff] }
 0x1ed   :  { %3776 = vmatmul.mubr.msk.f32.vlgmr.msra.gmra.mxu0 %vm588_vm5, %v5129_v53  ;;  %3780 = vmatmul.mubr.msk.f32.vlgmr.msra.gmra.mxu1 %vm588_vm5, %v5129_v53 }
 0x1ee   :  { %796 = vmatpush1.msra.mxu0 %v583_v55  ;;  %885 = vmatpush1.msra.mxu1 %v585_v18  ;;  %v520_v55 = vld [vmem:[#allocation7 + $0x20] sm:$0xff]  ;;  %v523_v18 = vld [vmem:[#allocation7 + $0x38] sm:$0xff] }
 0x1ef   :  { %797 = vmatprep.subr.mxu0 %v575_v54  ;;  %886 = vmatprep.subr.mxu1 %v577_v56  ;;  %v4359_v3 = vpop.eup %4358  ;;  %v587_v54 = vld [vmem:[#allocation7 + $0x238] sm:$0xff]  ;;  %v578_v56 = vld [vmem:[#allocation7 + $0x1f0] sm:$0xff] }
 0x1f0   :  { %798 = vmatpush1.msra.mxu0 %v574_v24  ;;  %671 = vmatprep.mubr.f32.mxu0 %v6166_v17  ;;  %v5137_v49 = vmul.f32 %v4359_v3, %v489_v2  ;;  %v4361_v42 = vpop.eup %4360  ;;  %v547_v2 = vld [vmem:[#allocation7 + $0xf8] sm:$0xff]  ;;  %v569_v24 = vld [vmem:[#allocation7 + $0x1a8] sm:$0xff] }
 0x1f1   :  { %760 = vmatprep.mubr.f32.mxu1 %v6166_v17  ;;  %799 = vmatprep.subr.mxu0 %v566_v57  ;;  %v5143_v27 = vmul.f32 %v4361_v42, %v490_v9  ;;  %v4363_v21 = vpop.eup %4362  ;;  %v541_v9 = vld [vmem:[#allocation7 + $0xc8] sm:$0xff]  ;;  %v560_v57 = vld [vmem:[#allocation7 + $0x160] sm:$0xff] }
 0x1f2   :  { %887 = vmatpush1.msra.mxu1 %v576_v40  ;;  %800 = vmatpush1.msra.mxu0 %v565_v10  ;;  %v5153_v38 = vmul.f32 %v4363_v21, %v5126_v6  ;;  %v522_v6 = vld [vmem:[#allocation7 + $0x30] sm:$0xff]  ;;  %v551_v40 = vld [vmem:[#allocation7 + $0x118] sm:$0xff]  ;;  %v5197_v3 = vld [vmem:[%s6069_s13 + $0xe8] sm:$0xff] }
 0x1f3   :  { %888 = vmatprep.subr.mxu1 %v568_v50  ;;  %801 = vmatprep.subr.mxu0 %v557_v35  ;;  %v542_v10 = vld [vmem:[#allocation7 + $0xd0] sm:$0xff]  ;;  %v533_v50 = vld [vmem:[#allocation7 + $0x88] sm:$0xff]  ;;  %v524_v35 = vld [vmem:[#allocation7 + $0x40] sm:$0xff]  ;;  %6167 = vst [vmem:[#allocation63_spill] sm:$0xff] %v5197_v3 }
 0x1f4   :  { %3777 = vmatmul.mubr.msk.f32.gmra.mxu0 %vm588_vm5, %v5137_v49  ;;  %3781 = vmatmul.mubr.msk.f32.gmra.mxu1 %vm588_vm5, %v5137_v49  ;;  %v5214_v42 = vld [vmem:[%s6069_s13 + $0xf0] sm:$0xff]  ;;  %v5268_v21 = vld [vmem:[%s6069_s13 + $0x88] sm:$0xff] }
 0x1f5   :  { %889 = vmatpush1.msra.mxu1 %v567_v41  ;;  %802 = vmatpush1.msra.mxu0 %v556_v25  ;;  %v5202_v41 = vld [vmem:[%s6069_s13 + $0xf8] sm:$0xff]  ;;  %v5208_v25 = vld [vmem:[%s6069_s13 + $0xe0] sm:$0xff]  ;;  %6170 = vst [vmem:[#allocation66_spill] sm:$0xff] %v5214_v42  ;;  %6179 = vst [vmem:[#allocation75_spill] sm:$0xff] %v5268_v21 }
 0x1f6   :  { %890 = vmatprep.subr.mxu1 %v559_v20  ;;  %677 = vmatprep.mubr.f32.mxu0 %v6166_v17  ;;  %6168 = vst [vmem:[#allocation64_spill] sm:$0xff] %v5202_v41  ;;  %6169 = vst [vmem:[#allocation65_spill] sm:$0xff] %v5208_v25  ;;  %v5220_v20 = vld [vmem:[%s6069_s13 + $0xc8] sm:$0xff] }
 0x1f7   :  { %766 = vmatprep.mubr.f32.mxu1 %v6166_v17  ;;  %803 = vmatprep.subr.mxu0 %v548_v26  ;;  %6171 = vst [vmem:[#allocation67_spill] sm:$0xff] %v5220_v20  ;;  %v5226_v26 = vld [vmem:[%s6069_s13 + $0xd8] sm:$0xff] }
 0x1f8   :  { %891 = vmatpush1.msra.mxu1 %v558_v11  ;;  %3778 = vmatmul.mubr.msk.f32.gmra.mxu0 %vm588_vm5, %v5143_v27  ;;  %6172 = vst [vmem:[#allocation68_spill] sm:$0xff] %v5226_v26  ;;  %v5232_v11 = vld [vmem:[%s6069_s13 + $0xc0] sm:$0xff] }
 0x1f9   :  { %3782 = vmatmul.mubr.msk.f32.gmra.mxu1 %vm588_vm5, %v5143_v27  ;;  %804 = vmatpush1.msra.mxu0 %v547_v2  ;;  %6173 = vst [vmem:[#allocation69_spill] sm:$0xff] %v5232_v11  ;;  %v5238_v2 = vld [vmem:[%s6069_s13 + $0xd0] sm:$0xff] }
 0x1fa   :  { %892 = vmatprep.subr.mxu1 %v550_v43  ;;  %805 = vmatprep.subr.mxu0 %v539_v58  ;;  %6174 = vst [vmem:[#allocation70_spill] sm:$0xff] %v5238_v2  ;;  %v5244_v43 = vld [vmem:[%s6069_s13 + $0xa8] sm:$0xff]  ;;  %v5250_v58 = vld [vmem:[%s6069_s13 + $0xb8] sm:$0xff] }
 0x1fb   :  { %893 = vmatpush1.msra.mxu1 %v549_v23  ;;  %806 = vmatpush1.msra.mxu0 %v538_v59  ;;  %6175 = vst [vmem:[#allocation71_spill] sm:$0xff] %v5244_v43  ;;  %6176 = vst [vmem:[#allocation72_spill] sm:$0xff] %v5250_v58  ;;  %v5256_v23 = vld [vmem:[%s6069_s13 + $0xa0] sm:$0xff]  ;;  %v5262_v59 = vld [vmem:[%s6069_s13 + $0xb0] sm:$0xff] }
 0x1fc   :  { %894 = vmatprep.subr.mxu1 %v541_v9  ;;  %683 = vmatprep.mubr.f32.mxu0 %v6166_v17  ;;  %6177 = vst [vmem:[#allocation73_spill] sm:$0xff] %v5256_v23  ;;  %6178 = vst [vmem:[#allocation74_spill] sm:$0xff] %v5262_v59  ;;  %v5274_v9 = vld [vmem:[%s6069_s13 + $0x98] sm:$0xff] }
 0x1fd   :  { %772 = vmatprep.mubr.f32.mxu1 %v6166_v17  ;;  %807 = vmatprep.subr.mxu0 %v530_v37  ;;  %6180 = vst [vmem:[#allocation76_spill] sm:$0xff] %v5274_v9  ;;  %v5280_v37 = vld [vmem:[%s6069_s13 + $0x80] sm:$0xff] }
 0x1fe   :  { %895 = vmatpush1.msra.mxu1 %v540_v7  ;;  %3779 = vmatmul.mubr.msk.f32.gmra.mxu0 %vm588_vm5, %v5153_v38  ;;  %6181 = vst [vmem:[#allocation77_spill] sm:$0xff] %v5280_v37  ;;  %v5286_v7 = vld [vmem:[%s6069_s13 + $0x90] sm:$0xff] }
 0x1ff   :  { %3783 = vmatmul.mubr.msk.f32.gmra.mxu1 %vm588_vm5, %v5153_v38  ;;  %808 = vmatpush1.msra.mxu0 %v529_v52  ;;  %6182 = vst [vmem:[#allocation78_spill] sm:$0xff] %v5286_v7  ;;  %v5292_v52 = vld [vmem:[%s6069_s13 + $0x68] sm:$0xff] }
 0x200   :  { %896 = vmatprep.subr.mxu1 %v532_v5  ;;  %809 = vmatprep.subr.mxu0 %v521_v8  ;;  %6183 = vst [vmem:[#allocation79_spill] sm:$0xff] %v5292_v52  ;;  %v5298_v5 = vld [vmem:[%s6069_s13 + $0x78] sm:$0xff]  ;;  %v5304_v8 = vld [vmem:[%s6069_s13 + $0x60] sm:$0xff] }
 0x201   :  { %897 = vmatpush1.msra.mxu1 %v531_v39  ;;  %810 = vmatpush1.msra.mxu0 %v520_v55  ;;  %6184 = vst [vmem:[#allocation80_spill] sm:$0xff] %v5298_v5  ;;  %6185 = vst [vmem:[#allocation81_spill] sm:$0xff] %v5304_v8  ;;  %v5310_v39 = vld [vmem:[%s6069_s13 + $0x70] sm:$0xff]  ;;  %v5316_v55 = vld [vmem:[%s6069_s13 + $0x48] sm:$0xff] }
 0x202   :  { %898 = vmatprep.subr.mxu1 %v523_v18  ;;  %843 = vmatprep.mubr.f32.mxu0 %v6166_v17  ;;  %6186 = vst [vmem:[#allocation82_spill] sm:$0xff] %v5310_v39  ;;  %6187 = vst [vmem:[#allocation83_spill] sm:$0xff] %v5316_v55  ;;  %v5322_v18 = vld [vmem:[%s6069_s13 + $0x58] sm:$0xff] }
 0x203   :  { %899 = vmatpush1.msra.mxu1 %v522_v6  ;;  %932 = vmatprep.mubr.f32.mxu1 %v6166_v17  ;;  %6188 = vst [vmem:[#allocation84_spill] sm:$0xff] %v5322_v18  ;;  %v5328_v6 = vld [vmem:[%s6069_s13 + $0x40] sm:$0xff] }
 0x204   :  { %4161 = vmatprep.subr.mxu0 %v587_v54  ;;  %3784 = vmatmul.mubr.msk.f32.vlgmr.msra.gmra.mxu0 %vm588_vm5, %v5129_v53  ;;  %6189 = vst [vmem:[#allocation85_spill] sm:$0xff] %v5328_v6 }
 0x205   :  { %3788 = vmatmul.mubr.msk.f32.vlgmr.msra.gmra.mxu1 %vm588_vm5, %v5129_v53  ;;  %4162 = vmatpush3.msra.mxu0 %v587_v54  ;;  %v5334_v54 = vld [vmem:[%s6069_s13 + $0x50] sm:$0xff] }
 0x206   :  { %4163 = vmatprep.subr.mxu0 %v578_v56  ;;  %849 = vmatprep.mubr.f32.mxu0 %v6166_v17  ;;  %6190 = vst [vmem:[#allocation86_spill] sm:$0xff] %v5334_v54 }
 0x207   :  { %4164 = vmatpush3.msra.mxu0 %v578_v56  ;;  %938 = vmatprep.mubr.f32.mxu1 %v6166_v17  ;;  %v5340_v56 = vld [vmem:[%s6069_s13 + $0x28] sm:$0xff] }
 0x208   :  { %4165 = vmatprep.subr.mxu0 %v569_v24  ;;  %3785 = vmatmul.mubr.msk.f32.gmra.mxu0 %vm588_vm5, %v5137_v49  ;;  %6191 = vst [vmem:[#allocation87_spill] sm:$0xff] %v5340_v56 }
 0x209   :  { %3789 = vmatmul.mubr.msk.f32.gmra.mxu1 %vm588_vm5, %v5137_v49  ;;  %4166 = vmatpush3.msra.mxu0 %v569_v24  ;;  %v5346_v24 = vld [vmem:[%s6069_s13 + $0x38] sm:$0xff] }
 0x20a   :  { %4167 = vmatprep.subr.mxu0 %v560_v57  ;;  %855 = vmatprep.mubr.f32.mxu0 %v6166_v17  ;;  %6192 = vst [vmem:[#allocation88_spill] sm:$0xff] %v5346_v24 }
 0x20b   :  { %4168 = vmatpush3.msra.mxu0 %v560_v57  ;;  %944 = vmatprep.mubr.f32.mxu1 %v6166_v17  ;;  %v5352_v57 = vld [vmem:[%s6069_s13 + $0x20] sm:$0xff] }
 0x20c   :  { %4169 = vmatprep.subr.mxu0 %v551_v40  ;;  %3786 = vmatmul.mubr.msk.f32.gmra.mxu0 %vm588_vm5, %v5143_v27  ;;  %6193 = vst [vmem:[#allocation89_spill] sm:$0xff] %v5352_v57 }
 0x20d   :  { %3790 = vmatmul.mubr.msk.f32.gmra.mxu1 %vm588_vm5, %v5143_v27  ;;  %4170 = vmatpush3.msra.mxu0 %v551_v40  ;;  %v5358_v40 = vld [vmem:[%s6069_s13 + $0x30] sm:$0xff] }
 0x20e   :  { %4171 = vmatprep.subr.mxu0 %v542_v10  ;;  %861 = vmatprep.mubr.f32.mxu0 %v6166_v17  ;;  %6194 = vst [vmem:[#allocation90_spill] sm:$0xff] %v5358_v40 }
 0x20f   :  { %4172 = vmatpush3.msra.mxu0 %v542_v10  ;;  %950 = vmatprep.mubr.f32.mxu1 %v6166_v17  ;;  %v5364_v10 = vld [vmem:[%s6069_s13 + $0x8] sm:$0xff] }
 0x210   :  { %4173 = vmatprep.subr.mxu0 %v533_v50  ;;  %3787 = vmatmul.mubr.msk.f32.gmra.mxu0 %vm588_vm5, %v5153_v38  ;;  %6195 = vst [vmem:[#allocation91_spill] sm:$0xff] %v5364_v10 }
 0x211   :  { %3791 = vmatmul.mubr.msk.f32.gmra.mxu1 %vm588_vm5, %v5153_v38  ;;  %4174 = vmatpush3.msra.mxu0 %v533_v50  ;;  %v5370_v50 = vld [vmem:[%s6069_s13 + $0x18] sm:$0xff] }
 0x212   :  { %4175 = vmatprep.subr.mxu0 %v524_v35  ;;  %4177 = vmatprep.mubr.msk.f32.mxu0 %vm588_vm5, %v5129_v53  ;;  %6196 = vst [vmem:[#allocation92_spill] sm:$0xff] %v5370_v50 }
 0x213   :  { %4176 = vmatpush3.msra.mxu0 %v524_v35  ;;  %1193 = vmatprep.mubr.f32.mxu1 %v6166_v17  ;;  %v5376_v35 = vld [vmem:[%s6069_s13] sm:$0xff] }
 0x214   :  { %4178 = vmatmul.mubr.msk.f32.vlgmr.msra.gmra.mxu0 %vm588_vm5, %v5137_v49  ;;  %1145 = vmatprep.subr.mxu1 %v5197_v3  ;;  %6197 = vst [vmem:[#allocation93_spill] sm:$0xff] %v5376_v35 }
 0x215   :  { %4180 = vmatprep.mubr.msk.f32.mxu0 %vm588_vm5, %v5143_v27  ;;  %1258 = vmatprep.subr.mxu0 %v5202_v41 }
 0x216   :  { %1146 = vmatpush1.msra.mxu1 %v5208_v25  ;;  %1259 = vmatpush1.msra.mxu0 %v5214_v42 }
 0x217   :  { %1147 = vmatprep.subr.mxu1 %v5220_v20  ;;  %1260 = vmatprep.subr.mxu0 %v5226_v26 }
 0x218   :  { %4181 = vmatmul.mubr.msk.f32.gmra.mxu0 %vm588_vm5, %v5153_v38  ;;  %1148 = vmatpush1.msra.mxu1 %v5232_v11 }
 0x219   :  { %1306 = vmatprep.mubr.f32.mxu0 %v6166_v17  ;;  %1261 = vmatpush1.msra.mxu0 %v5238_v2 }
 0x21a   :  { %1149 = vmatprep.subr.mxu1 %v5244_v43  ;;  %1262 = vmatprep.subr.mxu0 %v5250_v58 }
 0x21b   :  { %1150 = vmatpush1.msra.mxu1 %v5256_v23  ;;  %1263 = vmatpush1.msra.mxu0 %v5262_v59 }
 0x21c   :  { %1151 = vmatprep.subr.mxu1 %v5268_v21  ;;  %1264 = vmatprep.subr.mxu0 %v5274_v9 }
 0x21d   :  { %1152 = vmatpush1.msra.mxu1 %v5280_v37  ;;  %1265 = vmatpush1.msra.mxu0 %v5286_v7 }
 0x21e   :  { %1153 = vmatprep.subr.mxu1 %v5292_v52  ;;  %1266 = vmatprep.subr.mxu0 %v5298_v5 }
 0x21f   :  { %1154 = vmatpush1.msra.mxu1 %v5304_v8  ;;  %1267 = vmatpush1.msra.mxu0 %v5310_v39 }
 0x220   :  { %1155 = vmatprep.subr.mxu1 %v5316_v55  ;;  %1268 = vmatprep.subr.mxu0 %v5322_v18 }
 0x221   :  { %1156 = vmatpush1.msra.mxu1 %v5328_v6  ;;  %1269 = vmatpush1.msra.mxu0 %v5334_v54 }
 0x222   :  { %1157 = vmatprep.subr.mxu1 %v5340_v56  ;;  %1270 = vmatprep.subr.mxu0 %v5346_v24  ;;  %v5382_v24 = vld [vmem:[%s6069_s13 + $0x10] sm:$0xff] }
 0x223   :  { %1158 = vmatpush1.msra.mxu1 %v5352_v57  ;;  %1271 = vmatpush1.msra.mxu0 %v5358_v40  ;;  %6198 = vst [vmem:[#allocation94_spill] sm:$0xff] %v5382_v24 }
 0x224   :  { %1159 = vmatprep.subr.mxu1 %v5364_v10  ;;  %1272 = vmatprep.subr.mxu0 %v5370_v50 }
 0x225   :  { %1160 = vmatpush1.msra.mxu1 %v5376_v35  ;;  %1273 = vmatpush1.msra.mxu0 %v5382_v24 }
 0x2ad   :  { %v5386_v40 = vpop.f32.mrf.mxu0  ;;  %v5388_v57 = vpop.f32.mrf.mxu1 }
 0x2af   :  { %v5390_v10 = vpop.f32.mrf.mxu0  ;;  %v5392_v54 = vpop.f32.mrf.mxu1 }
 0x2b4   :  { %v5394_v56 = vpop.f32.mrf.mxu0  ;;  %v5396_v50 = vpop.f32.mrf.mxu1 }
 0x2b6   :  { %v5398_v18 = vpop.f32.mrf.mxu0  ;;  %v5400_v6 = vpop.f32.mrf.mxu1 }
 0x2b8   :  { %v5402_v39 = vpop.f32.mrf.mxu0 }
 0x2b9   :  { %v5404_v35 = vpop.f32.mrf.mxu1 }
 0x2ba   :  { %v5406_v24 = vpop.f32.mrf.mxu0 }
 0x2bb   :  { %v5408_v55 = vpop.f32.mrf.mxu1 }
 0x2be   :  { %v5410_v5 = vpop.f32.mrf.mxu0 }
 0x2bf   :  { %v5412_v8 = vpop.f32.mrf.mxu1 }
 0x2c0   :  { %v5414_v7 = vpop.f32.mrf.mxu0 }
 0x2c1   :  { %v5416_v52 = vpop.f32.mrf.mxu1 }
 0x2c4   :  { %v845_v9 = vpop.f32.mrf.mxu0 }
 0x2c5   :  { %1042 = vst [vmem:[#allocation5 + $0x30] sm:$0xff] %v845_v9  ;;  %v934_v37 = vpop.f32.mrf.mxu1 }
 0x2c6   :  { %1044 = vst [vmem:[#allocation5 + $0x58] sm:$0xff] %v934_v37  ;;  %v847_v59 = vpop.f32.mrf.mxu0 }
 0x2c7   :  { %1043 = vst [vmem:[#allocation5] sm:$0xff] %v847_v59  ;;  %v936_v21 = vpop.f32.mrf.mxu1 }
 0x2c8   :  { %1045 = vst [vmem:[#allocation5 + $0x18] sm:$0xff] %v936_v21  ;;  %v851_v58 = vpop.f32.mrf.mxu0 }
 0x2c9   :  { %1046 = vst [vmem:[#allocation5 + $0x50] sm:$0xff] %v851_v58  ;;  %v940_v23 = vpop.f32.mrf.mxu1  ;;  %v3796_v58 = vld [vmem:[%s6063_s7] ss:$0 sm:$0xff] }
 0x2ca   :  { %1048 = vst [vmem:[#allocation5 + $0x8] sm:$0xff] %v940_v23  ;;  %v853_v2 = vpop.f32.mrf.mxu0 }
 0x2cb   :  { %1047 = vst [vmem:[#allocation5 + $0x68] sm:$0xff] %v853_v2  ;;  %v942_v43 = vpop.f32.mrf.mxu1 }
 0x2cc   :  { %1049 = vst [vmem:[#allocation5 + $0x48] sm:$0xff] %v942_v43  ;;  %v857_v26 = vpop.f32.mrf.mxu0 }
 0x2cd   :  { %1050 = vst [vmem:[#allocation5 + $0x40] sm:$0xff] %v857_v26  ;;  %v946_v11 = vpop.f32.mrf.mxu1 }
 0x2ce   :  { %1052 = vst [vmem:[#allocation5 + $0x10] sm:$0xff] %v946_v11  ;;  %v859_v42 = vpop.f32.mrf.mxu0 }
 0x2cf   :  { %1051 = vst [vmem:[#allocation5 + $0x20] sm:$0xff] %v859_v42  ;;  %v948_v9 = vpop.f32.mrf.mxu1 }
 0x2d0   :  { %1053 = vst [vmem:[#allocation5 + $0x38] sm:$0xff] %v948_v9  ;;  %v863_v37 = vpop.f32.mrf.mxu0 }
 0x2d1   :  { %1054 = vst [vmem:[#allocation5 + $0x60] sm:$0xff] %v863_v37  ;;  %v952_v59 = vpop.f32.mrf.mxu1 }
 0x2d2   :  { %1056 = vst [vmem:[#allocation5 + $0x78] sm:$0xff] %v952_v59  ;;  %v865_v21 = vpop.f32.mrf.mxu0 }
 0x2d3   :  { %1055 = vst [vmem:[#allocation5 + $0x70] sm:$0xff] %v865_v21  ;;  %v954_v2 = vpop.f32.mrf.mxu1 }
 0x2d4   :  { %1057 = vst [vmem:[#allocation5 + $0x28] sm:$0xff] %v954_v2  ;;  %v4179_v43 = vpop.f32.mrf.mxu0 }
 0x2d5   :  { %v1066_v26 = vadd.f32 %v4179_v43, %v3796_v58 }
 0x2d6   :  { %v1023_v23 = vpop.f32.mrf.mxu0 }
 0x2d7   :  { %v1074_v11 = vmin.f32 %v1066_v26, 20.0  ;;  %v1065_v20 = vadd.f32 %v3796_v58, %v1023_v23  ;;  %vm1070_vm7 = vcmp.gt.f32.partialorder %v1066_v26, 20.0 }
 0x2d8   :  { %v4182_v42 = vpop.f32.mrf.mxu0 }
 0x2d9   :  { %v1079_v41 = vmul.f32 1.442695, %v1074_v11  ;;  %v1073_v9 = vmin.f32 %v1065_v20, 20.0  ;;  %v1068_v25 = vadd.f32 %v4182_v42, %v3796_v58  ;;  %vm1069_vm6 = vcmp.gt.f32.partialorder %v1065_v20, 20.0 }
 0x2da   :  { %v1033_v37 = vpop.f32.mrf.mxu0 }
 0x2db   :  { %4364 = vpow2.f32 %v1079_v41  ;;  %v1077_v59 = vmul.f32 1.442695, %v1073_v9  ;;  %v1076_v3 = vmin.f32 %v1068_v25, 20.0  ;;  %v1067_v44 = vadd.f32 %v3796_v58, %v1033_v37 }
 0x2dc   :  { %vm1072_vm9 = vcmp.gt.f32.partialorder %v1068_v25, 20.0 }
 0x2dd   :  { %4366 = vpow2.f32 %v1077_v59  ;;  %v1083_v12 = vmul.f32 1.442695, %v1076_v3  ;;  %v1075_v60 = vmin.f32 %v1067_v44, 20.0  ;;  %vm1071_vm8 = vcmp.gt.f32.partialorder %v1067_v44, 20.0 }
 0x2df   :  { %v1081_v21 = vmul.f32 1.442695, %v1075_v60  ;;  %4368 = vpow2.f32 %v1083_v12 }
 0x2e1   :  { %4370 = vpow2.f32 %v1081_v21 }
 0x2e8   :  { %v4365_v2 = vpop.eup %4364 }
 0x2e9   :  { %v1086_v43 = vadd.f32 1.0, %v4365_v2  ;;  %v1355_v2 = vld [vmem:[%s6064_s8] sm:$0xf] }
 0x2ea   :  { %v4367_v28 = vpop.eup %4366 }
 0x2eb   :  { %v1085_v45 = vadd.f32 1.0, %v4367_v28  ;;  %4372 = vlog2.f32 %v1086_v43  ;;  %v1360_v43 = vrot.slane %v1355_v2, %v5082_v1 }
 0x2ec   :  { %v4369_v23 = vpop.eup %4368 }
 0x2ed   :  { %4374 = vlog2.f32 %v1085_v45  ;;  %v1088_v13 = vadd.f32 1.0, %v4369_v23  ;;  %v1368_v23 = vrot.slane %v1355_v2, %v5084_v51 }
 0x2ee   :  { %v4371_v11 = vpop.eup %4370 }
 0x2ef   :  { %v1087_v42 = vadd.f32 1.0, %v4371_v11  ;;  %v1364_v11 = vrot.slane %v1355_v2, %v5080_v34 }
 0x2f1   :  { %4376 = vlog2.f32 %v1087_v42  ;;  %v1372_v42 = vrot.slane %v1355_v2, %v5088_v36 }
 0x2f2   :  { %4378 = vlog2.f32 %v1088_v13 }
 0x2f8   :  { %v4373_v41 = vpop.eup %4372 }
 0x2f9   :  { %v1092_v60 = vmul.f32 0.6931472, %v4373_v41 }
 0x2fa   :  { %v4375_v58 = vpop.eup %4374 }
 0x2fb   :  { %v1090_v9 = vmul.f32 0.6931472, %v4375_v58  ;;  %v1098_v28 = vsel %vm1070_vm7, %v1066_v26, %v1092_v60 }
 0x2fd   :  { %v1097_v3 = vsel %vm1069_vm6, %v1065_v20, %v1090_v9 }
 0x2fe   :  { %3797 = vmatmul.mubr.msk.f32.vlgmr.msra.gmra.mxu1 %vm588_vm5, %v1097_v3  ;;  %3805 = vmatmul.mubr.msk.f32.vlgmr.msra.gmra.mxu0 %vm588_vm5, %v1097_v3  ;;  %v4377_v12 = vpop.eup %4376 }
 0x2ff   :  { %1199 = vmatprep.mubr.f32.mxu1 %v6166_v17  ;;  %1312 = vmatprep.mubr.f32.mxu0 %v6166_v17  ;;  %v1094_v45 = vmul.f32 0.6931472, %v4377_v12  ;;  %v4379_v37 = vpop.eup %4378 }
 0x300   :  { %v1096_v20 = vmul.f32 0.6931472, %v4379_v37 }
 0x301   :  { %v1099_v13 = vsel %vm1071_vm8, %v1067_v44, %v1094_v45  ;;  %v1101_v44 = vmul.f32 %v1097_v3, %v5129_v53 }
 0x302   :  { %3798 = vmatmul.mubr.msk.f32.gmra.mxu1 %vm588_vm5, %v1098_v28  ;;  %3806 = vmatmul.mubr.msk.f32.gmra.mxu0 %vm588_vm5, %v1098_v28  ;;  %v1100_v26 = vsel %vm1072_vm9, %v1068_v25, %v1096_v20  ;;  %v1102_v25 = vmul.f32 %v1098_v28, %v5137_v49  ;;  %v1103_v59 = vmul.f32 %v1099_v13, %v5143_v27 }
 0x303   :  { %1205 = vmatprep.mubr.f32.mxu1 %v6166_v17  ;;  %1318 = vmatprep.mubr.f32.mxu0 %v6166_v17  ;;  %v1104_v21 = vmul.f32 %v1100_v26, %v5153_v38 }
 0x306   :  { %3799 = vmatmul.mubr.msk.f32.gmra.mxu1 %vm588_vm5, %v1099_v13  ;;  %3807 = vmatmul.mubr.msk.f32.gmra.mxu0 %vm588_vm5, %v1099_v13 }
 0x307   :  { %1211 = vmatprep.mubr.f32.mxu1 %v6166_v17  ;;  %1324 = vmatprep.mubr.f32.mxu0 %v6166_v17 }
 0x30a   :  { %3800 = vmatmul.mubr.msk.f32.gmra.mxu1 %vm588_vm5, %v1100_v26  ;;  %3808 = vmatmul.mubr.msk.f32.gmra.mxu0 %vm588_vm5, %v1100_v26 }
 0x30b   :  { %1217 = vmatprep.mubr.f32.mxu1 %v6166_v17  ;;  %1330 = vmatprep.mubr.f32.mxu0 %v6166_v17 }
 0x30e   :  { %3801 = vmatmul.mubr.msk.f32.gmra.mxu1 %vm588_vm5, %v1101_v44  ;;  %3809 = vmatmul.mubr.msk.f32.gmra.mxu0 %vm588_vm5, %v1101_v44 }
 0x30f   :  { %1223 = vmatprep.mubr.f32.mxu1 %v6166_v17  ;;  %1336 = vmatprep.mubr.f32.mxu0 %v6166_v17 }
 0x312   :  { %3802 = vmatmul.mubr.msk.f32.gmra.mxu1 %vm588_vm5, %v1102_v25  ;;  %3810 = vmatmul.mubr.msk.f32.gmra.mxu0 %vm588_vm5, %v1102_v25 }
 0x313   :  { %1229 = vmatprep.mubr.f32.mxu1 %v6166_v17  ;;  %1342 = vmatprep.mubr.f32.mxu0 %v6166_v17 }
 0x316   :  { %3803 = vmatmul.mubr.msk.f32.gmra.mxu1 %vm588_vm5, %v1103_v59  ;;  %3811 = vmatmul.mubr.msk.f32.gmra.mxu0 %vm588_vm5, %v1103_v59 }
 0x317   :  { %1235 = vmatprep.mubr.f32.mxu1 %v6166_v17  ;;  %1348 = vmatprep.mubr.f32.mxu0 %v6166_v17 }
 0x31a   :  { %3804 = vmatmul.mubr.msk.f32.gmra.mxu1 %vm588_vm5, %v1104_v21  ;;  %3812 = vmatmul.mubr.msk.f32.gmra.mxu0 %vm588_vm5, %v1104_v21 }
 0x3be   :  { %v1195_v41 = vpop.f32.mrf.mxu1  ;;  %v1308_v17 = vpop.f32.mrf.mxu0 }
 0x3bf   :  { %v1377_v58 = vmul.f32 %v1360_v43, %v1195_v41  ;;  %v1379_v9 = vmul.f32 %v1368_v23, %v1308_v17 }
 0x3c0   :  { %v1197_v3 = vpop.f32.mrf.mxu1  ;;  %v1310_v60 = vpop.f32.mrf.mxu0 }
 0x3c1   :  { %v1393_v12 = vmul.f32 1.442695, %v1377_v58  ;;  %v1397_v28 = vmul.f32 1.442695, %v1379_v9  ;;  %v1378_v45 = vmul.f32 %v1364_v11, %v1197_v3  ;;  %v1380_v37 = vmul.f32 %v1372_v42, %v1310_v60 }
 0x3c2   :  { %v1201_v13 = vpop.f32.mrf.mxu1  ;;  %v1314_v20 = vpop.f32.mrf.mxu0 }
 0x3c3   :  { %4380 = vpow2.f32 %v1393_v12  ;;  %v1395_v26 = vmul.f32 1.442695, %v1378_v45  ;;  %v1399_v44 = vmul.f32 1.442695, %v1380_v37  ;;  %v1381_v25 = vmul.f32 %v1360_v43, %v1201_v13 }
 0x3c4   :  { %4382 = vpow2.f32 %v1397_v28  ;;  %v1383_v59 = vmul.f32 %v1368_v23, %v1314_v20  ;;  %v1203_v21 = vpop.f32.mrf.mxu1  ;;  %v1316_v2 = vpop.f32.mrf.mxu0 }
 0x3c5   :  { %4384 = vpow2.f32 %v1395_v26  ;;  %v1401_v36 = vmul.f32 1.442695, %v1381_v25  ;;  %v1382_v41 = vmul.f32 %v1364_v11, %v1203_v21  ;;  %v1384_v17 = vmul.f32 %v1372_v42, %v1316_v2 }
 0x3c6   :  { %4386 = vpow2.f32 %v1399_v44  ;;  %v1405_v51 = vmul.f32 1.442695, %v1383_v59  ;;  %v1207_v58 = vpop.f32.mrf.mxu1  ;;  %v1320_v9 = vpop.f32.mrf.mxu0 }
 0x3c7   :  { %4388 = vpow2.f32 %v1401_v36  ;;  %v1403_v3 = vmul.f32 1.442695, %v1382_v41  ;;  %v1407_v60 = vmul.f32 1.442695, %v1384_v17  ;;  %v1385_v1 = vmul.f32 %v1360_v43, %v1207_v58 }
 0x3c8   :  { %4390 = vpow2.f32 %v1405_v51  ;;  %v1387_v12 = vmul.f32 %v1368_v23, %v1320_v9  ;;  %v1209_v45 = vpop.f32.mrf.mxu1  ;;  %v1322_v37 = vpop.f32.mrf.mxu0 }
 0x3c9   :  { %4392 = vpow2.f32 %v1403_v3  ;;  %v1409_v28 = vmul.f32 1.442695, %v1385_v1  ;;  %v1386_v13 = vmul.f32 %v1364_v11, %v1209_v45  ;;  %v1388_v20 = vmul.f32 %v1372_v42, %v1322_v37 }
 0x3ca   :  { %4394 = vpow2.f32 %v1407_v60  ;;  %v1413_v26 = vmul.f32 1.442695, %v1387_v12  ;;  %v1213_v25 = vpop.f32.mrf.mxu1  ;;  %v1326_v21 = vpop.f32.mrf.mxu0 }
 0x3cb   :  { %4396 = vpow2.f32 %v1409_v28  ;;  %v1411_v44 = vmul.f32 1.442695, %v1386_v13  ;;  %v1415_v59 = vmul.f32 1.442695, %v1388_v20  ;;  %v1389_v2 = vmul.f32 %v1360_v43, %v1213_v25 }
 0x3cc   :  { %4398 = vpow2.f32 %v1413_v26  ;;  %v1391_v36 = vmul.f32 %v1368_v23, %v1326_v21  ;;  %v1215_v41 = vpop.f32.mrf.mxu1  ;;  %v1328_v17 = vpop.f32.mrf.mxu0 }
 0x3cd   :  { %4400 = vpow2.f32 %v1411_v44  ;;  %v1417_v51 = vmul.f32 1.442695, %v1389_v2  ;;  %v1390_v58 = vmul.f32 %v1364_v11, %v1215_v41  ;;  %v1392_v9 = vmul.f32 %v1372_v42, %v1328_v17 }
 0x3ce   :  { %4402 = vpow2.f32 %v1415_v59  ;;  %v1421_v1 = vmul.f32 1.442695, %v1391_v36  ;;  %v1219_v3 = vpop.f32.mrf.mxu1  ;;  %v1332_v45 = vpop.f32.mrf.mxu0 }
 0x3cf   :  { %4404 = vpow2.f32 %v1417_v51  ;;  %v1419_v60 = vmul.f32 1.442695, %v1390_v58  ;;  %v1423_v12 = vmul.f32 1.442695, %v1392_v9  ;;  %v1441_v37 = vmul.f32 %v1219_v3, %v5386_v40 }
 0x3d0   :  { %v4381_v28 = vpop.eup %4380  ;;  %4406 = vpow2.f32 %v1421_v1  ;;  %v1443_v43 = vmul.f32 %v1332_v45, %v5388_v57  ;;  %v1221_v23 = vpop.f32.mrf.mxu1 }
 0x3d1   :  { %v1334_v13 = vpop.f32.mrf.mxu0  ;;  %v4383_v20 = vpop.eup %4382  ;;  %1425 = vst [vmem:[#allocation2] sm:$0xff] %v4381_v28  ;;  %4408 = vpow2.f32 %v1419_v60  ;;  %1457 = vst [vmem:[#allocation3] sm:$0xff] %v1441_v37  ;;  %v1442_v11 = vmul.f32 %v1221_v23, %v5390_v10 }
 0x3d2   :  { %v1444_v42 = vmul.f32 %v1334_v13, %v5392_v54  ;;  %v4385_v26 = vpop.eup %4384  ;;  %1427 = vst [vmem:[#allocation2 + $0x10] sm:$0xff] %v4383_v20  ;;  %4410 = vpow2.f32 %v1423_v12  ;;  %1459 = vst [vmem:[#allocation3 + $0x10] sm:$0xff] %v1443_v43  ;;  %v1225_v25 = vpop.f32.mrf.mxu1 }
 0x3d3   :  { %v1338_v40 = vpop.f32.mrf.mxu0  ;;  %v4387_v21 = vpop.eup %4386  ;;  %1426 = vst [vmem:[#allocation2 + $0x8] sm:$0xff] %v4385_v26  ;;  %1458 = vst [vmem:[#allocation3 + $0x8] sm:$0xff] %v1442_v11  ;;  %v1445_v57 = vmul.f32 %v1225_v25, %v5394_v56  ;;  %v5482_v25 = vmov 0.0  }
 0x3d4   :  { %1460 = vst [vmem:[#allocation3 + $0x18] sm:$0xff] %v1444_v42  ;;  %v1447_v44 = vmul.f32 %v1338_v40, %v5396_v50  ;;  %v4389_v59 = vpop.eup %4388  ;;  %1428 = vst [vmem:[#allocation2 + $0x18] sm:$0xff] %v4387_v21  ;;  %v1227_v2 = vpop.f32.mrf.mxu1  ;;  %v5484_v40 = vmov 0.0  }
 0x3d5   :  { %v1340_v10 = vpop.f32.mrf.mxu0  ;;  %v4391_v36 = vpop.eup %4390  ;;  %1429 = vst [vmem:[#allocation2 + $0x20] sm:$0xff] %v4389_v59  ;;  %1461 = vst [vmem:[#allocation3 + $0x20] sm:$0xff] %v1445_v57  ;;  %v1446_v54 = vmul.f32 %v1227_v2, %v5398_v18 }
 0x3d6   :  { %1463 = vst [vmem:[#allocation3 + $0x30] sm:$0xff] %v1447_v44  ;;  %v1448_v41 = vmul.f32 %v1340_v10, %v5400_v6  ;;  %v4393_v17 = vpop.eup %4392  ;;  %1431 = vst [vmem:[#allocation2 + $0x30] sm:$0xff] %v4391_v36  ;;  %v1231_v51 = vpop.f32.mrf.mxu1 }
 0x3d7   :  { %v1344_v58 = vpop.f32.mrf.mxu0  ;;  %v4395_v9 = vpop.eup %4394  ;;  %1430 = vst [vmem:[#allocation2 + $0x28] sm:$0xff] %v4393_v17  ;;  %1462 = vst [vmem:[#allocation3 + $0x28] sm:$0xff] %v1446_v54  ;;  %v1449_v56 = vmul.f32 %v1231_v51, %v5402_v39 }
 0x3d8   :  { %1464 = vst [vmem:[#allocation3 + $0x38] sm:$0xff] %v1448_v41  ;;  %v1451_v50 = vmul.f32 %v1344_v58, %v5404_v35  ;;  %v4397_v1 = vpop.eup %4396  ;;  %1432 = vst [vmem:[#allocation2 + $0x38] sm:$0xff] %v4395_v9  ;;  %v1233_v3 = vpop.f32.mrf.mxu1 }
 0x3d9   :  { %v1346_v45 = vpop.f32.mrf.mxu0  ;;  %v4399_v60 = vpop.eup %4398  ;;  %1433 = vst [vmem:[#allocation2 + $0x40] sm:$0xff] %v4397_v1  ;;  %1465 = vst [vmem:[#allocation3 + $0x40] sm:$0xff] %v1449_v56  ;;  %v1450_v18 = vmul.f32 %v1233_v3, %v5406_v24 }
 0x3da   :  { %1467 = vst [vmem:[#allocation3 + $0x50] sm:$0xff] %v1451_v50  ;;  %v1452_v6 = vmul.f32 %v1346_v45, %v5408_v55  ;;  %v4401_v12 = vpop.eup %4400  ;;  %1435 = vst [vmem:[#allocation2 + $0x50] sm:$0xff] %v4399_v60  ;;  %v1237_v37 = vpop.f32.mrf.mxu1 }
 0x3db   :  { %v1350_v28 = vpop.f32.mrf.mxu0  ;;  %v4403_v43 = vpop.eup %4402  ;;  %1434 = vst [vmem:[#allocation2 + $0x48] sm:$0xff] %v4401_v12  ;;  %1466 = vst [vmem:[#allocation3 + $0x48] sm:$0xff] %v1450_v18  ;;  %v1453_v39 = vmul.f32 %v1237_v37, %v5410_v5  ;;  %v5478_v5 = vmov 0.0  }
 0x3dc   :  { %1468 = vst [vmem:[#allocation3 + $0x58] sm:$0xff] %v1452_v6  ;;  %v1455_v35 = vmul.f32 %v1350_v28, %v5412_v8  ;;  %v4405_v23 = vpop.eup %4404  ;;  %1436 = vst [vmem:[#allocation2 + $0x58] sm:$0xff] %v4403_v43  ;;  %v1239_v13 = vpop.f32.mrf.mxu1  ;;  %v5480_v8 = vmov 0.0  }
 0x3dd   :  { %v1352_v20 = vpop.f32.mrf.mxu0  ;;  %v4407_v11 = vpop.eup %4406  ;;  %1437 = vst [vmem:[#allocation2 + $0x60] sm:$0xff] %v4405_v23  ;;  %1469 = vst [vmem:[#allocation3 + $0x60] sm:$0xff] %v1453_v39  ;;  %v1454_v55 = vmul.f32 %v1239_v13, %v5414_v7 }
 0x3de   :  { %1471 = vst [vmem:[#allocation3 + $0x70] sm:$0xff] %v1455_v35  ;;  %v1456_v24 = vmul.f32 %v1352_v20, %v5416_v52  ;;  %v4409_v42 = vpop.eup %4408  ;;  %1439 = vst [vmem:[#allocation2 + $0x70] sm:$0xff] %v4407_v11 }
 0x3df   :  { %v4411_v26 = vpop.eup %4410  ;;  %1438 = vst [vmem:[#allocation2 + $0x68] sm:$0xff] %v4409_v42  ;;  %1470 = vst [vmem:[#allocation3 + $0x68] sm:$0xff] %v1454_v55 }
 0x3e0   :  { %1472 = vst [vmem:[#allocation3 + $0x78] sm:$0xff] %v1456_v24  ;;  %1440 = vst [vmem:[#allocation2 + $0x78] sm:$0xff] %v4411_v26 }
 0x3e1 LB: > { %s3813_s27 = sshll.u32 %s4604_s12, 3  ;;  %v1503_v7 = vrot.slane %v4600_v40, 6  ;;  %v1504_v52 = vrot.slane %v4596_v25, 6  ;;  %v1505_v21 = vrot.slane %v4592_v8, 6  ;;  %v1506_v57 = vrot.slane %v4588_v5, 6  ;;  %s1478_s12 = sadd.s32 1, %s4604_s12   ;;  %s4604_s12 = sphi %s5486_s12, %s1478_s12   ;;  %v4600_v40 = vphi %v5484_v40, %v1575_v40   ;;  %v4596_v25 = vphi %v5482_v25, %v1576_v25   ;;  %v4592_v8 = vphi %v5480_v8, %v1577_v8   ;;  %v4588_v5 = vphi %v5478_v5, %v1578_v5  }
 0x3e2   : > { %s1484_s28 = sshra.s32 %s3813_s27, 3  ;;  %vm1579_vm10 = vcmask 1041408   ;;  %p1475_p5 = scmp.ge.s32.totalorder %s1478_s12, 4  }
 0x3e3   : > { %s5496_s1 = sshll.u32 %s1484_s28, 5  ;;  %3917 = vmatprep.subr.mxu1 (%p1475_p5), %v4875_v32  ;;  %3961 = vmatprep.subr.mxu0 (%p1475_p5), %v5035_v0  ;;  %s4630_s6 = smov (%p1475_p5), 64  }
 0x3e4   : > { %s1488_s29 = scalar_lea.vmem [#allocation2], %s5496_s1  ;;  %s1494_s30 = scalar_lea.vmem [#allocation3], %s5496_s1  ;;  %3918 = vmatpush3.msra.mxu1 (%p1475_p5), %v4795_v16  ;;  %3962 = vmatpush3.msra.mxu0 (%p1475_p5), %v4955_v48 }
 0x3e5   : > { %s1593_s16 = scalar_lea.vmem [#allocation4], %s5496_s1  ;;  %3919 = vmatprep.subr.mxu1 (%p1475_p5), %v4870_v31  ;;  %3963 = vmatprep.subr.mxu0 (%p1475_p5), %v5030_v63 }
 0x3e6   :  { %3920 = vmatpush3.msra.mxu1 (%p1475_p5), %v4790_v15  ;;  %3964 = vmatpush3.msra.mxu0 (%p1475_p5), %v4950_v47 }
 0x3e7   : > { %v1489_v44 = vld [vmem:[%s1488_s29] sm:$0xff]  ;;  %v1490_v2 = vld [vmem:[%s1488_s29 + $0x8] sm:$0xff]  ;;  %v1491_v41 = vld [vmem:[%s1488_s29 + $0x10] sm:$0xff]  ;;  %3921 = vmatprep.subr.mxu1 (%p1475_p5), %v4865_v30  ;;  %3965 = vmatprep.subr.mxu0 (%p1475_p5), %v5025_v62 }
 0x3e8   : > { %v1495_v59 = vld [vmem:[%s1494_s30] sm:$0xff]  ;;  %v1511_v10 = vmul.f32 %v1503_v7, %v1489_v44  ;;  %v1496_v36 = vld [vmem:[%s1494_s30 + $0x8] sm:$0xff]  ;;  %v1512_v54 = vmul.f32 %v1504_v52, %v1490_v2  ;;  %v1497_v17 = vld [vmem:[%s1494_s30 + $0x10] sm:$0xff]  ;;  %v1513_v51 = vmul.f32 %v1505_v21, %v1491_v41  ;;  %3922 = vmatpush3.msra.mxu1 (%p1475_p5), %v4785_v14  ;;  %3966 = vmatpush3.msra.mxu0 (%p1475_p5), %v4945_v46 }
 0x3e9   : > { %v1492_v58 = vld [vmem:[%s1488_s29 + $0x18] sm:$0xff]  ;;  %3923 = vmatprep.subr.mxu1 (%p1475_p5), %v4860_v29  ;;  %3967 = vmatprep.subr.mxu0 (%p1475_p5), %v5020_v61 }
 0x3ea   : > { %v1498_v9 = vld [vmem:[%s1494_s30 + $0x18] sm:$0xff]  ;;  %v1515_v56 = vadd.f32 %v1511_v10, %v1495_v59  ;;  %v1516_v50 = vadd.f32 %v1512_v54, %v1496_v36  ;;  %v1514_v1 = vmul.f32 %v1506_v57, %v1492_v58  ;;  %v1517_v3 = vadd.f32 %v1513_v51, %v1497_v17 }
 0x3ec   : > { %v1523_v45 = vrot.slane %v1515_v56, 6  ;;  %v1524_v60 = vrot.slane %v1516_v50, 6  ;;  %v1518_v18 = vadd.f32 %v1514_v1, %v1498_v9  ;;  %v1525_v6 = vrot.slane %v1517_v3, 6 }
 0x3ee   : > { %v1531_v12 = vmul.f32 %v1523_v45, %v1489_v44  ;;  %v1532_v37 = vmul.f32 %v1524_v60, %v1490_v2  ;;  %v1526_v28 = vrot.slane %v1518_v18, 6  ;;  %v1533_v43 = vmul.f32 %v1525_v6, %v1491_v41 }
 0x3f0   : > { %v1535_v39 = vadd.f32 %v1531_v12, %v1495_v59  ;;  %v1536_v35 = vadd.f32 %v1532_v37, %v1496_v36  ;;  %v1534_v23 = vmul.f32 %v1526_v28, %v1492_v58  ;;  %v1537_v13 = vadd.f32 %v1533_v43, %v1497_v17 }
 0x3f2   : > { %v1543_v20 = vrot.slane %v1535_v39, 6  ;;  %v1544_v11 = vrot.slane %v1536_v35, 6  ;;  %v1545_v55 = vrot.slane %v1537_v13, 6  ;;  %v1538_v24 = vadd.f32 %v1534_v23, %v1498_v9 }
 0x3f3   : > { %v1580_v57 = vsel %vm1579_vm10, %v1515_v56, %v1535_v39  ;;  %v1581_v54 = vsel %vm1579_vm10, %v1516_v50, %v1536_v35  ;;  %v1582_v1 = vsel %vm1579_vm10, %v1517_v3, %v1537_v13 }
 0x3f4   : > { %v1551_v42 = vmul.f32 %v1543_v20, %v1489_v44  ;;  %v1552_v26 = vmul.f32 %v1544_v11, %v1490_v2  ;;  %v1553_v5 = vmul.f32 %v1545_v55, %v1491_v41  ;;  %v1546_v8 = vrot.slane %v1538_v24, 6  ;;  %v6199_v20 = vld [vmem:[#allocation22_spill] sm:$0xff] (%p1475_p5)  ;;  %v6200_v11 = vld [vmem:[#allocation47_spill] sm:$0xff] (%p1475_p5) }
 0x3f5   : > { %v1583_v12 = vsel %vm1579_vm10, %v1518_v18, %v1538_v24  ;;  %3924 = vmatpush3.msra.mxu1 (%p1475_p5), %v6199_v20  ;;  %3968 = vmatpush3.msra.mxu0 (%p1475_p5), %v6200_v11  ;;  %v6201_v55 = vld [vmem:[#allocation34_spill] sm:$0xff] (%p1475_p5)  ;;  %v6202_v24 = vld [vmem:[#allocation59_spill] sm:$0xff] (%p1475_p5) }
 0x3f6   : > { %v1555_v25 = vadd.f32 %v1551_v42, %v1495_v59  ;;  %v1556_v40 = vadd.f32 %v1552_v26, %v1496_v36  ;;  %v1557_v7 = vadd.f32 %v1553_v5, %v1497_v17  ;;  %v1554_v52 = vmul.f32 %v1546_v8, %v1492_v58  ;;  %3925 = vmatprep.subr.mxu1 (%p1475_p5), %v6201_v55  ;;  %v6203_v42 = vld [vmem:[#allocation21_spill] sm:$0xff] (%p1475_p5)  ;;  %v6204_v26 = vld [vmem:[#allocation46_spill] sm:$0xff] (%p1475_p5)  ;;  %v6232_v20 = vld [vmem:[#allocation39_spill] sm:$0xff] (%p1475_p5) }
 0x3f7   :  { %3969 = vmatprep.subr.mxu0 (%p1475_p5), %v6202_v24  ;;  %3926 = vmatpush3.msra.mxu1 (%p1475_p5), %v6203_v42  ;;  %v6233_v11 = vld [vmem:[#allocation26_spill] sm:$0xff] (%p1475_p5)  ;;  %v6234_v55 = vld [vmem:[#allocation51_spill] sm:$0xff] (%p1475_p5) }
 0x3f8   : > { %v1563_v21 = vrot.slane %v1555_v25, 6  ;;  %v1564_v10 = vrot.slane %v1556_v40, 6  ;;  %v1565_v51 = vrot.slane %v1557_v7, 6  ;;  %v1558_v45 = vadd.f32 %v1554_v52, %v1498_v9  ;;  %3970 = vmatpush3.msra.mxu0 (%p1475_p5), %v6204_v26  ;;  %v6210_v52 = vld [vmem:[#allocation57_spill] sm:$0xff] (%p1475_p5) }
 0x3f9   : > { %v1584_v37 = vsel %vm463_vm4, %v1580_v57, %v1555_v25  ;;  %v1585_v28 = vsel %vm463_vm4, %v1581_v54, %v1556_v40  ;;  %v1586_v56 = vsel %vm463_vm4, %v1582_v1, %v1557_v7  ;;  %v6209_v7 = vld [vmem:[#allocation32_spill] sm:$0xff] (%p1475_p5)  ;;  %v6216_v1 = vld [vmem:[#allocation43_spill] sm:$0xff] (%p1475_p5)  ;;  %v1615_v42 = vld [vmem:[#allocation5] sm:$0xff] (%p1475_p5) }
 0x3fa   : > { %v1571_v60 = vmul.f32 %v1563_v21, %v1489_v44  ;;  %v1572_v6 = vmul.f32 %v1564_v10, %v1490_v2  ;;  %v1573_v43 = vmul.f32 %v1565_v51, %v1491_v41  ;;  %v1566_v23 = vrot.slane %v1558_v45, 6  ;;  %v6211_v21 = vld [vmem:[#allocation19_spill] sm:$0xff] (%p1475_p5)  ;;  %v6212_v57 = vld [vmem:[#allocation44_spill] sm:$0xff] (%p1475_p5)  ;;  %v6215_v51 = vld [vmem:[#allocation18_spill] sm:$0xff] (%p1475_p5) }
 0x3fb   : > { %v1587_v44 = vsel %vm463_vm4, %v1583_v12, %v1558_v45  ;;  %v1828_v41 = vsub.f32 (%p1475_p5), 0.0, %v5086_v19  ;;  %v6213_v10 = vld [vmem:[#allocation31_spill] sm:$0xff] (%p1475_p5)  ;;  %v6214_v54 = vld [vmem:[#allocation56_spill] sm:$0xff] (%p1475_p5)  ;;  %v6217_v45 = vld [vmem:[#allocation30_spill] sm:$0xff] (%p1475_p5) }
 0x3fc   : > { %v1575_v40 = vadd.f32 %v1571_v60, %v1495_v59   ;;  %v1576_v25 = vadd.f32 %v1572_v6, %v1496_v36   ;;  %v1577_v8 = vadd.f32 %v1573_v43, %v1497_v17   ;;  %v1574_v50 = vmul.f32 %v1566_v23, %v1492_v58  ;;  %v6218_v60 = vld [vmem:[#allocation55_spill] sm:$0xff] (%p1475_p5)  ;;  %v6219_v12 = vld [vmem:[#allocation17_spill] sm:$0xff] (%p1475_p5)  ;;  %v6222_v23 = vld [vmem:[#allocation54_spill] sm:$0xff] (%p1475_p5) }
 0x3fd   :  { %1477 = sbr.rel (!%p1475_p5) target bundleno = 993 (0x3e1), region = 111  ;;  %v1827_v36 = vsub.f32 (%p1475_p5), 0.0, %v5094_v33  ;;  %v1829_v17 = vsub.f32 (%p1475_p5), 0.0, %v5107_v22  ;;  %v1830_v58 = vsub.f32 (%p1475_p5), 0.0, %v5101_v4  ;;  %v1833_v18 = vmul.f32 (%p1475_p5), 1.442695, %v1828_v41 }
 0x3fe   : > { %v1588_v3 = vsel %vm384_vm3, %v1584_v37, %v1575_v40  ;;  %v1589_v39 = vsel %vm384_vm3, %v1585_v28, %v1576_v25  ;;  %v1590_v2 = vsel %vm384_vm3, %v1586_v56, %v1577_v8  ;;  %v1578_v5 = vadd.f32 %v1574_v50, %v1498_v9   ;;  %v6206_v8 = vld [vmem:[#allocation58_spill] sm:$0xff] (%p1475_p5)  ;;  %v6207_v25 = vld [vmem:[#allocation20_spill] sm:$0xff] (%p1475_p5)  ;;  %v6208_v40 = vld [vmem:[#allocation45_spill] sm:$0xff] (%p1475_p5) }
 0x3ff   : > { %1594 = vst [vmem:[%s1593_s16] sm:$0xff] %v1588_v3  ;;  %1595 = vst [vmem:[%s1593_s16 + $0x8] sm:$0xff] %v1589_v39  ;;  %v1831_v9 = vmul.f32 (%p1475_p5), 1.442695, %v1827_v36  ;;  %v1835_v35 = vmul.f32 (%p1475_p5), 1.442695, %v1829_v17  ;;  %3971 = vmatprep.subr.mxu0 (%p1475_p5), %v6206_v8  ;;  %v6220_v37 = vld [vmem:[#allocation42_spill] sm:$0xff] (%p1475_p5) }
 0x400   : > { %1596 = vst [vmem:[%s1593_s16 + $0x10] sm:$0xff] %v1590_v2  ;;  %v1591_v59 = vsel %vm384_vm3, %v1587_v44, %v1578_v5  ;;  %v1837_v13 = vmul.f32 (%p1475_p5), 1.442695, %v1830_v58  ;;  %v6205_v5 = vld [vmem:[#allocation33_spill] sm:$0xff] (%p1475_p5)  ;;  %3972 = vmatpush3.msra.mxu0 (%p1475_p5), %v6208_v40  ;;  %v6223_v3 = vld [vmem:[#allocation16_spill] sm:$0xff] (%p1475_p5)  ;;  %v6227_v17 = vld [vmem:[#allocation15_spill] sm:$0xff] (%p1475_p5) }
 0x401   : > { %1597 = vst [vmem:[%s1593_s16 + $0x18] sm:$0xff] %v1591_v59  ;;  %4412 = vpow2.f32 (%p1475_p5), %v1831_v9  ;;  %3927 = vmatprep.subr.mxu1 (%p1475_p5), %v6205_v5  ;;  %3973 = vmatprep.subr.mxu0 (%p1475_p5), %v6210_v52  ;;  %v6221_v43 = vld [vmem:[#allocation29_spill] sm:$0xff] (%p1475_p5)  ;;  %v6225_v59 = vld [vmem:[#allocation28_spill] sm:$0xff] (%p1475_p5)  ;;  %v6236_v8 = vld [vmem:[#allocation38_spill] sm:$0xff] (%p1475_p5) }
 0x402   :  { %4414 = vpow2.f32 %v1833_v18  ;;  %3928 = vmatpush3.msra.mxu1 %v6207_v25  ;;  %3974 = vmatpush3.msra.mxu0 %v6212_v57  ;;  %v6224_v39 = vld [vmem:[#allocation41_spill] sm:$0xff]  ;;  %v6228_v58 = vld [vmem:[#allocation40_spill] sm:$0xff]  ;;  %v6229_v18 = vld [vmem:[#allocation27_spill] sm:$0xff] }
 0x403   :  { %4416 = vpow2.f32 %v1835_v35  ;;  %3929 = vmatprep.subr.mxu1 %v6209_v7  ;;  %3975 = vmatprep.subr.mxu0 %v6214_v54  ;;  %v6226_v36 = vld [vmem:[#allocation53_spill] sm:$0xff]  ;;  %v6230_v35 = vld [vmem:[#allocation52_spill] sm:$0xff] }
 0x404   :  { %4418 = vpow2.f32 %v1837_v13  ;;  %3930 = vmatpush3.msra.mxu1 %v6211_v21  ;;  %3976 = vmatpush3.msra.mxu0 %v6216_v1  ;;  %v6231_v13 = vld [vmem:[#allocation14_spill] sm:$0xff]  ;;  %v6235_v5 = vld [vmem:[#allocation13_spill] sm:$0xff]  ;;  %v1614_v7 = vld [vmem:[#allocation5 + $0x30] sm:$0xff] }
 0x405   :  { %3931 = vmatprep.subr.mxu1 %v6213_v10  ;;  %3977 = vmatprep.subr.mxu0 %v6218_v60  ;;  %v1617_v25 = vld [vmem:[#allocation5 + $0x18] sm:$0xff]  ;;  %v6238_v21 = vld [vmem:[#allocation50_spill] sm:$0xff] }
 0x406   :  { %3932 = vmatpush3.msra.mxu1 %v6215_v51  ;;  %3978 = vmatpush3.msra.mxu0 %v6220_v37  ;;  %v6237_v52 = vld [vmem:[#allocation25_spill] sm:$0xff]  ;;  %v6239_v51 = vld [vmem:[#allocation12_spill] sm:$0xff]  ;;  %v1619_v60 = vld [vmem:[#allocation5 + $0x68] sm:$0xff] }
 0x407   :  { %3933 = vmatprep.subr.mxu1 %v6217_v45  ;;  %3979 = vmatprep.subr.mxu0 %v6222_v23  ;;  %v1616_v10 = vld [vmem:[#allocation5 + $0x58] sm:$0xff]  ;;  %v6243_v23 = vld [vmem:[#allocation11_spill] sm:$0xff] }
 0x408   :  { %3934 = vmatpush3.msra.mxu1 %v6219_v12  ;;  %3980 = vmatpush3.msra.mxu0 %v6224_v39  ;;  %v1599_v24 = vld [vmem:[#allocation4 + $0x8] sm:$0xff]  ;;  %v1601_v26 = vld [vmem:[#allocation4 + $0x18] sm:$0xff]  ;;  %v1598_v40 = vld [vmem:[#allocation4] sm:$0xff] }
 0x409   :  { %3935 = vmatprep.subr.mxu1 %v6221_v43  ;;  %3981 = vmatprep.subr.mxu0 %v6226_v36  ;;  %v1600_v57 = vld [vmem:[#allocation4 + $0x10] sm:$0xff]  ;;  %v1603_v54 = vld [vmem:[#allocation4 + $0x28] sm:$0xff]  ;;  %v6240_v1 = vld [vmem:[#allocation37_spill] sm:$0xff]  ;;  %v1631_v45 = vmul.f32 %v1615_v42, %v1599_v24  ;;  %v1633_v43 = vmul.f32 %v1617_v25, %v1601_v26 }
 0x40a   :  { %3936 = vmatpush3.msra.mxu1 %v6223_v3  ;;  %3982 = vmatpush3.msra.mxu0 %v6228_v58  ;;  %v1621_v12 = vld [vmem:[#allocation5 + $0x48] sm:$0xff]  ;;  %v6241_v37 = vld [vmem:[#allocation24_spill] sm:$0xff]  ;;  %v1632_v3 = vmul.f32 %v1616_v10, %v1600_v57  ;;  %v1602_v39 = vld [vmem:[#allocation4 + $0x20] sm:$0xff]  ;;  %v1635_v36 = vmul.f32 %v1619_v60, %v1603_v54 }
 0x40b   :  { %3937 = vmatprep.subr.mxu1 %v6225_v59  ;;  %3983 = vmatprep.subr.mxu0 %v6230_v35  ;;  %v6246_v59 = vld [vmem:[#allocation48_spill] sm:$0xff]  ;;  %v1620_v58 = vld [vmem:[#allocation5 + $0x8] sm:$0xff]  ;;  %v1623_v35 = vld [vmem:[#allocation5 + $0x20] sm:$0xff] }
 0x40c   :  { %3938 = vmatpush3.msra.mxu1 %v6227_v17  ;;  %3984 = vmatpush3.msra.mxu0 %v6232_v20  ;;  %v1604_v17 = vld [vmem:[#allocation4 + $0x30] sm:$0xff]  ;;  %v1625_v20 = vld [vmem:[#allocation5 + $0x38] sm:$0xff]  ;;  %v1611_v57 = vld [vmem:[#allocation4 + $0x68] sm:$0xff] }
 0x40d   :  { %3939 = vmatprep.subr.mxu1 %v6229_v18  ;;  %3985 = vmatprep.subr.mxu0 %v6234_v55  ;;  %v6247_v18 = vld [vmem:[#allocation10_spill] sm:$0xff]  ;;  %v1878_v55 = vld [vmem:[%s6066_s10 + $0x38] sm:$0xff]  ;;  %v1636_v26 = vmul.f32 %v1620_v58, %v1604_v17 }
 0x40e   :  { %v4413_v6 = vpop.eup %4412  ;;  %3940 = vmatpush3.msra.mxu1 %v6231_v13  ;;  %3986 = vmatpush3.msra.mxu0 %v6236_v8  ;;  %v1609_v13 = vld [vmem:[#allocation4 + $0x58] sm:$0xff]  ;;  %v1622_v8 = vld [vmem:[#allocation5 + $0x40] sm:$0xff]  ;;  %v1872_v17 = vld [vmem:[%s6066_s10 + $0x8] sm:$0xff] }
 0x40f   :  { %v4415_v28 = vpop.eup %4414  ;;  %v1839_v56 = vadd.f32 1.0, %v4413_v6  ;;  %3941 = vmatprep.subr.mxu1 %v6233_v11  ;;  %3987 = vmatprep.subr.mxu0 %v6238_v21  ;;  %v1605_v6 = vld [vmem:[#allocation4 + $0x38] sm:$0xff]  ;;  %v6248_v11 = vld [vmem:[#allocation35_spill] sm:$0xff]  ;;  %v1871_v58 = vld [vmem:[%s6066_s10] sm:$0xff] }
 0x410   :  { %v4417_v50 = vpop.eup %4416  ;;  %v1840_v44 = vadd.f32 1.0, %v4415_v28  ;;  %3942 = vmatpush3.msra.mxu1 %v6235_v5  ;;  %3988 = vmatpush3.msra.mxu0 %v6240_v1  ;;  %v6242_v28 = vld [vmem:[#allocation49_spill] sm:$0xff]  ;;  %v1624_v21 = vld [vmem:[#allocation5 + $0x10] sm:$0xff] }
 0x411   :  { %v4419_v2 = vpop.eup %4418  ;;  %4420 = vrcp.f32 %v1839_v56  ;;  %v1841_v41 = vadd.f32 1.0, %v4417_v50  ;;  %3943 = vmatprep.subr.mxu1 %v6237_v52  ;;  %3989 = vmatprep.subr.mxu0 %v6242_v28  ;;  %v6244_v56 = vld [vmem:[#allocation36_spill] sm:$0xff]  ;;  %v1630_v50 = vmul.f32 %v1614_v7, %v1598_v40  ;;  %v1606_v5 = vld [vmem:[#allocation4 + $0x40] sm:$0xff]  ;;  %v1641_v7 = vmul.f32 %v1625_v20, %v1609_v13 }
 0x412   :  { %4422 = vrcp.f32 %v1840_v44  ;;  %v1842_v9 = vadd.f32 1.0, %v4419_v2  ;;  %3944 = vmatpush3.msra.mxu1 %v6239_v51  ;;  %3990 = vmatpush3.msra.mxu0 %v6244_v56  ;;  %v1618_v44 = vld [vmem:[#allocation5 + $0x50] sm:$0xff]  ;;  %v1613_v1 = vld [vmem:[#allocation4 + $0x78] sm:$0xff]  ;;  %v1626_v56 = vld [vmem:[#allocation5 + $0x60] sm:$0xff] }
 0x413   :  { %4424 = vrcp.f32 %v1841_v41  ;;  %3945 = vmatprep.subr.mxu1 %v6241_v37  ;;  %v6245_v2 = vld [vmem:[#allocation23_spill] sm:$0xff]  ;;  %3991 = vmatprep.subr.mxu0 %v6246_v59  ;;  %v1637_v41 = vmul.f32 %v1621_v12, %v1605_v6  ;;  %v1634_v42 = vmul.f32 %v1618_v44, %v1602_v39  ;;  %v1638_v37 = vmul.f32 %v1622_v8, %v1606_v5  ;;  %v1875_v59 = vld [vmem:[%s6066_s10 + $0x20] sm:$0xff] }
 0x414   :  { %4426 = vrcp.f32 %v1842_v9  ;;  %3946 = vmatpush3.msra.mxu1 %v6243_v23  ;;  %v1607_v9 = vld [vmem:[#allocation4 + $0x48] sm:$0xff]  ;;  %1721 = vmatprep.mubr.f32.mxu1 %v1631_v45  ;;  %v1608_v52 = vld [vmem:[#allocation4 + $0x50] sm:$0xff]  ;;  %v6249_v44 = vmov 0.0  }
 0x415   :  { %3947 = vmatprep.subr.mxu1 %v6245_v2  ;;  %3992 = vmatpush3.msra.mxu0 %v6248_v11  ;;  %v1639_v40 = vmul.f32 %v1623_v35, %v1607_v9  ;;  %v1627_v51 = vld [vmem:[#allocation5 + $0x70] sm:$0xff]  ;;  %v1629_v45 = vld [vmem:[#allocation5 + $0x28] sm:$0xff]  ;;  %v1640_v28 = vmul.f32 %v1624_v21, %v1608_v52  ;;  %v3826_v9 = vld [vmem:[%s6059_s3 + $0x38] sm:$0xff] }
 0x416   :  { %3948 = vmatpush3.msra.mxu1 %v6247_v18  ;;  %1806 = vmatprep.mubr.f32.mxu0 %v1633_v43  ;;  %v1610_v43 = vld [vmem:[#allocation4 + $0x60] sm:$0xff]  ;;  %v1645_v23 = vmul.f32 %v1629_v45, %v1613_v1  ;;  %v1877_v2 = vld [vmem:[%s6066_s10 + $0x30] sm:$0xff] }
 0x417   :  { %1722 = vmatmul.mubr.f32.vlgmr.msra.gmra.mxu1 %v1630_v50  ;;  %1807 = vmatmul.mubr.f32.vlgmr.msra.gmra.mxu0 %v1632_v3  ;;  %v1612_v50 = vld [vmem:[#allocation4 + $0x70] sm:$0xff]  ;;  %v1628_v3 = vld [vmem:[#allocation5 + $0x78] sm:$0xff]  ;;  %v3818_v18 = vld [vmem:[%s6065_s9] ss:$0 sm:$0xff] }
 0x418   :  { %1726 = vmatprep.mubr.f32.mxu1 %v1635_v36  ;;  %1811 = vmatprep.mubr.f32.mxu0 %v1637_v41  ;;  %v1874_v36 = vld [vmem:[%s6066_s10 + $0x18] sm:$0xff]  ;;  %v1873_v41 = vld [vmem:[%s6066_s10 + $0x10] sm:$0xff]  ;;  %v1653_v20 = vmul.f32 %v3818_v18, %v5129_v53  ;;  %v1655_v53 = vmul.f32 %v3818_v18, %v5143_v27 }
 0x419   :  { %4183 = vmatprep.subr.mxu1 %v1878_v55  ;;  %v3825_v27 = vld [vmem:[%s6059_s3 + $0x30] sm:$0xff] }
 0x41a   :  { %4184 = vmatpush3.msra.mxu1 %v1878_v55 }
 0x41b   :  { %1727 = vmatmul.mubr.f32.gmra.mxu1 %v1634_v42  ;;  %1812 = vmatmul.mubr.f32.gmra.mxu0 %v1636_v26 }
 0x41c   :  { %1731 = vmatprep.mubr.f32.mxu1 %v1639_v40  ;;  %1816 = vmatprep.mubr.f32.mxu0 %v1641_v7  ;;  %v1654_v40 = vmul.f32 %v3818_v18, %v5137_v49 }
 0x41d   :  { %4185 = vmatprep.subr.mxu1 %v1877_v2 }
 0x41e   :  { %v4421_v24 = vpop.eup %4420  ;;  %4186 = vmatpush3.msra.mxu1 %v1877_v2 }
 0x41f   :  { %v4423_v25 = vpop.eup %4422  ;;  %v1847_v10 = vmul.f32 %v4421_v24, %v5094_v33  ;;  %v1643_v33 = vmul.f32 %v1627_v51, %v1611_v57  ;;  %1732 = vmatmul.mubr.f32.gmra.mxu1 %v1638_v37  ;;  %1817 = vmatmul.mubr.f32.gmra.mxu0 %v1640_v28 }
 0x420   :  { %v4425_v54 = vpop.eup %4424  ;;  %v1848_v6 = vmul.f32 %v4423_v25, %v5086_v19  ;;  %v1644_v19 = vmul.f32 %v1628_v3, %v1612_v50  ;;  %1821 = vmatprep.mubr.f32.mxu0 %v1645_v23  ;;  %v1656_v3 = vmul.f32 %v3818_v18, %v5153_v38 }
 0x421   :  { %v4427_v60 = vpop.eup %4426  ;;  %1855 = vrot.lane.b32.xlu0 %v1847_v10, %s4630_s6  ;;  %v1849_v12 = vmul.f32 %v4425_v54, %v5107_v22  ;;  %v1642_v22 = vmul.f32 %v1626_v56, %v1610_v43  ;;  %1736 = vmatprep.mubr.f32.mxu1 %v1643_v33 }
 0x422   :  { %v1850_v39 = vmul.f32 %v4427_v60, %v5101_v4  ;;  %v1876_v4 = vld [vmem:[%s6066_s10 + $0x28] sm:$0xff] }
 0x423   :  { %1859 = vrot.lane.b32.xlu1 %v1849_v12, %s4630_s6  ;;  %1737 = vmatmul.mubr.f32.gmra.mxu1 %v1642_v22 }
 0x424   :  { %1822 = vmatmul.mubr.f32.gmra.mxu0 %v1644_v19  ;;  %4187 = vmatprep.subr.mxu1 %v1876_v4 }
 0x425   :  { %1857 = vrot.lane.b32.xlu0 %v1848_v6, %s4630_s6  ;;  %2364 = vmatprep.mubr.f32.mxu0 %v6249_v44 }
 0x426   :  { %4188 = vmatpush3.msra.mxu1 %v1876_v4 }
 0x427   :  { %1861 = vrot.lane.b32.xlu1 %v1850_v39, %s4630_s6  ;;  %4189 = vmatprep.subr.mxu1 %v1875_v59 }
 0x428   :  { %4190 = vmatpush3.msra.mxu1 %v1875_v59 }
 0x429   :  { %4191 = vmatprep.subr.mxu1 %v1874_v36 }
 0x42a   :  { %4192 = vmatpush3.msra.mxu1 %v1874_v36 }
 0x42b   :  { %4193 = vmatprep.subr.mxu1 %v1873_v41 }
 0x42c   :  { %4194 = vmatpush3.msra.mxu1 %v1873_v41 }
 0x42d   :  { %4195 = vmatprep.subr.mxu1 %v1872_v17 }
 0x42e   :  { %4196 = vmatpush3.msra.mxu1 %v1872_v17 }
 0x42f   :  { %4197 = vmatprep.subr.mxu1 %v1871_v58 }
 0x430   :  { %4198 = vmatpush3.msra.mxu1 %v1871_v58  ;;  %v3824_v58 = vld [vmem:[%s6059_s3 + $0x28] sm:$0xff] }
 0x431   :  { %4205 = vmatprep.subr.mxu1 %v3826_v9 }
 0x493   :  { %v1856_v42 = vpop.permute.xlu0 %1855 }
 0x495   :  { %v1860_v43 = vpop.permute.xlu1 %1859 }
 0x497   :  { %v1858_v60 = vpop.permute.xlu0 %1857 }
 0x499   :  { %v1862_v41 = vpop.permute.xlu1 %1861 }
 0x4d7   :  { %v3949_v35 = vpop.f32.mrf.mxu1  ;;  %v3993_v13 = vpop.f32.mrf.mxu0 }
 0x4d9   :  { %v3950_v11 = vpop.f32.mrf.mxu1  ;;  %v3994_v55 = vpop.f32.mrf.mxu0 }
 0x4da   :  { %v3951_v24 = vadd.f32 %v3950_v11, %v3949_v35  ;;  %v3995_v25 = vadd.f32 %v3994_v55, %v3993_v13  ;;  %v2280_v11 = vld [vmem:[#allocation7 + $0x440] sm:$0xff]  ;;  %v2282_v55 = vld [vmem:[#allocation7 + $0x450] sm:$0xff] }
 0x4db   :  { %v3952_v26 = vpop.f32.mrf.mxu1  ;;  %v3996_v5 = vpop.f32.mrf.mxu0  ;;  %2316 = vmatprep.subr.mxu0 %v2280_v11 }
 0x4dc   :  { %v1724_v8 = vadd.f32 %v3951_v24, %v1653_v20  ;;  %v2279_v24 = vld [vmem:[#allocation7 + $0x438] sm:$0xff] }
 0x4dd   :  { %v3953_v7 = vpop.f32.mrf.mxu1  ;;  %v3997_v52 = vpop.f32.mrf.mxu0  ;;  %2317 = vmatpush1.msra.mxu0 %v2279_v24 }
 0x4de   :  { %v3954_v21 = vadd.f32 %v3953_v7, %v3952_v26  ;;  %v1809_v57 = vadd.f32 %v3995_v25, %v1724_v8  ;;  %v3998_v1 = vadd.f32 %v3997_v52, %v3996_v5  ;;  %v2271_v26 = vld [vmem:[#allocation7 + $0x3f8] sm:$0xff]  ;;  %v2273_v5 = vld [vmem:[#allocation7 + $0x408] sm:$0xff]  ;;  %v2270_v8 = vld [vmem:[#allocation7 + $0x3f0] sm:$0xff] }
 0x4df   :  { %v3955_v10 = vpop.f32.mrf.mxu1  ;;  %v3999_v54 = vpop.f32.mrf.mxu0  ;;  %2318 = vmatprep.subr.mxu0 %v2271_v26  ;;  %v2272_v25 = vld [vmem:[#allocation7 + $0x400] sm:$0xff]  ;;  %v2261_v52 = vld [vmem:[#allocation7 + $0x3a8] sm:$0xff] }
 0x4e0   :  { %v1729_v51 = vadd.f32 %v3954_v21, %v1654_v40  ;;  %v1867_v45 = vmul.f32 %v1856_v42, %v1809_v57  ;;  %v2281_v42 = vld [vmem:[#allocation7 + $0x448] sm:$0xff]  ;;  %2319 = vmatpush1.msra.mxu0 %v2270_v8  ;;  %v2262_v40 = vld [vmem:[#allocation7 + $0x3b0] sm:$0xff]  ;;  %v2264_v7 = vld [vmem:[#allocation7 + $0x3c0] sm:$0xff] }
 0x4e1   :  { %v3956_v6 = vpop.f32.mrf.mxu1  ;;  %v4000_v12 = vpop.f32.mrf.mxu0  ;;  %2320 = vmatprep.subr.mxu0 %v2262_v40  ;;  %v2263_v21 = vld [vmem:[#allocation7 + $0x3b8] sm:$0xff]  ;;  %v2253_v57 = vld [vmem:[#allocation7 + $0x368] sm:$0xff] }
 0x4e2   :  { %v3957_v37 = vadd.f32 %v3956_v6, %v3955_v10  ;;  %4199 = vmatprep.mubr.msk.f32.mxu1 %vm588_vm5, %v1867_v45  ;;  %v1814_v28 = vadd.f32 %v3998_v1, %v1729_v51  ;;  %v4001_v56 = vadd.f32 %v4000_v12, %v3999_v54  ;;  %2321 = vmatpush1.msra.mxu0 %v2261_v52  ;;  %v2255_v10 = vld [vmem:[#allocation7 + $0x378] sm:$0xff]  ;;  %v2252_v54 = vld [vmem:[#allocation7 + $0x360] sm:$0xff]  ;;  %v2254_v51 = vld [vmem:[#allocation7 + $0x370] sm:$0xff] }
 0x4e3   :  { %v3958_v49 = vpop.f32.mrf.mxu1  ;;  %2322 = vmatprep.subr.mxu0 %v2253_v57  ;;  %v2244_v1 = vld [vmem:[#allocation7 + $0x320] sm:$0xff]  ;;  %v2246_v45 = vld [vmem:[#allocation7 + $0x330] sm:$0xff]  ;;  %v2235_v6 = vld [vmem:[#allocation7 + $0x2d8] sm:$0xff] }
 0x4e4   :  { %v4002_v33 = vpop.f32.mrf.mxu0  ;;  %v1734_v23 = vadd.f32 %v3957_v37, %v1655_v53  ;;  %v1868_v50 = vmul.f32 %v1858_v60, %v1814_v28  ;;  %2323 = vmatpush1.msra.mxu0 %v2252_v54  ;;  %v2243_v53 = vld [vmem:[#allocation7 + $0x318] sm:$0xff]  ;;  %v2245_v60 = vld [vmem:[#allocation7 + $0x328] sm:$0xff]  ;;  %v2234_v37 = vld [vmem:[#allocation7 + $0x2d0] sm:$0xff] }
 0x4e5   :  { %v3959_v39 = vpop.f32.mrf.mxu1  ;;  %2324 = vmatprep.subr.mxu0 %v2244_v1  ;;  %v2237_v12 = vld [vmem:[#allocation7 + $0x2e8] sm:$0xff]  ;;  %v2236_v28 = vld [vmem:[#allocation7 + $0x2e0] sm:$0xff] }
 0x4e6   :  { %v4003_v22 = vpop.f32.mrf.mxu0  ;;  %v3960_v19 = vadd.f32 %v3959_v39, %v3958_v49  ;;  %4200 = vmatmul.mubr.msk.f32.vlgmr.msra.gmra.mxu1 %vm588_vm5, %v1868_v50  ;;  %v1819_v2 = vadd.f32 %v4001_v56, %v1734_v23  ;;  %2325 = vmatpush1.msra.mxu0 %v2243_v53  ;;  %v2228_v49 = vld [vmem:[#allocation7 + $0x2a0] sm:$0xff]  ;;  %v2227_v23 = vld [vmem:[#allocation7 + $0x298] sm:$0xff]  ;;  %v2217_v56 = vld [vmem:[#allocation7 + $0x248] sm:$0xff] }
 0x4e7   :  { %4206 = vmatpush3.msra.mxu1 %v3826_v9  ;;  %v4004_v59 = vadd.f32 %v4003_v22, %v4002_v33  ;;  %v3823_v9 = vld [vmem:[%s6059_s3 + $0x20] sm:$0xff]  ;;  %2326 = vmatprep.subr.mxu0 %v2235_v6  ;;  %v2225_v33 = vld [vmem:[#allocation7 + $0x288] sm:$0xff]  ;;  %v2218_v39 = vld [vmem:[#allocation7 + $0x250] sm:$0xff] }
 0x4e8   :  { %v1739_v4 = vadd.f32 %v3960_v19, %v1656_v3  ;;  %v1869_v36 = vmul.f32 %v1860_v43, %v1819_v2  ;;  %4207 = vmatprep.subr.mxu1 %v3825_v27  ;;  %2327 = vmatpush1.msra.mxu0 %v2234_v37  ;;  %v2226_v43 = vld [vmem:[#allocation7 + $0x290] sm:$0xff]  ;;  %v2219_v50 = vld [vmem:[#allocation7 + $0x258] sm:$0xff]  ;;  %v2216_v3 = vld [vmem:[#allocation7 + $0x240] sm:$0xff] }
 0x4e9   :  { %4208 = vmatpush3.msra.mxu1 %v3825_v27  ;;  %2328 = vmatprep.subr.mxu0 %v2226_v43  ;;  %v2284_v22 = vld [vmem:[#allocation7 + $0x460] sm:$0xff]  ;;  %v2286_v27 = vld [vmem:[#allocation7 + $0x470] sm:$0xff] }
 0x4ea   :  { %4202 = vmatprep.mubr.msk.f32.mxu1 %vm588_vm5, %v1869_v36  ;;  %v1824_v38 = vadd.f32 %v4004_v59, %v1739_v4  ;;  %4209 = vmatprep.subr.mxu1 %v3824_v58  ;;  %v3831_v2 = vld [vmem:[%s6060_s4 + $0x4] sm:$0xf]  ;;  %v6250_v36 = vld [vmem:[#allocation60_spill] sm:$0xff] }
 0x4eb   :  { %4210 = vmatpush3.msra.mxu1 %v3824_v58  ;;  %2329 = vmatpush1.msra.mxu0 %v2225_v33  ;;  %v2120_v4 = vrot.slane %v3831_v2, %v5080_v34 }
 0x4ec   :  { %v1870_v17 = vmul.f32 %v1862_v41, %v1824_v38  ;;  %4211 = vmatprep.subr.mxu1 %v3823_v9  ;;  %2330 = vmatprep.subr.mxu0 %v2217_v56  ;;  %v2108_v41 = vrot.slane %v3831_v2, %v6250_v36 }
 0x4ed   :  { %4212 = vmatpush3.msra.mxu1 %v3823_v9  ;;  %2331 = vmatpush1.msra.mxu0 %v2216_v3 }
 0x4ee   :  { %4203 = vmatmul.mubr.msk.f32.gmra.mxu1 %vm588_vm5, %v1870_v17  ;;  %2405 = vmatprep.subr.mxu1 %v2282_v55  ;;  %v6251_v17 = vld [vmem:[#allocation61_spill] sm:$0xff] }
 0x4ef   :  { %2494 = vmatprep.subr.mxu0 %v2284_v22  ;;  %v2151_v58 = vrot.slane %v3831_v2, %v6251_v17 }
 0x5a6   :  { %v4201_v18 = vpop.f32.mrf.mxu1 }
 0x5a8   :  { %v1957_v35 = vpop.f32.mrf.mxu1 }
 0x5a9   :  { %4213 = vmatprep.mubr.msk.f32.mxu1 %vm281_vm2, %v1957_v35 }
 0x5aa   :  { %4214 = vmatmul.mubr.msk.f32.vlgmr.msra.gmra.mxu1 %vm281_vm2, %v4201_v18  ;;  %v6252_v18 = vld [vmem:[#allocation62_spill] sm:$0xff] }
 0x5ab   :  { %2406 = vmatpush1.msra.mxu1 %v2281_v42  ;;  %v2100_v35 = vrot.slane %v3831_v2, %v6252_v18 }
 0x5ac   :  { %2407 = vmatprep.subr.mxu1 %v2273_v5 }
 0x5ad   :  { %2408 = vmatpush1.msra.mxu1 %v2272_v25 }
 0x5ae   :  { %v4204_v13 = vpop.f32.mrf.mxu1  ;;  %2409 = vmatprep.subr.mxu1 %v2264_v7 }
 0x5af   :  { %2410 = vmatpush1.msra.mxu1 %v2263_v21 }
 0x5b0   :  { %v1967_v20 = vpop.f32.mrf.mxu1  ;;  %2411 = vmatprep.subr.mxu1 %v2255_v10 }
 0x5b1   :  { %4216 = vmatprep.mubr.msk.f32.mxu1 %vm281_vm2, %v1967_v20  ;;  %2412 = vmatpush1.msra.mxu1 %v2254_v51 }
 0x5b2   :  { %4217 = vmatmul.mubr.msk.f32.gmra.mxu1 %vm281_vm2, %v4204_v13  ;;  %2413 = vmatprep.subr.mxu1 %v2246_v45 }
 0x5b3   :  { %2453 = vmatprep.mubr.f32.mxu1 %v6249_v44  ;;  %2414 = vmatpush1.msra.mxu1 %v2245_v60  ;;  %v3833_v60 = vld [vmem:[%s6061_s5 + $0x1] ss:$0 sm:$0xff] }
 0x5b4   :  { %2415 = vmatprep.subr.mxu1 %v2237_v12 }
 0x5b5   :  { %2416 = vmatpush1.msra.mxu1 %v2236_v28 }
 0x5b6   :  { %2417 = vmatprep.subr.mxu1 %v2228_v49 }
 0x5b7   :  { %2418 = vmatpush1.msra.mxu1 %v2227_v23 }
 0x5b8   :  { %2419 = vmatprep.subr.mxu1 %v2219_v50 }
 0x5b9   :  { %2420 = vmatpush1.msra.mxu1 %v2218_v39 }
 0x5ba   :  { %2583 = vmatprep.subr.mxu1 %v2286_v27 }
 0x66a   :  { %v5653_v19 = vpop.f32.mrf.mxu1 }
 0x66b   :  { %v2085_v38 = vrot.slane %v5653_v19, 2  ;;  %v2102_v1 = vmul.f32 %v5653_v19, %v2100_v35 }
 0x66c   :  { %v5659_v59 = vpop.f32.mrf.mxu1 }
 0x66d   :  { %v2084_v9 = vrot.slane %v5659_v59, 2  ;;  %v2101_v11 = vmul.f32 %v2100_v35, %v5659_v59 }
 0x66f   :  { %v2086_v13 = vsel %vm384_vm3, %v2084_v9, %v2085_v38  ;;  %v2096_v20 = vsel %vm384_vm3, 0.0, %v2084_v9 }
 0x670   :  { %v2109_v55 = vmul.f32 %v2108_v41, %v2096_v20  ;;  %v2121_v24 = vmul.f32 %v2120_v4, %v2096_v20  ;;  %v2122_v42 = vmul.f32 %v2120_v4, %v2086_v13  ;;  %v2152_v26 = vmul.f32 %v2151_v58, %v2096_v20 }
 0x671   :  { %v2153_v5 = vmul.f32 %v2151_v58, %v2086_v13  ;;  %v2110_v52 = vmul.f32 %v2108_v41, %v2086_v13 }
 0x672   :  { %v2113_v8 = vadd.f32 %v2109_v55, %v2101_v11  ;;  %v2131_v25 = vrot.slane %v2121_v24, 2  ;;  %v2132_v40 = vrot.slane %v2122_v42, 2  ;;  %v5669_v7 = vpop.f32.mrf.mxu1  ;;  %v2162_v21 = vrot.slane %v2152_v26, 4 }
 0x673   :  { %v2163_v57 = vrot.slane %v2153_v5, 4  ;;  %v2089_v54 = vrot.slane %v5669_v7, 2  ;;  %v2114_v12 = vadd.f32 %v2110_v52, %v2102_v1  ;;  %v2104_v28 = vmul.f32 %v5669_v7, %v2100_v35 }
 0x674   :  { %v2133_v10 = vsel %vm384_vm3, %v2131_v25, %v2132_v40  ;;  %v5673_v51 = vpop.f32.mrf.mxu1 }
 0x675   :  { %v2144_v45 = vadd.f32 %v2133_v10, %v2113_v8  ;;  %v2164_v53 = vsel %vm463_vm4, %v2162_v21, %v2163_v57  ;;  %v2087_v6 = vrot.slane %v5673_v51, 2  ;;  %v2125_v43 = vmul.f32 %v2120_v4, %v2089_v54 }
 0x676   :  { %v2103_v23 = vmul.f32 %v2100_v35, %v5673_v51  ;;  %v2156_v22 = vmul.f32 %v2151_v58, %v2089_v54 }
 0x677   :  { %v2175_v37 = vadd.f32 %v2164_v53, %v2144_v45  ;;  %v2088_v49 = vsel %vm384_vm3, %v2085_v38, %v2087_v6  ;;  %v2090_v33 = vsel %vm384_vm3, %v2087_v6, %v2089_v54  ;;  %v2138_v24 = vrot.slane %v2125_v43, 2 }
 0x678   :  { %v2111_v50 = vmul.f32 %v2108_v41, %v2088_v49  ;;  %v2112_v3 = vmul.f32 %v2108_v41, %v2090_v33  ;;  %v2123_v39 = vmul.f32 %v2120_v4, %v2088_v49  ;;  %v2124_v27 = vmul.f32 %v2120_v4, %v2090_v33 }
 0x679   :  { %v2187_v56 = vadd.f32 %v3833_v60, %v2175_v37  ;;  %v2154_v2 = vmul.f32 %v2151_v58, %v2088_v49  ;;  %v2155_v9 = vmul.f32 %v2151_v58, %v2090_v33  ;;  %v2169_v35 = vrot.slane %v2156_v22, 4 }
 0x67a   :  { %v2115_v20 = vadd.f32 %v2111_v50, %v2103_v23  ;;  %v2116_v11 = vadd.f32 %v2112_v3, %v2104_v28  ;;  %v2134_v55 = vrot.slane %v2123_v39, 2  ;;  %v2136_v42 = vrot.slane %v2124_v27, 2 }
 0x67b   :  { %v2191_v13 = vsub.f32 0.0, %v2187_v56  ;;  %v2165_v26 = vrot.slane %v2154_v2, 4  ;;  %v2167_v38 = vrot.slane %v2155_v9, 4 }
 0x67c   :  { %v2135_v8 = vsel %vm384_vm3, %v2132_v40, %v2134_v55  ;;  %v2137_v25 = vsel %vm384_vm3, %v2134_v55, %v2136_v42  ;;  %v2139_v41 = vsel %vm384_vm3, %v2136_v42, %v2138_v24  ;;  %v2275_v55 = vld [vmem:[#allocation7 + $0x418] sm:$0xff]  ;;  %v2277_v24 = vld [vmem:[#allocation7 + $0x428] sm:$0xff]  ;;  %v2274_v42 = vld [vmem:[#allocation7 + $0x410] sm:$0xff] }
 0x67d   :  { %v2195_v5 = vmul.f32 1.442695, %v2191_v13  ;;  %v2145_v52 = vadd.f32 %v2135_v8, %v2114_v12  ;;  %v2146_v4 = vadd.f32 %v2137_v25, %v2115_v20  ;;  %v2147_v58 = vadd.f32 %v2139_v41, %v2116_v11  ;;  %v2283_v20 = vld [vmem:[#allocation7 + $0x458] sm:$0xff]  ;;  %v2285_v11 = vld [vmem:[#allocation7 + $0x468] sm:$0xff]  ;;  %v2256_v25 = vld [vmem:[#allocation7 + $0x380] sm:$0xff] }
 0x67e   :  { %v2166_v21 = vsel %vm463_vm4, %v2163_v57, %v2165_v26  ;;  %v2168_v10 = vsel %vm463_vm4, %v2165_v26, %v2167_v38  ;;  %v2170_v54 = vsel %vm463_vm4, %v2167_v38, %v2169_v35  ;;  %v2266_v26 = vld [vmem:[#allocation7 + $0x3d0] sm:$0xff]  ;;  %v2276_v38 = vld [vmem:[#allocation7 + $0x420] sm:$0xff]  ;;  %v2257_v8 = vld [vmem:[#allocation7 + $0x388] sm:$0xff] }
 0x67f   :  { %4428 = vpow2.f32 %v2195_v5  ;;  %v2176_v1 = vadd.f32 %v2166_v21, %v2145_v52  ;;  %v2177_v45 = vadd.f32 %v2168_v10, %v2146_v4  ;;  %v2178_v53 = vadd.f32 %v2170_v54, %v2147_v58  ;;  %v2268_v5 = vld [vmem:[#allocation7 + $0x3e0] sm:$0xff]  ;;  %v2267_v35 = vld [vmem:[#allocation7 + $0x3d8] sm:$0xff]  ;;  %v2258_v10 = vld [vmem:[#allocation7 + $0x390] sm:$0xff] }
 0x680   :  { %v2259_v41 = vld [vmem:[#allocation7 + $0x398] sm:$0xff]  ;;  %v2248_v52 = vld [vmem:[#allocation7 + $0x340] sm:$0xff] }
 0x681   :  { %v2188_v6 = vadd.f32 %v3833_v60, %v2176_v1  ;;  %v5691_v40 = vadd.f32 %v3833_v60, %v2177_v45  ;;  %v5693_v37 = vadd.f32 %v3833_v60, %v2178_v53  ;;  %v2247_v54 = vld [vmem:[#allocation7 + $0x338] sm:$0xff]  ;;  %v2250_v1 = vld [vmem:[#allocation7 + $0x350] sm:$0xff] }
 0x682   :  { %v2239_v45 = vld [vmem:[#allocation7 + $0x2f8] sm:$0xff] }
 0x683   :  { %v2192_v28 = vsub.f32 0.0, %v2188_v6  ;;  %v2193_v12 = vsub.f32 0.0, %v5691_v40  ;;  %v2194_v43 = vsub.f32 0.0, %v5693_v37 }
 0x685   :  { %v2197_v49 = vmul.f32 1.442695, %v2192_v28  ;;  %v2199_v33 = vmul.f32 1.442695, %v2193_v12  ;;  %v2201_v57 = vmul.f32 1.442695, %v2194_v43 }
 0x686   :  { %v2238_v28 = vld [vmem:[#allocation7 + $0x2f0] sm:$0xff]  ;;  %v2241_v43 = vld [vmem:[#allocation7 + $0x308] sm:$0xff] }
 0x687   :  { %4430 = vpow2.f32 %v2197_v49  ;;  %v2230_v49 = vld [vmem:[#allocation7 + $0x2b0] sm:$0xff] }
 0x688   :  { %4432 = vpow2.f32 %v2199_v33  ;;  %v2240_v33 = vld [vmem:[#allocation7 + $0x300] sm:$0xff] }
 0x689   :  { %4434 = vpow2.f32 %v2201_v57  ;;  %v2229_v57 = vld [vmem:[#allocation7 + $0x2a8] sm:$0xff] }
 0x68c   :  { %v4429_v23 = vpop.eup %4428 }
 0x68d   :  { %v2203_v50 = vadd.f32 1.0, %v4429_v23  ;;  %v2232_v23 = vld [vmem:[#allocation7 + $0x2c0] sm:$0xff] }
 0x68f   :  { %4436 = vrcp.f32 %v2203_v50  ;;  %v2221_v50 = vld [vmem:[#allocation7 + $0x268] sm:$0xff] }
 0x694   :  { %v4431_v3 = vpop.eup %4430 }
 0x695   :  { %v4433_v39 = vpop.eup %4432  ;;  %v2204_v22 = vadd.f32 1.0, %v4431_v3  ;;  %v2231_v3 = vld [vmem:[#allocation7 + $0x2b8] sm:$0xff] }
 0x696   :  { %v4435_v27 = vpop.eup %4434  ;;  %v2205_v60 = vadd.f32 1.0, %v4433_v39  ;;  %v2220_v39 = vld [vmem:[#allocation7 + $0x260] sm:$0xff] }
 0x697   :  { %4438 = vrcp.f32 %v2204_v22  ;;  %v2206_v2 = vadd.f32 1.0, %v4435_v27  ;;  %v2222_v22 = vld [vmem:[#allocation7 + $0x270] sm:$0xff]  ;;  %v2287_v27 = vld [vmem:[#allocation7 + $0x478] sm:$0xff] }
 0x698   :  { %4440 = vrcp.f32 %v2205_v60  ;;  %v2278_v60 = vld [vmem:[#allocation7 + $0x430] sm:$0xff] }
 0x699   :  { %4442 = vrcp.f32 %v2206_v2  ;;  %v2269_v2 = vld [vmem:[#allocation7 + $0x3e8] sm:$0xff] }
 0x69c   :  { %v4437_v9 = vpop.eup %4436 }
 0x69d   :  { %v5697_v13 = vmul.f32 %v4437_v9, %v2187_v56  ;;  %v2265_v56 = vld [vmem:[#allocation7 + $0x3c8] sm:$0xff]  ;;  %v2260_v9 = vld [vmem:[#allocation7 + $0x3a0] sm:$0xff] }
 0x69f   :  { %3834 = vmatmul.mubr.msk.f32.vlgmr.msra.gmra.mxu0 %vm588_vm5, %v5697_v13  ;;  %3838 = vmatmul.mubr.msk.f32.vlgmr.msra.gmra.mxu1 %vm588_vm5, %v5697_v13 }
 0x6a0   :  { %2495 = vmatpush1.msra.mxu0 %v2283_v20  ;;  %2584 = vmatpush1.msra.mxu1 %v2285_v11  ;;  %v2251_v20 = vld [vmem:[#allocation7 + $0x358] sm:$0xff]  ;;  %v2242_v11 = vld [vmem:[#allocation7 + $0x310] sm:$0xff] }
 0x6a1   :  { %2496 = vmatprep.subr.mxu0 %v2275_v55  ;;  %2585 = vmatprep.subr.mxu1 %v2277_v24  ;;  %v2233_v55 = vld [vmem:[#allocation7 + $0x2c8] sm:$0xff]  ;;  %v2224_v24 = vld [vmem:[#allocation7 + $0x280] sm:$0xff] }
 0x6a2   :  { %2497 = vmatpush1.msra.mxu0 %v2274_v42  ;;  %2370 = vmatprep.mubr.f32.mxu0 %v6249_v44  ;;  %v6253_v42 = vld [vmem:[#allocation63_spill] sm:$0xff] }
 0x6a3   :  { %2459 = vmatprep.mubr.f32.mxu1 %v6249_v44  ;;  %2498 = vmatprep.subr.mxu0 %v2266_v26  ;;  %v6254_v26 = vld [vmem:[#allocation65_spill] sm:$0xff] }
 0x6a4   :  { %2586 = vmatpush1.msra.mxu1 %v2276_v38  ;;  %2499 = vmatpush1.msra.mxu0 %v2265_v56  ;;  %v4439_v4 = vpop.eup %4438  ;;  %v6255_v38 = vld [vmem:[#allocation64_spill] sm:$0xff]  ;;  %v6256_v56 = vld [vmem:[#allocation67_spill] sm:$0xff] }
 0x6a5   :  { %2587 = vmatprep.subr.mxu1 %v2268_v5  ;;  %2500 = vmatprep.subr.mxu0 %v2257_v8  ;;  %v5705_v58 = vmul.f32 %v4439_v4, %v2188_v6  ;;  %v4441_v21 = vpop.eup %4440  ;;  %v2249_v6 = vld [vmem:[#allocation7 + $0x348] sm:$0xff]  ;;  %v6257_v5 = vld [vmem:[#allocation66_spill] sm:$0xff]  ;;  %v6258_v8 = vld [vmem:[#allocation69_spill] sm:$0xff] }
 0x6a6   :  { %2588 = vmatpush1.msra.mxu1 %v2267_v35  ;;  %2501 = vmatpush1.msra.mxu0 %v2256_v25  ;;  %v5714_v53 = vmul.f32 %v4441_v21, %v5691_v40  ;;  %v4443_v12 = vpop.eup %4442  ;;  %v6259_v35 = vld [vmem:[#allocation68_spill] sm:$0xff]  ;;  %v6260_v25 = vld [vmem:[#allocation71_spill] sm:$0xff] }
 0x6a7   :  { %2589 = vmatprep.subr.mxu1 %v2259_v41  ;;  %2502 = vmatprep.subr.mxu0 %v2248_v52  ;;  %v5721_v40 = vmul.f32 %v4443_v12, %v5693_v37  ;;  %v2223_v37 = vld [vmem:[#allocation7 + $0x278] sm:$0xff]  ;;  %v6261_v41 = vld [vmem:[#allocation70_spill] sm:$0xff]  ;;  %v6263_v4 = vld [vmem:[#allocation72_spill] sm:$0xff] }
 0x6a8   :  { %3835 = vmatmul.mubr.msk.f32.gmra.mxu0 %vm588_vm5, %v5705_v58  ;;  %3839 = vmatmul.mubr.msk.f32.gmra.mxu1 %vm588_vm5, %v5705_v58  ;;  %v6262_v52 = vld [vmem:[#allocation73_spill] sm:$0xff]  ;;  %v6264_v21 = vld [vmem:[#allocation75_spill] sm:$0xff]  ;;  %v6271_v12 = vld [vmem:[#allocation80_spill] sm:$0xff] }
 0x6a9   :  { %2376 = vmatprep.mubr.f32.mxu0 %v6249_v44  ;;  %2465 = vmatprep.mubr.f32.mxu1 %v6249_v44 }
 0x6aa   :  { %2590 = vmatpush1.msra.mxu1 %v2258_v10  ;;  %2503 = vmatpush1.msra.mxu0 %v2247_v54  ;;  %v6265_v10 = vld [vmem:[#allocation74_spill] sm:$0xff]  ;;  %v6266_v54 = vld [vmem:[#allocation77_spill] sm:$0xff] }
 0x6ab   :  { %2591 = vmatprep.subr.mxu1 %v2250_v1  ;;  %2504 = vmatprep.subr.mxu0 %v2239_v45  ;;  %v6267_v1 = vld [vmem:[#allocation76_spill] sm:$0xff]  ;;  %v6268_v45 = vld [vmem:[#allocation79_spill] sm:$0xff] }
 0x6ac   :  { %3836 = vmatmul.mubr.msk.f32.gmra.mxu0 %vm588_vm5, %v5714_v53  ;;  %3840 = vmatmul.mubr.msk.f32.gmra.mxu1 %vm588_vm5, %v5714_v53 }
 0x6ad   :  { %2592 = vmatpush1.msra.mxu1 %v2249_v6  ;;  %2505 = vmatpush1.msra.mxu0 %v2238_v28  ;;  %v6269_v6 = vld [vmem:[#allocation78_spill] sm:$0xff]  ;;  %v6270_v28 = vld [vmem:[#allocation81_spill] sm:$0xff] }
 0x6ae   :  { %2593 = vmatprep.subr.mxu1 %v2241_v43  ;;  %2382 = vmatprep.mubr.f32.mxu0 %v6249_v44  ;;  %v6272_v43 = vld [vmem:[#allocation83_spill] sm:$0xff] }
 0x6af   :  { %2471 = vmatprep.mubr.f32.mxu1 %v6249_v44  ;;  %2506 = vmatprep.subr.mxu0 %v2230_v49  ;;  %v6273_v49 = vld [vmem:[#allocation82_spill] sm:$0xff] }
 0x6b0   :  { %2594 = vmatpush1.msra.mxu1 %v2240_v33  ;;  %3837 = vmatmul.mubr.msk.f32.gmra.mxu0 %vm588_vm5, %v5721_v40  ;;  %v6274_v33 = vld [vmem:[#allocation85_spill] sm:$0xff] }
 0x6b1   :  { %3841 = vmatmul.mubr.msk.f32.gmra.mxu1 %vm588_vm5, %v5721_v40  ;;  %2507 = vmatpush1.msra.mxu0 %v2229_v57  ;;  %v6275_v57 = vld [vmem:[#allocation84_spill] sm:$0xff] }
 0x6b2   :  { %2595 = vmatprep.subr.mxu1 %v2232_v23  ;;  %2508 = vmatprep.subr.mxu0 %v2221_v50  ;;  %v6276_v23 = vld [vmem:[#allocation87_spill] sm:$0xff]  ;;  %v6277_v50 = vld [vmem:[#allocation86_spill] sm:$0xff] }
 0x6b3   :  { %2596 = vmatpush1.msra.mxu1 %v2231_v3  ;;  %2509 = vmatpush1.msra.mxu0 %v2220_v39  ;;  %v6278_v3 = vld [vmem:[#allocation89_spill] sm:$0xff]  ;;  %v6279_v39 = vld [vmem:[#allocation88_spill] sm:$0xff] }
 0x6b4   :  { %2597 = vmatprep.subr.mxu1 %v2223_v37  ;;  %2542 = vmatprep.mubr.f32.mxu0 %v6249_v44  ;;  %v6280_v37 = vld [vmem:[#allocation91_spill] sm:$0xff] }
 0x6b5   :  { %2598 = vmatpush1.msra.mxu1 %v2222_v22  ;;  %2631 = vmatprep.mubr.f32.mxu1 %v6249_v44  ;;  %v6281_v22 = vld [vmem:[#allocation90_spill] sm:$0xff] }
 0x6b6   :  { %4219 = vmatprep.subr.mxu0 %v2287_v27  ;;  %3842 = vmatmul.mubr.msk.f32.vlgmr.msra.gmra.mxu0 %vm588_vm5, %v5697_v13 }
 0x6b7   :  { %3846 = vmatmul.mubr.msk.f32.vlgmr.msra.gmra.mxu1 %vm588_vm5, %v5697_v13  ;;  %4220 = vmatpush3.msra.mxu0 %v2287_v27  ;;  %v6282_v27 = vld [vmem:[#allocation93_spill] sm:$0xff] }
 0x6b8   :  { %4221 = vmatprep.subr.mxu0 %v2278_v60  ;;  %2548 = vmatprep.mubr.f32.mxu0 %v6249_v44 }
 0x6b9   :  { %4222 = vmatpush3.msra.mxu0 %v2278_v60  ;;  %2637 = vmatprep.mubr.f32.mxu1 %v6249_v44  ;;  %v6283_v60 = vld [vmem:[#allocation92_spill] sm:$0xff] }
 0x6ba   :  { %4223 = vmatprep.subr.mxu0 %v2269_v2  ;;  %3843 = vmatmul.mubr.msk.f32.gmra.mxu0 %vm588_vm5, %v5705_v58 }
 0x6bb   :  { %3847 = vmatmul.mubr.msk.f32.gmra.mxu1 %vm588_vm5, %v5705_v58  ;;  %4224 = vmatpush3.msra.mxu0 %v2269_v2  ;;  %v6284_v2 = vld [vmem:[#allocation94_spill] sm:$0xff] }
 0x6bc   :  { %4225 = vmatprep.subr.mxu0 %v2260_v9  ;;  %2554 = vmatprep.mubr.f32.mxu0 %v6249_v44 }
 0x6bd   :  { %4226 = vmatpush3.msra.mxu0 %v2260_v9  ;;  %2643 = vmatprep.mubr.f32.mxu1 %v6249_v44 }
 0x6be   :  { %4227 = vmatprep.subr.mxu0 %v2251_v20  ;;  %3844 = vmatmul.mubr.msk.f32.gmra.mxu0 %vm588_vm5, %v5714_v53 }
 0x6bf   :  { %3848 = vmatmul.mubr.msk.f32.gmra.mxu1 %vm588_vm5, %v5714_v53  ;;  %4228 = vmatpush3.msra.mxu0 %v2251_v20 }
 0x6c0   :  { %4229 = vmatprep.subr.mxu0 %v2242_v11  ;;  %2560 = vmatprep.mubr.f32.mxu0 %v6249_v44 }
 0x6c1   :  { %4230 = vmatpush3.msra.mxu0 %v2242_v11  ;;  %2649 = vmatprep.mubr.f32.mxu1 %v6249_v44 }
 0x6c2   :  { %4231 = vmatprep.subr.mxu0 %v2233_v55  ;;  %3845 = vmatmul.mubr.msk.f32.gmra.mxu0 %vm588_vm5, %v5721_v40 }
 0x6c3   :  { %3849 = vmatmul.mubr.msk.f32.gmra.mxu1 %vm588_vm5, %v5721_v40  ;;  %4232 = vmatpush3.msra.mxu0 %v2233_v55 }
 0x6c4   :  { %4233 = vmatprep.subr.mxu0 %v2224_v24  ;;  %4235 = vmatprep.mubr.msk.f32.mxu0 %vm588_vm5, %v5697_v13 }
 0x6c5   :  { %4234 = vmatpush3.msra.mxu0 %v2224_v24  ;;  %2845 = vmatprep.subr.mxu1 %v6253_v42 }
 0x6c6   :  { %4236 = vmatmul.mubr.msk.f32.vlgmr.msra.gmra.mxu0 %vm588_vm5, %v5705_v58  ;;  %2846 = vmatpush1.msra.mxu1 %v6254_v26 }
 0x6c7   :  { %4238 = vmatprep.mubr.msk.f32.mxu0 %vm588_vm5, %v5714_v53  ;;  %2958 = vmatprep.subr.mxu0 %v6255_v38 }
 0x6c8   :  { %2847 = vmatprep.subr.mxu1 %v6256_v56  ;;  %2959 = vmatpush1.msra.mxu0 %v6257_v5 }
 0x6c9   :  { %2848 = vmatpush1.msra.mxu1 %v6258_v8  ;;  %2960 = vmatprep.subr.mxu0 %v6259_v35 }
 0x6ca   :  { %4239 = vmatmul.mubr.msk.f32.gmra.mxu0 %vm588_vm5, %v5721_v40  ;;  %2849 = vmatprep.subr.mxu1 %v6260_v25 }
 0x6cb   :  { %2961 = vmatpush1.msra.mxu0 %v6261_v41  ;;  %2850 = vmatpush1.msra.mxu1 %v6262_v52 }
 0x6cc   :  { %2962 = vmatprep.subr.mxu0 %v6263_v4  ;;  %2851 = vmatprep.subr.mxu1 %v6264_v21 }
 0x6cd   :  { %2963 = vmatpush1.msra.mxu0 %v6265_v10  ;;  %2852 = vmatpush1.msra.mxu1 %v6266_v54 }
 0x6ce   :  { %2964 = vmatprep.subr.mxu0 %v6267_v1  ;;  %2853 = vmatprep.subr.mxu1 %v6268_v45 }
 0x6cf   :  { %2965 = vmatpush1.msra.mxu0 %v6269_v6  ;;  %2854 = vmatpush1.msra.mxu1 %v6270_v28 }
 0x6d0   :  { %2966 = vmatprep.subr.mxu0 %v6271_v12  ;;  %2855 = vmatprep.subr.mxu1 %v6272_v43 }
 0x6d1   :  { %2967 = vmatpush1.msra.mxu0 %v6273_v49  ;;  %2856 = vmatpush1.msra.mxu1 %v6274_v33 }
 0x6d2   :  { %2968 = vmatprep.subr.mxu0 %v6275_v57  ;;  %2857 = vmatprep.subr.mxu1 %v6276_v23 }
 0x6d3   :  { %2969 = vmatpush1.msra.mxu0 %v6277_v50  ;;  %2858 = vmatpush1.msra.mxu1 %v6278_v3 }
 0x6d4   :  { %2970 = vmatprep.subr.mxu0 %v6279_v39  ;;  %2859 = vmatprep.subr.mxu1 %v6280_v37  ;;  %v3855_v39 = vld [vmem:[%s6063_s7 + $0x1] ss:$0 sm:$0xff] }
 0x6d5   :  { %2971 = vmatpush1.msra.mxu0 %v6281_v22  ;;  %2860 = vmatpush1.msra.mxu1 %v6282_v27 }
 0x6d6   :  { %2972 = vmatprep.subr.mxu0 %v6283_v60  ;;  %2893 = vmatprep.mubr.f32.mxu1 %v6249_v44 }
 0x6d7   :  { %2973 = vmatpush1.msra.mxu0 %v6284_v2  ;;  %3006 = vmatprep.mubr.f32.mxu0 %v6249_v44 }
 0x75f   :  { %v5795_v9 = vpop.f32.mrf.mxu0  ;;  %v5797_v20 = vpop.f32.mrf.mxu1 }
 0x761   :  { %v5799_v11 = vpop.f32.mrf.mxu0  ;;  %v5801_v55 = vpop.f32.mrf.mxu1 }
 0x768   :  { %v5803_v24 = vpop.f32.mrf.mxu0  ;;  %v5805_v42 = vpop.f32.mrf.mxu1 }
 0x76a   :  { %v5807_v26 = vpop.f32.mrf.mxu0  ;;  %v5809_v38 = vpop.f32.mrf.mxu1 }
 0x76c   :  { %v5811_v56 = vpop.f32.mrf.mxu0  ;;  %v5813_v5 = vpop.f32.mrf.mxu1 }
 0x76e   :  { %v5815_v8 = vpop.f32.mrf.mxu0  ;;  %v5817_v35 = vpop.f32.mrf.mxu1 }
 0x770   :  { %v5819_v25 = vpop.f32.mrf.mxu0 }
 0x771   :  { %v5821_v41 = vpop.f32.mrf.mxu1 }
 0x772   :  { %v5823_v52 = vpop.f32.mrf.mxu0 }
 0x773   :  { %v5825_v4 = vpop.f32.mrf.mxu1 }
 0x776   :  { %v2544_v21 = vpop.f32.mrf.mxu0 }
 0x777   :  { %2741 = vst [vmem:[#allocation5 + $0x30] sm:$0xff] %v2544_v21  ;;  %v2633_v10 = vpop.f32.mrf.mxu1 }
 0x778   :  { %2743 = vst [vmem:[#allocation5 + $0x58] sm:$0xff] %v2633_v10  ;;  %v2546_v54 = vpop.f32.mrf.mxu0 }
 0x779   :  { %2742 = vst [vmem:[#allocation5] sm:$0xff] %v2546_v54  ;;  %v2635_v1 = vpop.f32.mrf.mxu1 }
 0x77a   :  { %2744 = vst [vmem:[#allocation5 + $0x18] sm:$0xff] %v2635_v1  ;;  %v2550_v45 = vpop.f32.mrf.mxu0 }
 0x77b   :  { %2745 = vst [vmem:[#allocation5 + $0x50] sm:$0xff] %v2550_v45  ;;  %v2639_v6 = vpop.f32.mrf.mxu1 }
 0x77c   :  { %2747 = vst [vmem:[#allocation5 + $0x8] sm:$0xff] %v2639_v6  ;;  %v2552_v28 = vpop.f32.mrf.mxu0 }
 0x77d   :  { %2746 = vst [vmem:[#allocation5 + $0x68] sm:$0xff] %v2552_v28  ;;  %v2641_v12 = vpop.f32.mrf.mxu1 }
 0x77e   :  { %2748 = vst [vmem:[#allocation5 + $0x48] sm:$0xff] %v2641_v12  ;;  %v2556_v43 = vpop.f32.mrf.mxu0 }
 0x77f   :  { %2749 = vst [vmem:[#allocation5 + $0x40] sm:$0xff] %v2556_v43  ;;  %v2645_v49 = vpop.f32.mrf.mxu1 }
 0x780   :  { %2751 = vst [vmem:[#allocation5 + $0x10] sm:$0xff] %v2645_v49  ;;  %v2558_v33 = vpop.f32.mrf.mxu0 }
 0x781   :  { %2750 = vst [vmem:[#allocation5 + $0x20] sm:$0xff] %v2558_v33  ;;  %v2647_v57 = vpop.f32.mrf.mxu1 }
 0x782   :  { %2752 = vst [vmem:[#allocation5 + $0x38] sm:$0xff] %v2647_v57  ;;  %v2562_v23 = vpop.f32.mrf.mxu0 }
 0x783   :  { %2753 = vst [vmem:[#allocation5 + $0x60] sm:$0xff] %v2562_v23  ;;  %v2651_v50 = vpop.f32.mrf.mxu1 }
 0x784   :  { %2755 = vst [vmem:[#allocation5 + $0x78] sm:$0xff] %v2651_v50  ;;  %v2564_v3 = vpop.f32.mrf.mxu0 }
 0x785   :  { %2754 = vst [vmem:[#allocation5 + $0x70] sm:$0xff] %v2564_v3  ;;  %v2653_v37 = vpop.f32.mrf.mxu1 }
 0x786   :  { %2756 = vst [vmem:[#allocation5 + $0x28] sm:$0xff] %v2653_v37  ;;  %v4237_v22 = vpop.f32.mrf.mxu0 }
 0x787   :  { %v2766_v27 = vadd.f32 %v4237_v22, %v3855_v39 }
 0x788   :  { %v2722_v60 = vpop.f32.mrf.mxu0 }
 0x789   :  { %v2774_v2 = vmin.f32 %v2766_v27, 20.0  ;;  %v2765_v21 = vadd.f32 %v3855_v39, %v2722_v60  ;;  %vm2770_vm12 = vcmp.gt.f32.partialorder %v2766_v27, 20.0 }
 0x78a   :  { %v4240_v10 = vpop.f32.mrf.mxu0 }
 0x78b   :  { %v2779_v54 = vmul.f32 1.442695, %v2774_v2  ;;  %v2773_v1 = vmin.f32 %v2765_v21, 20.0  ;;  %v2768_v45 = vadd.f32 %v4240_v10, %v3855_v39  ;;  %vm2769_vm11 = vcmp.gt.f32.partialorder %v2765_v21, 20.0 }
 0x78c   :  { %v2732_v6 = vpop.f32.mrf.mxu0 }
 0x78d   :  { %4444 = vpow2.f32 %v2779_v54  ;;  %v2777_v28 = vmul.f32 1.442695, %v2773_v1  ;;  %v2776_v12 = vmin.f32 %v2768_v45, 20.0  ;;  %v2767_v43 = vadd.f32 %v3855_v39, %v2732_v6 }
 0x78e   :  { %vm2772_vm14 = vcmp.gt.f32.partialorder %v2768_v45, 20.0 }
 0x78f   :  { %4446 = vpow2.f32 %v2777_v28  ;;  %v2783_v49 = vmul.f32 1.442695, %v2776_v12  ;;  %v2775_v33 = vmin.f32 %v2767_v43, 20.0  ;;  %vm2771_vm13 = vcmp.gt.f32.partialorder %v2767_v43, 20.0 }
 0x791   :  { %v2781_v57 = vmul.f32 1.442695, %v2775_v33  ;;  %4448 = vpow2.f32 %v2783_v49 }
 0x793   :  { %4450 = vpow2.f32 %v2781_v57 }
 0x79a   :  { %v4445_v23 = vpop.eup %4444 }
 0x79b   :  { %v2786_v50 = vadd.f32 1.0, %v4445_v23 }
 0x79c   :  { %v4447_v3 = vpop.eup %4446 }
 0x79d   :  { %v2785_v37 = vadd.f32 1.0, %v4447_v3  ;;  %4452 = vlog2.f32 %v2786_v50 }
 0x79e   :  { %v4449_v22 = vpop.eup %4448 }
 0x79f   :  { %4454 = vlog2.f32 %v2785_v37  ;;  %v2788_v10 = vadd.f32 1.0, %v4449_v22  ;;  %v3872_v37 = vld [vmem:[%s6064_s8 + $0x4] sm:$0xf]  ;;  %s5895_s8 = smov 0  }
 0x7a0   :  { %v4451_v60 = vpop.eup %4450  ;;  %v3061_v22 = vrot.slane %v3872_v37, %v6250_v36 }
 0x7a1   :  { %v2787_v2 = vadd.f32 1.0, %v4451_v60  ;;  %v3069_v60 = vrot.slane %v3872_v37, %v6251_v17 }
 0x7a3   :  { %4456 = vlog2.f32 %v2787_v2  ;;  %v3065_v2 = vrot.slane %v3872_v37, %v5080_v34 }
 0x7a4   :  { %4458 = vlog2.f32 %v2788_v10  ;;  %v3073_v10 = vrot.slane %v3872_v37, %v6252_v18 }
 0x7aa   :  { %v4453_v54 = vpop.eup %4452 }
 0x7ab   :  { %v2792_v28 = vmul.f32 0.6931472, %v4453_v54 }
 0x7ac   :  { %v4455_v39 = vpop.eup %4454 }
 0x7ad   :  { %v2790_v1 = vmul.f32 0.6931472, %v4455_v39  ;;  %v2798_v49 = vsel %vm2770_vm12, %v2766_v27, %v2792_v28 }
 0x7af   :  { %v2797_v6 = vsel %vm2769_vm11, %v2765_v21, %v2790_v1 }
 0x7b0   :  { %v4457_v12 = vpop.eup %4456  ;;  %3856 = vmatmul.mubr.msk.f32.vlgmr.msra.gmra.mxu1 %vm588_vm5, %v2797_v6  ;;  %3864 = vmatmul.mubr.msk.f32.vlgmr.msra.gmra.mxu0 %vm588_vm5, %v2797_v6 }
 0x7b1   :  { %2899 = vmatprep.mubr.f32.mxu1 %v6249_v44  ;;  %3012 = vmatprep.mubr.f32.mxu0 %v6249_v44  ;;  %v2794_v33 = vmul.f32 0.6931472, %v4457_v12  ;;  %v4459_v57 = vpop.eup %4458 }
 0x7b2   :  { %v2796_v23 = vmul.f32 0.6931472, %v4459_v57 }
 0x7b3   :  { %v2799_v21 = vsel %vm2771_vm13, %v2767_v43, %v2794_v33  ;;  %v2801_v43 = vmul.f32 %v2797_v6, %v5697_v13 }
 0x7b4   :  { %3857 = vmatmul.mubr.msk.f32.gmra.mxu1 %vm588_vm5, %v2798_v49  ;;  %3865 = vmatmul.mubr.msk.f32.gmra.mxu0 %vm588_vm5, %v2798_v49  ;;  %v2800_v27 = vsel %vm2772_vm14, %v2768_v45, %v2796_v23  ;;  %v2802_v45 = vmul.f32 %v2798_v49, %v5705_v58  ;;  %v2803_v50 = vmul.f32 %v2799_v21, %v5714_v53 }
 0x7b5   :  { %2905 = vmatprep.mubr.f32.mxu1 %v6249_v44  ;;  %3018 = vmatprep.mubr.f32.mxu0 %v6249_v44  ;;  %v2804_v3 = vmul.f32 %v2800_v27, %v5721_v40 }
 0x7b8   :  { %3858 = vmatmul.mubr.msk.f32.gmra.mxu1 %vm588_vm5, %v2799_v21  ;;  %3866 = vmatmul.mubr.msk.f32.gmra.mxu0 %vm588_vm5, %v2799_v21 }
 0x7b9   :  { %2911 = vmatprep.mubr.f32.mxu1 %v6249_v44  ;;  %3024 = vmatprep.mubr.f32.mxu0 %v6249_v44 }
 0x7bc   :  { %3859 = vmatmul.mubr.msk.f32.gmra.mxu1 %vm588_vm5, %v2800_v27  ;;  %3867 = vmatmul.mubr.msk.f32.gmra.mxu0 %vm588_vm5, %v2800_v27 }
 0x7bd   :  { %2917 = vmatprep.mubr.f32.mxu1 %v6249_v44  ;;  %3030 = vmatprep.mubr.f32.mxu0 %v6249_v44 }
 0x7c0   :  { %3860 = vmatmul.mubr.msk.f32.gmra.mxu1 %vm588_vm5, %v2801_v43  ;;  %3868 = vmatmul.mubr.msk.f32.gmra.mxu0 %vm588_vm5, %v2801_v43 }
 0x7c1   :  { %2923 = vmatprep.mubr.f32.mxu1 %v6249_v44  ;;  %3036 = vmatprep.mubr.f32.mxu0 %v6249_v44 }
 0x7c4   :  { %3861 = vmatmul.mubr.msk.f32.gmra.mxu1 %vm588_vm5, %v2802_v45  ;;  %3869 = vmatmul.mubr.msk.f32.gmra.mxu0 %vm588_vm5, %v2802_v45 }
 0x7c5   :  { %2929 = vmatprep.mubr.f32.mxu1 %v6249_v44  ;;  %3042 = vmatprep.mubr.f32.mxu0 %v6249_v44 }
 0x7c8   :  { %3862 = vmatmul.mubr.msk.f32.gmra.mxu1 %vm588_vm5, %v2803_v50  ;;  %3870 = vmatmul.mubr.msk.f32.gmra.mxu0 %vm588_vm5, %v2803_v50 }
 0x7c9   :  { %2935 = vmatprep.mubr.f32.mxu1 %v6249_v44  ;;  %3048 = vmatprep.mubr.f32.mxu0 %v6249_v44 }
 0x7cc   :  { %3863 = vmatmul.mubr.msk.f32.gmra.mxu1 %vm588_vm5, %v2804_v3  ;;  %3871 = vmatmul.mubr.msk.f32.gmra.mxu0 %vm588_vm5, %v2804_v3 }
 0x870   :  { %v2895_v54 = vpop.f32.mrf.mxu1  ;;  %v3008_v44 = vpop.f32.mrf.mxu0 }
 0x871   :  { %v3078_v39 = vmul.f32 %v3061_v22, %v2895_v54  ;;  %v3080_v1 = vmul.f32 %v3069_v60, %v3008_v44 }
 0x872   :  { %v2897_v6 = vpop.f32.mrf.mxu1  ;;  %v3010_v28 = vpop.f32.mrf.mxu0 }
 0x873   :  { %v3094_v12 = vmul.f32 1.442695, %v3078_v39  ;;  %v3098_v49 = vmul.f32 1.442695, %v3080_v1  ;;  %v3079_v33 = vmul.f32 %v3065_v2, %v2897_v6  ;;  %v3081_v57 = vmul.f32 %v3073_v10, %v3010_v28 }
 0x874   :  { %v2901_v21 = vpop.f32.mrf.mxu1  ;;  %v3014_v23 = vpop.f32.mrf.mxu0 }
 0x875   :  { %4460 = vpow2.f32 %v3094_v12  ;;  %v3096_v36 = vmul.f32 1.442695, %v3079_v33  ;;  %v3100_v27 = vmul.f32 1.442695, %v3081_v57  ;;  %v3082_v17 = vmul.f32 %v3061_v22, %v2901_v21 }
 0x876   :  { %4462 = vpow2.f32 %v3098_v49  ;;  %v3084_v34 = vmul.f32 %v3069_v60, %v3014_v23  ;;  %v2903_v43 = vpop.f32.mrf.mxu1  ;;  %v3016_v18 = vpop.f32.mrf.mxu0 }
 0x877   :  { %4464 = vpow2.f32 %v3096_v36  ;;  %v3102_v45 = vmul.f32 1.442695, %v3082_v17  ;;  %v3083_v50 = vmul.f32 %v3065_v2, %v2903_v43  ;;  %v3085_v3 = vmul.f32 %v3073_v10, %v3016_v18 }
 0x878   :  { %4466 = vpow2.f32 %v3100_v27  ;;  %v3106_v37 = vmul.f32 1.442695, %v3084_v34  ;;  %v2907_v54 = vpop.f32.mrf.mxu1  ;;  %v3020_v44 = vpop.f32.mrf.mxu0 }
 0x879   :  { %4468 = vpow2.f32 %v3102_v45  ;;  %v3104_v39 = vmul.f32 1.442695, %v3083_v50  ;;  %v3108_v1 = vmul.f32 1.442695, %v3085_v3  ;;  %v3086_v6 = vmul.f32 %v3061_v22, %v2907_v54 }
 0x87a   :  { %4470 = vpow2.f32 %v3106_v37  ;;  %v3088_v28 = vmul.f32 %v3069_v60, %v3020_v44  ;;  %v2909_v12 = vpop.f32.mrf.mxu1  ;;  %v3022_v33 = vpop.f32.mrf.mxu0 }
 0x87b   :  { %4472 = vpow2.f32 %v3104_v39  ;;  %v3110_v49 = vmul.f32 1.442695, %v3086_v6  ;;  %v3087_v57 = vmul.f32 %v3065_v2, %v2909_v12  ;;  %v3089_v21 = vmul.f32 %v3073_v10, %v3022_v33 }
 0x87c   :  { %4474 = vpow2.f32 %v3108_v1  ;;  %v3114_v23 = vmul.f32 1.442695, %v3088_v28  ;;  %v2913_v36 = vpop.f32.mrf.mxu1  ;;  %v3026_v17 = vpop.f32.mrf.mxu0 }
 0x87d   :  { %4476 = vpow2.f32 %v3110_v49  ;;  %v3112_v27 = vmul.f32 1.442695, %v3087_v57  ;;  %v3116_v34 = vmul.f32 1.442695, %v3089_v21  ;;  %v3090_v43 = vmul.f32 %v3061_v22, %v2913_v36 }
 0x87e   :  { %4478 = vpow2.f32 %v3114_v23  ;;  %v3092_v18 = vmul.f32 %v3069_v60, %v3026_v17  ;;  %v2915_v45 = vpop.f32.mrf.mxu1  ;;  %v3028_v50 = vpop.f32.mrf.mxu0 }
 0x87f   :  { %4480 = vpow2.f32 %v3112_v27  ;;  %v3118_v3 = vmul.f32 1.442695, %v3090_v43  ;;  %v3091_v37 = vmul.f32 %v3065_v2, %v2915_v45  ;;  %v3093_v54 = vmul.f32 %v3073_v10, %v3028_v50 }
 0x880   :  { %4482 = vpow2.f32 %v3116_v34  ;;  %v3122_v44 = vmul.f32 1.442695, %v3092_v18  ;;  %v2919_v39 = vpop.f32.mrf.mxu1  ;;  %v3032_v6 = vpop.f32.mrf.mxu0 }
 0x881   :  { %4484 = vpow2.f32 %v3118_v3  ;;  %v3120_v1 = vmul.f32 1.442695, %v3091_v37  ;;  %v3124_v28 = vmul.f32 1.442695, %v3093_v54  ;;  %v3142_v12 = vmul.f32 %v2919_v39, %v5795_v9 }
 0x882   :  { %v4461_v33 = vpop.eup %4460  ;;  %4486 = vpow2.f32 %v3122_v44  ;;  %v3144_v22 = vmul.f32 %v3032_v6, %v5797_v20  ;;  %v2921_v60 = vpop.f32.mrf.mxu1 }
 0x883   :  { %v3034_v49 = vpop.f32.mrf.mxu0  ;;  %v4463_v57 = vpop.eup %4462  ;;  %3126 = vst [vmem:[#allocation2] sm:$0xff] %v4461_v33  ;;  %4488 = vpow2.f32 %v3120_v1  ;;  %3158 = vst [vmem:[#allocation3] sm:$0xff] %v3142_v12  ;;  %v3143_v2 = vmul.f32 %v2921_v60, %v5799_v11 }
 0x884   :  { %v3145_v10 = vmul.f32 %v3034_v49, %v5801_v55  ;;  %v4465_v21 = vpop.eup %4464  ;;  %3128 = vst [vmem:[#allocation2 + $0x10] sm:$0xff] %v4463_v57  ;;  %4490 = vpow2.f32 %v3124_v28  ;;  %3160 = vst [vmem:[#allocation3 + $0x10] sm:$0xff] %v3144_v22  ;;  %v2925_v23 = vpop.f32.mrf.mxu1 }
 0x885   :  { %v3038_v9 = vpop.f32.mrf.mxu0  ;;  %v4467_v36 = vpop.eup %4466  ;;  %3127 = vst [vmem:[#allocation2 + $0x8] sm:$0xff] %v4465_v21  ;;  %3159 = vst [vmem:[#allocation3 + $0x8] sm:$0xff] %v3143_v2  ;;  %v3146_v20 = vmul.f32 %v2925_v23, %v5803_v24  ;;  %v5891_v21 = vmov 0.0   ;;  %v5893_v23 = vmov 0.0  }
 0x886   :  { %3161 = vst [vmem:[#allocation3 + $0x18] sm:$0xff] %v3145_v10  ;;  %v3148_v17 = vmul.f32 %v3038_v9, %v5805_v42  ;;  %v4469_v27 = vpop.eup %4468  ;;  %3129 = vst [vmem:[#allocation2 + $0x18] sm:$0xff] %v4467_v36  ;;  %v2927_v34 = vpop.f32.mrf.mxu1 }
 0x887   :  { %v3040_v11 = vpop.f32.mrf.mxu0  ;;  %v4471_v43 = vpop.eup %4470  ;;  %3130 = vst [vmem:[#allocation2 + $0x20] sm:$0xff] %v4469_v27  ;;  %3162 = vst [vmem:[#allocation3 + $0x20] sm:$0xff] %v3146_v20  ;;  %v3147_v55 = vmul.f32 %v2927_v34, %v5807_v26 }
 0x888   :  { %3164 = vst [vmem:[#allocation3 + $0x30] sm:$0xff] %v3148_v17  ;;  %v3149_v18 = vmul.f32 %v3040_v11, %v5809_v38  ;;  %v4473_v45 = vpop.eup %4472  ;;  %3132 = vst [vmem:[#allocation2 + $0x30] sm:$0xff] %v4471_v43  ;;  %v2931_v50 = vpop.f32.mrf.mxu1 }
 0x889   :  { %v3044_v3 = vpop.f32.mrf.mxu0  ;;  %v4475_v37 = vpop.eup %4474  ;;  %3131 = vst [vmem:[#allocation2 + $0x28] sm:$0xff] %v4473_v45  ;;  %3163 = vst [vmem:[#allocation3 + $0x28] sm:$0xff] %v3147_v55  ;;  %v3150_v24 = vmul.f32 %v2931_v50, %v5811_v56 }
 0x88a   :  { %3165 = vst [vmem:[#allocation3 + $0x38] sm:$0xff] %v3149_v18  ;;  %v3152_v42 = vmul.f32 %v3044_v3, %v5813_v5  ;;  %v4477_v54 = vpop.eup %4476  ;;  %3133 = vst [vmem:[#allocation2 + $0x38] sm:$0xff] %v4475_v37  ;;  %v2933_v44 = vpop.f32.mrf.mxu1 }
 0x88b   :  { %v3046_v39 = vpop.f32.mrf.mxu0  ;;  %v4479_v6 = vpop.eup %4478  ;;  %3134 = vst [vmem:[#allocation2 + $0x40] sm:$0xff] %v4477_v54  ;;  %3166 = vst [vmem:[#allocation3 + $0x40] sm:$0xff] %v3150_v24  ;;  %v3151_v26 = vmul.f32 %v2933_v44, %v5815_v8 }
 0x88c   :  { %3168 = vst [vmem:[#allocation3 + $0x50] sm:$0xff] %v3152_v42  ;;  %v3153_v38 = vmul.f32 %v3046_v39, %v5817_v35  ;;  %v4481_v1 = vpop.eup %4480  ;;  %3136 = vst [vmem:[#allocation2 + $0x50] sm:$0xff] %v4479_v6  ;;  %v2937_v28 = vpop.f32.mrf.mxu1 }
 0x88d   :  { %v3050_v12 = vpop.f32.mrf.mxu0  ;;  %v4483_v33 = vpop.eup %4482  ;;  %3135 = vst [vmem:[#allocation2 + $0x48] sm:$0xff] %v4481_v1  ;;  %3167 = vst [vmem:[#allocation3 + $0x48] sm:$0xff] %v3151_v26  ;;  %v3154_v56 = vmul.f32 %v2937_v28, %v5819_v25  ;;  %v5887_v25 = vmov 0.0  }
 0x88e   :  { %3169 = vst [vmem:[#allocation3 + $0x58] sm:$0xff] %v3153_v38  ;;  %v3156_v5 = vmul.f32 %v3050_v12, %v5821_v41  ;;  %v4485_v22 = vpop.eup %4484  ;;  %3137 = vst [vmem:[#allocation2 + $0x58] sm:$0xff] %v4483_v33  ;;  %v2939_v60 = vpop.f32.mrf.mxu1  ;;  %v5889_v41 = vmov 0.0  }
 0x88f   :  { %v3052_v49 = vpop.f32.mrf.mxu0  ;;  %v4487_v57 = vpop.eup %4486  ;;  %3138 = vst [vmem:[#allocation2 + $0x60] sm:$0xff] %v4485_v22  ;;  %3170 = vst [vmem:[#allocation3 + $0x60] sm:$0xff] %v3154_v56  ;;  %v3155_v8 = vmul.f32 %v2939_v60, %v5823_v52 }
 0x890   :  { %3172 = vst [vmem:[#allocation3 + $0x70] sm:$0xff] %v3156_v5  ;;  %v3157_v35 = vmul.f32 %v3052_v49, %v5825_v4  ;;  %v4489_v2 = vpop.eup %4488  ;;  %3140 = vst [vmem:[#allocation2 + $0x70] sm:$0xff] %v4487_v57 }
 0x891   :  { %v4491_v10 = vpop.eup %4490  ;;  %3139 = vst [vmem:[#allocation2 + $0x68] sm:$0xff] %v4489_v2  ;;  %3171 = vst [vmem:[#allocation3 + $0x68] sm:$0xff] %v3155_v8 }
 0x892   :  { %3173 = vst [vmem:[#allocation3 + $0x78] sm:$0xff] %v3157_v35  ;;  %3141 = vst [vmem:[#allocation2 + $0x78] sm:$0xff] %v4491_v10 }
 0x893 LB: > { %s3873_s23 = sshll.u32 %s4624_s8, 3  ;;  %v3204_v52 = vrot.slane %v4620_v23, 6  ;;  %v3205_v4 = vrot.slane %v4616_v21, 6  ;;  %v3206_v9 = vrot.slane %v4612_v41, 6  ;;  %v3207_v36 = vrot.slane %v4608_v25, 6  ;;  %s3179_s8 = sadd.s32 1, %s4624_s8   ;;  %s4624_s8 = sphi %s5895_s8, %s3179_s8   ;;  %v4620_v23 = vphi %v5893_v23, %v6285_v23   ;;  %v4616_v21 = vphi %v5891_v21, %v3277_v21   ;;  %v4612_v41 = vphi %v5889_v41, %v3278_v41   ;;  %v4608_v25 = vphi %v5887_v25, %v3279_v25  }
 0x894   : > { %s3185_s24 = sshra.s32 %s3873_s23, 3  ;;  %p3176_p6 = scmp.ge.s32.totalorder %s3179_s8, 4  }
 0x895   : > { %s5905_s13 = sshll.u32 %s3185_s24, 5  ;;  %4037 = vmatprep.subr.mxu1 (%p3176_p6), %v4875_v32  ;;  %4081 = vmatprep.subr.mxu0 (%p3176_p6), %v5035_v0  ;;  %v6296_v0 = vld [vmem:[#allocation32_spill] sm:$0xff] (%p3176_p6)  ;;  %vm3709_vm15 = vcmask (%p3176_p6), 7168  }
 0x896   : > { %s3189_s25 = scalar_lea.vmem [#allocation2], %s5905_s13  ;;  %s3195_s26 = scalar_lea.vmem [#allocation3], %s5905_s13  ;;  %4038 = vmatpush3.msra.mxu1 (%p3176_p6), %v4795_v16  ;;  %4082 = vmatpush3.msra.mxu0 (%p3176_p6), %v4955_v48  ;;  %v6289_v48 = vld [vmem:[#allocation59_spill] sm:$0xff] (%p3176_p6) }
 0x897   : > { %s3294_s14 = scalar_lea.vmem [#allocation4], %s5905_s13  ;;  %4039 = vmatprep.subr.mxu1 (%p3176_p6), %v4870_v31  ;;  %4083 = vmatprep.subr.mxu0 (%p3176_p6), %v5030_v63  ;;  %v6293_v63 = vld [vmem:[#allocation58_spill] sm:$0xff] (%p3176_p6) }
 0x898   :  { %4040 = vmatpush3.msra.mxu1 (%p3176_p6), %v4790_v15  ;;  %4084 = vmatpush3.msra.mxu0 (%p3176_p6), %v4950_v47  ;;  %v6286_v15 = vld [vmem:[#allocation22_spill] sm:$0xff] (%p3176_p6)  ;;  %v6287_v47 = vld [vmem:[#allocation47_spill] sm:$0xff] (%p3176_p6) }
 0x899   : > { %v3190_v20 = vld [vmem:[%s3189_s25] sm:$0xff]  ;;  %v3191_v27 = vld [vmem:[%s3189_s25 + $0x8] sm:$0xff]  ;;  %v3192_v55 = vld [vmem:[%s3189_s25 + $0x10] sm:$0xff]  ;;  %4041 = vmatprep.subr.mxu1 (%p3176_p6), %v4865_v30  ;;  %4085 = vmatprep.subr.mxu0 (%p3176_p6), %v5025_v62 }
 0x89a   : > { %v3196_v17 = vld [vmem:[%s3195_s26] sm:$0xff]  ;;  %v3212_v34 = vmul.f32 %v3204_v52, %v3190_v20  ;;  %v3197_v11 = vld [vmem:[%s3195_s26 + $0x8] sm:$0xff]  ;;  %v3213_v43 = vmul.f32 %v3205_v4, %v3191_v27  ;;  %v3198_v18 = vld [vmem:[%s3195_s26 + $0x10] sm:$0xff]  ;;  %v3214_v45 = vmul.f32 %v3206_v9, %v3192_v55  ;;  %4042 = vmatpush3.msra.mxu1 (%p3176_p6), %v4785_v14  ;;  %4086 = vmatpush3.msra.mxu0 (%p3176_p6), %v4945_v46 }
 0x89b   : > { %v3193_v50 = vld [vmem:[%s3189_s25 + $0x18] sm:$0xff]  ;;  %4043 = vmatprep.subr.mxu1 (%p3176_p6), %v4860_v29  ;;  %4087 = vmatprep.subr.mxu0 (%p3176_p6), %v5020_v61  ;;  %v6288_v30 = vld [vmem:[#allocation34_spill] sm:$0xff] (%p3176_p6) }
 0x89c   : > { %v3199_v3 = vld [vmem:[%s3195_s26 + $0x18] sm:$0xff]  ;;  %v3216_v37 = vadd.f32 %v3212_v34, %v3196_v17  ;;  %v3217_v24 = vadd.f32 %v3213_v43, %v3197_v11  ;;  %v3215_v42 = vmul.f32 %v3207_v36, %v3193_v50  ;;  %v3218_v54 = vadd.f32 %v3214_v45, %v3198_v18  ;;  %4044 = vmatpush3.msra.mxu1 (%p3176_p6), %v6286_v15  ;;  %v6291_v14 = vld [vmem:[#allocation46_spill] sm:$0xff] (%p3176_p6) }
 0x89d   :  { %4088 = vmatpush3.msra.mxu0 (%p3176_p6), %v6287_v47  ;;  %4045 = vmatprep.subr.mxu1 (%p3176_p6), %v6288_v30  ;;  %v6290_v62 = vld [vmem:[#allocation21_spill] sm:$0xff] (%p3176_p6)  ;;  %v6294_v29 = vld [vmem:[#allocation20_spill] sm:$0xff] (%p3176_p6) }
 0x89e   : > { %v3224_v44 = vrot.slane %v3216_v37, 6  ;;  %v3225_v39 = vrot.slane %v3217_v24, 6  ;;  %v3219_v6 = vadd.f32 %v3215_v42, %v3199_v3  ;;  %v3226_v26 = vrot.slane %v3218_v54, 6  ;;  %4089 = vmatprep.subr.mxu0 (%p3176_p6), %v6289_v48  ;;  %4046 = vmatpush3.msra.mxu1 (%p3176_p6), %v6290_v62  ;;  %v6292_v46 = vld [vmem:[#allocation33_spill] sm:$0xff] (%p3176_p6)  ;;  %v6326_v47 = vld [vmem:[#allocation12_spill] sm:$0xff] (%p3176_p6)  ;;  %v3320_v62 = vld [vmem:[#allocation5 + $0x68] sm:$0xff] (%p3176_p6) }
 0x89f   :  { %4090 = vmatpush3.msra.mxu0 (%p3176_p6), %v6291_v14  ;;  %4047 = vmatprep.subr.mxu1 (%p3176_p6), %v6292_v46  ;;  %v6295_v61 = vld [vmem:[#allocation45_spill] sm:$0xff] (%p3176_p6)  ;;  %v3322_v46 = vld [vmem:[#allocation5 + $0x48] sm:$0xff] (%p3176_p6) }
 0x8a0   : > { %v3232_v38 = vmul.f32 %v3224_v44, %v3190_v20  ;;  %v3233_v1 = vmul.f32 %v3225_v39, %v3191_v27  ;;  %v3227_v28 = vrot.slane %v3219_v6, 6  ;;  %v3234_v12 = vmul.f32 %v3226_v26, %v3192_v55  ;;  %4091 = vmatprep.subr.mxu0 (%p3176_p6), %v6293_v63  ;;  %4048 = vmatpush3.msra.mxu1 (%p3176_p6), %v6294_v29  ;;  %v6327_v30 = vld [vmem:[#allocation37_spill] sm:$0xff] (%p3176_p6)  ;;  %v6328_v63 = vld [vmem:[#allocation24_spill] sm:$0xff] (%p3176_p6) }
 0x8a1   :  { %4092 = vmatpush3.msra.mxu0 (%p3176_p6), %v6295_v61  ;;  %4049 = vmatprep.subr.mxu1 (%p3176_p6), %v6296_v0  ;;  %v6329_v29 = vld [vmem:[#allocation49_spill] sm:$0xff] (%p3176_p6)  ;;  %v6330_v0 = vld [vmem:[#allocation11_spill] sm:$0xff] (%p3176_p6) }
 0x8a2   : > { %v3236_v33 = vadd.f32 %v3232_v38, %v3196_v17  ;;  %v3237_v56 = vadd.f32 %v3233_v1, %v3197_v11  ;;  %v3235_v5 = vmul.f32 %v3227_v28, %v3193_v50  ;;  %v3238_v22 = vadd.f32 %v3234_v12, %v3198_v18 }
 0x8a4   : > { %v3244_v60 = vrot.slane %v3236_v33, 6  ;;  %v3245_v49 = vrot.slane %v3237_v56, 6  ;;  %v3246_v57 = vrot.slane %v3238_v22, 6  ;;  %v3239_v8 = vadd.f32 %v3235_v5, %v3199_v3 }
 0x8a5   : > { %v3281_v9 = vsel %vm1579_vm10, %v3216_v37, %v3236_v33  ;;  %v3282_v34 = vsel %vm1579_vm10, %v3217_v24, %v3237_v56  ;;  %v3283_v45 = vsel %vm1579_vm10, %v3218_v54, %v3238_v22  ;;  %v6298_v56 = vld [vmem:[#allocation19_spill] sm:$0xff] (%p3176_p6)  ;;  %v6299_v22 = vld [vmem:[#allocation44_spill] sm:$0xff] (%p3176_p6) }
 0x8a6   : > { %v3252_v35 = vmul.f32 %v3244_v60, %v3190_v20  ;;  %v3253_v2 = vmul.f32 %v3245_v49, %v3191_v27  ;;  %v3254_v10 = vmul.f32 %v3246_v57, %v3192_v55  ;;  %v3247_v25 = vrot.slane %v3239_v8, 6  ;;  %4050 = vmatpush3.msra.mxu1 (%p3176_p6), %v6298_v56  ;;  %v6300_v60 = vld [vmem:[#allocation31_spill] sm:$0xff] (%p3176_p6)  ;;  %v6301_v49 = vld [vmem:[#allocation56_spill] sm:$0xff] (%p3176_p6)  ;;  %v6302_v57 = vld [vmem:[#allocation18_spill] sm:$0xff] (%p3176_p6) }
 0x8a7   : > { %v3284_v26 = vsel %vm1579_vm10, %v3219_v6, %v3239_v8  ;;  %v6297_v6 = vld [vmem:[#allocation57_spill] sm:$0xff] (%p3176_p6)  ;;  %4051 = vmatprep.subr.mxu1 (%p3176_p6), %v6300_v60  ;;  %v6303_v8 = vld [vmem:[#allocation43_spill] sm:$0xff] (%p3176_p6) }
 0x8a8   : > { %v3256_v41 = vadd.f32 %v3252_v35, %v3196_v17  ;;  %v3257_v21 = vadd.f32 %v3253_v2, %v3197_v11  ;;  %v3258_v23 = vadd.f32 %v3254_v10, %v3198_v18  ;;  %v3255_v52 = vmul.f32 %v3247_v25, %v3193_v50  ;;  %4093 = vmatprep.subr.mxu0 (%p3176_p6), %v6297_v6  ;;  %v6304_v35 = vld [vmem:[#allocation30_spill] sm:$0xff] (%p3176_p6)  ;;  %v6305_v2 = vld [vmem:[#allocation55_spill] sm:$0xff] (%p3176_p6)  ;;  %v6331_v6 = vld [vmem:[#allocation36_spill] sm:$0xff] (%p3176_p6) }
 0x8a9   :  { %4094 = vmatpush3.msra.mxu0 (%p3176_p6), %v6299_v22  ;;  %4052 = vmatpush3.msra.mxu1 (%p3176_p6), %v6302_v57  ;;  %v6332_v57 = vld [vmem:[#allocation23_spill] sm:$0xff] (%p3176_p6) }
 0x8aa   : > { %v3264_v4 = vrot.slane %v3256_v41, 6  ;;  %v3265_v36 = vrot.slane %v3257_v21, 6  ;;  %v3266_v43 = vrot.slane %v3258_v23, 6  ;;  %v3259_v42 = vadd.f32 %v3255_v52, %v3199_v3  ;;  %4095 = vmatprep.subr.mxu0 (%p3176_p6), %v6301_v49  ;;  %4053 = vmatprep.subr.mxu1 (%p3176_p6), %v6304_v35  ;;  %v6309_v52 = vld [vmem:[#allocation54_spill] sm:$0xff] (%p3176_p6)  ;;  %v3319_v49 = vld [vmem:[#allocation5 + $0x50] sm:$0xff] (%p3176_p6) }
 0x8ab   : > { %v3285_v38 = vsel %vm463_vm4, %v3281_v9, %v3256_v41  ;;  %v3286_v1 = vsel %vm463_vm4, %v3282_v34, %v3257_v21  ;;  %v3287_v37 = vsel %vm463_vm4, %v3283_v45, %v3258_v23  ;;  %4096 = vmatpush3.msra.mxu0 (%p3176_p6), %v6303_v8  ;;  %v6311_v34 = vld [vmem:[#allocation41_spill] sm:$0xff] (%p3176_p6)  ;;  %v6333_v8 = vld [vmem:[#allocation48_spill] sm:$0xff] (%p3176_p6) }
 0x8ac   : > { %v3272_v44 = vmul.f32 %v3264_v4, %v3190_v20  ;;  %v3273_v39 = vmul.f32 %v3265_v36, %v3191_v27  ;;  %v3274_v28 = vmul.f32 %v3266_v43, %v3192_v55  ;;  %v3267_v12 = vrot.slane %v3259_v42, 6  ;;  %4097 = vmatprep.subr.mxu0 (%p3176_p6), %v6305_v2  ;;  %v6310_v36 = vld [vmem:[#allocation16_spill] sm:$0xff] (%p3176_p6) }
 0x8ad   : > { %v3288_v20 = vsel %vm463_vm4, %v3284_v26, %v3259_v42  ;;  %v3530_v55 = vsub.f32 (%p3176_p6), 0.0, %v5653_v19  ;;  %v6312_v42 = vld [vmem:[#allocation28_spill] sm:$0xff] (%p3176_p6)  ;;  %v6314_v26 = vld [vmem:[#allocation15_spill] sm:$0xff] (%p3176_p6) }
 0x8ae   : > { %v3276_v5 = vadd.f32 %v3272_v44, %v3196_v17   ;;  %v3277_v21 = vadd.f32 %v3273_v39, %v3197_v11   ;;  %v3278_v41 = vadd.f32 %v3274_v28, %v3198_v18   ;;  %v3275_v24 = vmul.f32 %v3267_v12, %v3193_v50  ;;  %v6313_v44 = vld [vmem:[#allocation53_spill] sm:$0xff] (%p3176_p6)  ;;  %v6316_v28 = vld [vmem:[#allocation27_spill] sm:$0xff] (%p3176_p6)  ;;  %v6317_v12 = vld [vmem:[#allocation52_spill] sm:$0xff] (%p3176_p6) }
 0x8af   :  { %3178 = sbr.rel (!%p3176_p6) target bundleno = 2195 (0x893), region = 122  ;;  %v3529_v11 = vsub.f32 (%p3176_p6), 0.0, %v5659_v59  ;;  %v3531_v18 = vsub.f32 (%p3176_p6), 0.0, %v5673_v51  ;;  %v3532_v50 = vsub.f32 (%p3176_p6), 0.0, %v5669_v7  ;;  %v3535_v32 = vmul.f32 (%p3176_p6), 1.442695, %v3530_v55 }
 0x8b0   : > { %v3289_v54 = vsel %vm384_vm3, %v3285_v38, %v3276_v5  ;;  %v3290_v33 = vsel %vm384_vm3, %v3286_v1, %v3277_v21  ;;  %v3291_v27 = vsel %vm384_vm3, %v3287_v37, %v3278_v41  ;;  %v3279_v25 = vadd.f32 %v3275_v24, %v3199_v3   ;;  %v6307_v41 = vld [vmem:[#allocation42_spill] sm:$0xff] (%p3176_p6)  ;;  %v6315_v38 = vld [vmem:[#allocation40_spill] sm:$0xff] (%p3176_p6)  ;;  %v6319_v37 = vld [vmem:[#allocation39_spill] sm:$0xff] (%p3176_p6) }
 0x8b1   : > { %3295 = vst [vmem:[%s3294_s14] sm:$0xff] %v3289_v54  ;;  %3296 = vst [vmem:[%s3294_s14 + $0x8] sm:$0xff] %v3290_v33  ;;  %v6285_v23 = vmov %v3276_v5  ;;  %v3533_v3 = vmul.f32 (%p3176_p6), 1.442695, %v3529_v11  ;;  %v3537_v16 = vmul.f32 (%p3176_p6), 1.442695, %v3531_v18  ;;  %4098 = vmatpush3.msra.mxu0 (%p3176_p6), %v6307_v41  ;;  %v6318_v5 = vld [vmem:[#allocation14_spill] sm:$0xff] (%p3176_p6) }
 0x8b2   : > { %3297 = vst [vmem:[%s3294_s14 + $0x10] sm:$0xff] %v3291_v27  ;;  %v3292_v17 = vsel %vm384_vm3, %v3288_v20, %v3279_v25  ;;  %v3539_v31 = vmul.f32 (%p3176_p6), 1.442695, %v3532_v50  ;;  %v6306_v25 = vld [vmem:[#allocation17_spill] sm:$0xff] (%p3176_p6)  ;;  %4099 = vmatprep.subr.mxu0 (%p3176_p6), %v6309_v52  ;;  %v6320_v24 = vld [vmem:[#allocation26_spill] sm:$0xff] (%p3176_p6)  ;;  %v6321_v54 = vld [vmem:[#allocation51_spill] sm:$0xff] (%p3176_p6) }
 0x8b3   : > { %3298 = vst [vmem:[%s3294_s14 + $0x18] sm:$0xff] %v3292_v17  ;;  %4492 = vpow2.f32 (%p3176_p6), %v3533_v3  ;;  %4054 = vmatpush3.msra.mxu1 (%p3176_p6), %v6306_v25  ;;  %v6308_v23 = vld [vmem:[#allocation29_spill] sm:$0xff] (%p3176_p6)  ;;  %4100 = vmatpush3.msra.mxu0 (%p3176_p6), %v6311_v34  ;;  %v6323_v11 = vld [vmem:[#allocation38_spill] sm:$0xff] (%p3176_p6)  ;;  %v3315_v50 = vld [vmem:[#allocation5 + $0x30] sm:$0xff] (%p3176_p6) }
 0x8b4   :  { %4494 = vpow2.f32 %v3535_v32  ;;  %4055 = vmatprep.subr.mxu1 %v6308_v23  ;;  %4101 = vmatprep.subr.mxu0 %v6313_v44  ;;  %v3316_v20 = vld [vmem:[#allocation5] sm:$0xff]  ;;  %v3318_v55 = vld [vmem:[#allocation5 + $0x18] sm:$0xff]  ;;  %v3321_v25 = vld [vmem:[#allocation5 + $0x8] sm:$0xff] }
 0x8b5   :  { %4496 = vpow2.f32 %v3537_v16  ;;  %4056 = vmatpush3.msra.mxu1 %v6310_v36  ;;  %4102 = vmatpush3.msra.mxu0 %v6315_v38  ;;  %v6322_v17 = vld [vmem:[#allocation13_spill] sm:$0xff]  ;;  %v6325_v32 = vld [vmem:[#allocation50_spill] sm:$0xff] }
 0x8b6   :  { %4498 = vpow2.f32 %v3539_v31  ;;  %4057 = vmatprep.subr.mxu1 %v6312_v42  ;;  %4103 = vmatprep.subr.mxu0 %v6317_v12  ;;  %v6324_v3 = vld [vmem:[#allocation25_spill] sm:$0xff] }
 0x8b7   :  { %4058 = vmatpush3.msra.mxu1 %v6314_v26  ;;  %4104 = vmatpush3.msra.mxu0 %v6319_v37  ;;  %v3317_v31 = vld [vmem:[#allocation5 + $0x58] sm:$0xff]  ;;  %v3324_v23 = vld [vmem:[#allocation5 + $0x20] sm:$0xff] }
 0x8b8   :  { %4059 = vmatprep.subr.mxu1 %v6316_v28  ;;  %4105 = vmatprep.subr.mxu0 %v6321_v54  ;;  %v3580_v36 = vld [vmem:[%s6067_s11 + $0x38] sm:$0xff]  ;;  %v3323_v44 = vld [vmem:[#allocation5 + $0x40] sm:$0xff]  ;;  %v3325_v28 = vld [vmem:[#allocation5 + $0x10] sm:$0xff] }
 0x8b9   :  { %4060 = vmatpush3.msra.mxu1 %v6318_v5  ;;  %4106 = vmatpush3.msra.mxu0 %v6323_v11 }
 0x8ba   :  { %4061 = vmatprep.subr.mxu1 %v6320_v24  ;;  %v3300_v33 = vld [vmem:[#allocation4 + $0x8] sm:$0xff]  ;;  %v3302_v27 = vld [vmem:[#allocation4 + $0x18] sm:$0xff]  ;;  %v3299_v18 = vld [vmem:[#allocation4] sm:$0xff]  ;;  %4107 = vmatprep.subr.mxu0 %v6325_v32 }
 0x8bb   :  { %4062 = vmatpush3.msra.mxu1 %v6322_v17  ;;  %v3301_v16 = vld [vmem:[#allocation4 + $0x10] sm:$0xff]  ;;  %v3304_v15 = vld [vmem:[#allocation4 + $0x28] sm:$0xff]  ;;  %4108 = vmatpush3.msra.mxu0 %v6327_v30  ;;  %v3332_v48 = vmul.f32 %v3316_v20, %v3300_v33  ;;  %v3306_v14 = vld [vmem:[#allocation4 + $0x38] sm:$0xff]  ;;  %v3334_v61 = vmul.f32 %v3318_v55, %v3302_v27  ;;  %v3331_v56 = vmul.f32 %v3315_v50, %v3299_v18 }
 0x8bc   :  { %4063 = vmatprep.subr.mxu1 %v6324_v3  ;;  %4109 = vmatprep.subr.mxu0 %v6329_v29  ;;  %v3333_v22 = vmul.f32 %v3317_v31, %v3301_v16  ;;  %v3303_v60 = vld [vmem:[#allocation4 + $0x20] sm:$0xff]  ;;  %v3336_v35 = vmul.f32 %v3320_v62, %v3304_v15  ;;  %v3338_v2 = vmul.f32 %v3322_v46, %v3306_v14  ;;  %v3308_v41 = vld [vmem:[#allocation4 + $0x48] sm:$0xff]  ;;  %v3310_v52 = vld [vmem:[#allocation4 + $0x58] sm:$0xff] }
 0x8bd   :  { %4064 = vmatpush3.msra.mxu1 %v6326_v47  ;;  %4110 = vmatpush3.msra.mxu0 %v6331_v6  ;;  %v3307_v42 = vld [vmem:[#allocation4 + $0x40] sm:$0xff]  ;;  %v3340_v26 = vmul.f32 %v3324_v23, %v3308_v41  ;;  %v3312_v12 = vld [vmem:[#allocation4 + $0x68] sm:$0xff]  ;;  %v3328_v24 = vld [vmem:[#allocation5 + $0x70] sm:$0xff] }
 0x8be   :  { %4065 = vmatprep.subr.mxu1 %v6328_v63  ;;  %4111 = vmatprep.subr.mxu0 %v6333_v8  ;;  %v3314_v54 = vld [vmem:[#allocation4 + $0x78] sm:$0xff]  ;;  %v3330_v33 = vld [vmem:[#allocation5 + $0x28] sm:$0xff]  ;;  %v3339_v11 = vmul.f32 %v3323_v44, %v3307_v42  ;;  %v3311_v18 = vld [vmem:[#allocation4 + $0x60] sm:$0xff] }
 0x8bf   :  { %4066 = vmatpush3.msra.mxu1 %v6330_v0  ;;  %3423 = vmatprep.mubr.f32.mxu1 %v3332_v48  ;;  %v3346_v50 = vmul.f32 %v3330_v33, %v3314_v54  ;;  %v3327_v3 = vld [vmem:[#allocation5 + $0x60] sm:$0xff]  ;;  %v3313_v32 = vld [vmem:[#allocation4 + $0x70] sm:$0xff]  ;;  %v3329_v16 = vld [vmem:[#allocation5 + $0x78] sm:$0xff] }
 0x8c0   :  { %v4493_v10 = vpop.eup %4492  ;;  %4067 = vmatprep.subr.mxu1 %v6332_v57  ;;  %3508 = vmatprep.mubr.f32.mxu0 %v3334_v61  ;;  %v3579_v15 = vld [vmem:[%s6067_s11 + $0x30] sm:$0xff]  ;;  %v3577_v47 = vld [vmem:[%s6067_s11 + $0x20] sm:$0xff]  ;;  %v3576_v30 = vld [vmem:[%s6067_s11 + $0x18] sm:$0xff] }
 0x8c1   :  { %v4495_v21 = vpop.eup %4494  ;;  %v3541_v4 = vadd.f32 1.0, %v4493_v10  ;;  %v3305_v10 = vld [vmem:[#allocation4 + $0x30] sm:$0xff]  ;;  %v3574_v62 = vld [vmem:[%s6067_s11 + $0x8] sm:$0xff]  ;;  %v3573_v14 = vld [vmem:[%s6067_s11] sm:$0xff] }
 0x8c2   :  { %v4497_v9 = vpop.eup %4496  ;;  %v3542_v43 = vadd.f32 1.0, %v4495_v21  ;;  %v6334_v21 = vld [vmem:[#allocation10_spill] sm:$0xff]  ;;  %v3575_v48 = vld [vmem:[%s6067_s11 + $0x10] sm:$0xff] }
 0x8c3   :  { %v4499_v45 = vpop.eup %4498  ;;  %4500 = vrcp.f32 %v3541_v4  ;;  %v3543_v39 = vadd.f32 1.0, %v4497_v9  ;;  %4068 = vmatpush3.msra.mxu1 %v6334_v21  ;;  %v3326_v4 = vld [vmem:[#allocation5 + $0x38] sm:$0xff]  ;;  %v6335_v9 = vld [vmem:[#allocation35_spill] sm:$0xff]  ;;  %v3879_v46 = vld [vmem:[%s6065_s9 + $0x1] ss:$0 sm:$0xff] }
 0x8c4   :  { %4502 = vrcp.f32 %v3542_v43  ;;  %v3544_v1 = vadd.f32 1.0, %v4499_v45  ;;  %4112 = vmatpush3.msra.mxu0 %v6335_v9  ;;  %3424 = vmatmul.mubr.f32.vlgmr.msra.gmra.mxu1 %v3331_v56  ;;  %v3335_v43 = vmul.f32 %v3319_v49, %v3303_v60  ;;  %v3337_v45 = vmul.f32 %v3321_v25, %v3305_v10 }
 0x8c5   :  { %4504 = vrcp.f32 %v3543_v39  ;;  %3509 = vmatmul.mubr.f32.vlgmr.msra.gmra.mxu0 %v3333_v22  ;;  %3428 = vmatprep.mubr.f32.mxu1 %v3336_v35  ;;  %v3342_v38 = vmul.f32 %v3326_v4, %v3310_v52  ;;  %v3355_v61 = vmul.f32 %v3879_v46, %v5697_v13  ;;  %v3356_v35 = vmul.f32 %v3879_v46, %v5705_v58 }
 0x8c6   :  { %4506 = vrcp.f32 %v3544_v1  ;;  %3513 = vmatprep.mubr.f32.mxu0 %v3338_v2  ;;  %v3309_v1 = vld [vmem:[#allocation4 + $0x50] sm:$0xff]  ;;  %4241 = vmatprep.subr.mxu1 %v3580_v36  ;;  %v3357_v13 = vmul.f32 %v3879_v46, %v5714_v53 }
 0x8c7   :  { %4242 = vmatpush3.msra.mxu1 %v3580_v36  ;;  %v3341_v55 = vmul.f32 %v3325_v28, %v3309_v1  ;;  %v3358_v28 = vmul.f32 %v3879_v46, %v5721_v40 }
 0x8c8   :  { %3429 = vmatmul.mubr.f32.gmra.mxu1 %v3335_v43  ;;  %4243 = vmatprep.subr.mxu1 %v3579_v15 }
 0x8c9   :  { %3514 = vmatmul.mubr.f32.gmra.mxu0 %v3337_v45  ;;  %3433 = vmatprep.mubr.f32.mxu1 %v3340_v26 }
 0x8ca   :  { %3518 = vmatprep.mubr.f32.mxu0 %v3342_v38  ;;  %4244 = vmatpush3.msra.mxu1 %v3579_v15 }
 0x8cc   :  { %3434 = vmatmul.mubr.f32.gmra.mxu1 %v3339_v11  ;;  %v3880_v11 = vld [vmem:[#allocation6] ss:$0 sm:$0xff] }
 0x8cd   :  { %3519 = vmatmul.mubr.f32.gmra.mxu0 %v3341_v55 }
 0x8ce   :  { %3523 = vmatprep.mubr.f32.mxu0 %v3346_v50 }
 0x8d0   :  { %v4501_v34 = vpop.eup %4500 }
 0x8d1   :  { %v4503_v39 = vpop.eup %4502  ;;  %v3549_v5 = vmul.f32 %v4501_v34, %v5659_v59  ;;  %v3344_v59 = vmul.f32 %v3328_v24, %v3312_v12 }
 0x8d2   :  { %v4505_v37 = vpop.eup %4504  ;;  %v3550_v27 = vmul.f32 %v4503_v39, %v5653_v19  ;;  %v3343_v19 = vmul.f32 %v3327_v3, %v3311_v18 }
 0x8d3   :  { %v4507_v20 = vpop.eup %4506  ;;  %3557 = vrot.lane.b32.xlu0 %v3549_v5, %s4630_s6  ;;  %v3551_v17 = vmul.f32 %v4505_v37, %v5673_v51  ;;  %v3345_v51 = vmul.f32 %v3329_v16, %v3313_v32  ;;  %3438 = vmatprep.mubr.f32.mxu1 %v3344_v59 }
 0x8d4   :  { %v3552_v31 = vmul.f32 %v4507_v20, %v5669_v7  ;;  %3439 = vmatmul.mubr.f32.gmra.mxu1 %v3343_v19  ;;  %v3578_v7 = vld [vmem:[%s6067_s11 + $0x28] sm:$0xff] }
 0x8d5   :  { %3561 = vrot.lane.b32.xlu1 %v3551_v17, %s4630_s6  ;;  %3524 = vmatmul.mubr.f32.gmra.mxu0 %v3345_v51 }
 0x8d6   :  { %4245 = vmatprep.subr.mxu1 %v3578_v7 }
 0x8d7   :  { %3559 = vrot.lane.b32.xlu0 %v3550_v27, %s4630_s6  ;;  %4246 = vmatpush3.msra.mxu1 %v3578_v7 }
 0x8d8   :  { %4247 = vmatprep.subr.mxu1 %v3577_v47 }
 0x8d9   :  { %3563 = vrot.lane.b32.xlu1 %v3552_v31, %s4630_s6  ;;  %4248 = vmatpush3.msra.mxu1 %v3577_v47 }
 0x8da   :  { %4249 = vmatprep.subr.mxu1 %v3576_v30 }
 0x8db   :  { %4250 = vmatpush3.msra.mxu1 %v3576_v30 }
 0x8dc   :  { %4251 = vmatprep.subr.mxu1 %v3575_v48 }
 0x8dd   :  { %4252 = vmatpush3.msra.mxu1 %v3575_v48 }
 0x8de   :  { %4253 = vmatprep.subr.mxu1 %v3574_v62 }
 0x8df   :  { %4254 = vmatpush3.msra.mxu1 %v3574_v62 }
 0x8e0   :  { %4255 = vmatprep.subr.mxu1 %v3573_v14 }
 0x8e1   :  { %4256 = vmatpush3.msra.mxu1 %v3573_v14 }
 0x945   :  { %v3558_v22 = vpop.permute.xlu0 %3557 }
 0x947   :  { %v3562_v44 = vpop.permute.xlu1 %3561 }
 0x949   :  { %v3560_v36 = vpop.permute.xlu0 %3559 }
 0x94b   :  { %v3564_v20 = vpop.permute.xlu1 %3563 }
 0x984   :  { %v4069_v63 = vpop.f32.mrf.mxu1 }
 0x985   :  { %v4113_v29 = vpop.f32.mrf.mxu0 }
 0x986   :  { %v4070_v0 = vpop.f32.mrf.mxu1 }
 0x987   :  { %v4114_v6 = vpop.f32.mrf.mxu0  ;;  %v4071_v56 = vadd.f32 %v4070_v0, %v4069_v63 }
 0x988   :  { %v4072_v60 = vpop.f32.mrf.mxu1  ;;  %v4115_v8 = vadd.f32 %v4114_v6, %v4113_v29 }
 0x989   :  { %v4116_v49 = vpop.f32.mrf.mxu0  ;;  %v3426_v57 = vadd.f32 %v4071_v56, %v3355_v61 }
 0x98a   :  { %v4073_v2 = vpop.f32.mrf.mxu1 }
 0x98b   :  { %v4117_v10 = vpop.f32.mrf.mxu0  ;;  %v4074_v25 = vadd.f32 %v4073_v2, %v4072_v60  ;;  %v3511_v41 = vadd.f32 %v4115_v8, %v3426_v57 }
 0x98c   :  { %v4075_v21 = vpop.f32.mrf.mxu1  ;;  %v4118_v4 = vadd.f32 %v4117_v10, %v4116_v49 }
 0x98d   :  { %v4119_v23 = vpop.f32.mrf.mxu0  ;;  %v3431_v52 = vadd.f32 %v4074_v25, %v3356_v35  ;;  %v3569_v9 = vmul.f32 %v3558_v22, %v3511_v41 }
 0x98e   :  { %v4076_v34 = vpop.f32.mrf.mxu1 }
 0x98f   :  { %v4120_v43 = vpop.f32.mrf.mxu0  ;;  %v4077_v45 = vadd.f32 %v4076_v34, %v4075_v21  ;;  %4257 = vmatprep.mubr.msk.f32.mxu1 %vm588_vm5, %v3569_v9  ;;  %v3516_v42 = vadd.f32 %v4118_v4, %v3431_v52 }
 0x990   :  { %v4121_v38 = vadd.f32 %v4120_v43, %v4119_v23 }
 0x991   :  { %v3436_v26 = vadd.f32 %v4077_v45, %v3357_v13  ;;  %v3570_v1 = vmul.f32 %v3560_v36, %v3516_v42 }
 0x993   :  { %4258 = vmatmul.mubr.msk.f32.vlgmr.msra.gmra.mxu1 %vm588_vm5, %v3570_v1  ;;  %v3521_v53 = vadd.f32 %v4121_v38, %v3436_v26 }
 0x994   :  { %v4078_v58 = vpop.f32.mrf.mxu1 }
 0x995   :  { %v4122_v39 = vpop.f32.mrf.mxu0  ;;  %v3571_v33 = vmul.f32 %v3562_v44, %v3521_v53 }
 0x996   :  { %v4079_v12 = vpop.f32.mrf.mxu1 }
 0x997   :  { %v4123_v5 = vpop.f32.mrf.mxu0  ;;  %v4080_v37 = vadd.f32 %v4079_v12, %v4078_v58  ;;  %4260 = vmatprep.mubr.msk.f32.mxu1 %vm588_vm5, %v3571_v33 }
 0x998   :  { %v4124_v54 = vadd.f32 %v4123_v5, %v4122_v39 }
 0x999   :  { %v3441_v24 = vadd.f32 %v4080_v37, %v3358_v28 }
 0x99b   :  { %v3526_v27 = vadd.f32 %v4124_v54, %v3441_v24 }
 0x99d   :  { %v3572_v17 = vmul.f32 %v3564_v20, %v3526_v27 }
 0x99f   :  { %4261 = vmatmul.mubr.msk.f32.gmra.mxu1 %vm588_vm5, %v3572_v17 }
 0xa53   :  { %v4259_v55 = vpop.f32.mrf.mxu1 }
 0xa54   :  { %v3672_v18 = vadd.f32 %v4259_v55, %v3880_v11 }
 0xa55   :  { %v3666_v40 = vpop.f32.mrf.mxu1 }
 0xa56   :  { %v3686_v59 = vsub.f32 0.0, %v3672_v18  ;;  %v3667_v50 = vadd.f32 %v3880_v11, %v3666_v40 }
 0xa58   :  { %v3691_v3 = vmul.f32 1.442695, %v3686_v59  ;;  %v3685_v32 = vsub.f32 0.0, %v3667_v50 }
 0xa5a   :  { %4508 = vpow2.f32 %v3691_v3  ;;  %v3689_v16 = vmul.f32 1.442695, %v3685_v32 }
 0xa5c   :  { %4510 = vpow2.f32 %v3689_v16 }
 0xa5f   :  { %v4262_v31 = vpop.f32.mrf.mxu1 }
 0xa60   :  { %v3682_v19 = vadd.f32 %v4262_v31, %v3880_v11 }
 0xa61   :  { %v3676_v51 = vpop.f32.mrf.mxu1 }
 0xa62   :  { %v3688_v15 = vsub.f32 0.0, %v3682_v19  ;;  %v3677_v7 = vadd.f32 %v3880_v11, %v3676_v51 }
 0xa64   :  { %v3695_v47 = vmul.f32 1.442695, %v3688_v15  ;;  %v3687_v30 = vsub.f32 0.0, %v3677_v7 }
 0xa66   :  { %4512 = vpow2.f32 %v3695_v47  ;;  %v3693_v48 = vmul.f32 1.442695, %v3687_v30 }
 0xa67   :  { %v4509_v62 = vpop.eup %4508 }
 0xa68   :  { %4514 = vpow2.f32 %v3693_v48  ;;  %v3698_v14 = vadd.f32 1.0, %v4509_v62 }
 0xa69   :  { %v4511_v46 = vpop.eup %4510 }
 0xa6a   :  { %4516 = vrcp.f32 %v3698_v14  ;;  %v3697_v63 = vadd.f32 1.0, %v4511_v46 }
 0xa6c   :  { %4518 = vrcp.f32 %v3697_v63 }
 0xa73   :  { %v4513_v29 = vpop.eup %4512 }
 0xa74   :  { %v3700_v61 = vadd.f32 1.0, %v4513_v29 }
 0xa75   :  { %v4515_v0 = vpop.eup %4514 }
 0xa76   :  { %4520 = vrcp.f32 %v3700_v61  ;;  %v3699_v6 = vadd.f32 1.0, %v4515_v0 }
 0xa77   :  { %v4517_v56 = vpop.eup %4516 }
 0xa78   :  { %4522 = vrcp.f32 %v3699_v6  ;;  %3711 = vst.msk [vmem:[%s6071_s15 + $0x8] sm:$0xff] %vm3709_vm15, %v4517_v56 }
 0xa79   :  { %v4519_v22 = vpop.eup %4518 }
 0xa7a   :  { %3710 = vst.msk [vmem:[%s6071_s15] sm:$0xff] %vm3709_vm15, %v4519_v22 }
 0xa83   :  { %v4521_v60 = vpop.eup %4520 }
 0xa84   :  { %3713 = vst.msk [vmem:[%s6071_s15 + $0x18] sm:$0xff] %vm3709_vm15, %v4521_v60 }
 0xa85   :  { %v4523_v49 = vpop.eup %4522 }
 0xa86   :  { %3712 = vst.msk [vmem:[%s6071_s15 + $0x10] sm:$0xff] %vm3709_vm15, %v4523_v49 }
 0xa87   :  { %3718 = vsyncpa [#allocation8], 1 }

</bundles_post_ra>
